<compile_context>
chip_gen: v6e
topology: v6e:2x2x1
jax: 0.10.0
libtpu: 0.0.40
codegen_flags: <defaults>
</compile_context>

<pallas_src>
import functools

import jax
import jax.numpy as jnp
from jax.experimental import pallas as pl
from jax.experimental.pallas import tpu as pltpu


def _fused_kernel(x_ref, w1f_ref, w2f_ref, b2f_ref, gam_ref, bet_ref, o_ref,
                  zbuf_ref, zsum_ref, sumsq_ref, scale_ref, shift_ref,
                  *, rows, H, fold, M, eps, keep_z):
    p = pl.program_id(0)   # phase: 0 = stats, 1 = normalize + fc2
    i = pl.program_id(1)   # row tile

    @pl.when(jnp.logical_and(p == 0, i == 0))
    def _init():
        zsum_ref[...] = jnp.zeros_like(zsum_ref)
        sumsq_ref[...] = jnp.zeros_like(sumsq_ref)

    @pl.when(p == 0)
    def _stats():
        z = jnp.dot(x_ref[...], w1f_ref[...], preferred_element_type=jnp.float32)
        if keep_z:
            start = pl.multiple_of(i * rows, rows)
            zbuf_ref[pl.ds(start, rows), :] = z
        # Column reductions on VPU/XLU; keeps MXU to a single push per tile and
        # avoids materializing z and z*z as MXU LHS operands (vreg pressure).
        zsum_ref[...] += jnp.sum(z, axis=0, keepdims=True)
        sumsq_ref[...] += jnp.sum(z * z, axis=0, keepdims=True)

    @pl.when(jnp.logical_and(p == 1, i == 0))
    def _finalize():
        s = zsum_ref[...]
        q = sumsq_ref[...]
        if fold > 1:
            # Combine per-fold partial sums: comb[a, b] = 1 iff a == b (mod H).
            # Built once from 2-D iota + equality (no mod/div), consumed by one
            # tiny (1, Hf) @ (Hf, Hf) matmul; result is already fold-replicated.
            hf = H * fold
            r = jax.lax.broadcasted_iota(jnp.int32, (hf, hf), 0)
            c = jax.lax.broadcasted_iota(jnp.int32, (hf, hf), 1)
            d = r - c
            comb = jnp.zeros((hf, hf), jnp.float32)
            for k in range(-(fold - 1), fold):
                comb = comb + (d == k * H).astype(jnp.float32)
            s = jnp.dot(s, comb, preferred_element_type=jnp.float32)
            q = jnp.dot(q, comb, preferred_element_type=jnp.float32)
        inv_m = jnp.float32(1.0 / M)
        mean = s * inv_m
        var = jnp.maximum(q * inv_m - mean * mean, 0.0)
        sc = gam_ref[...] * jax.lax.rsqrt(var + jnp.float32(eps))
        scale_ref[...] = sc
        shift_ref[...] = bet_ref[...] - mean * sc

    @pl.when(p == 1)
    def _apply():
        if keep_z:
            start = pl.multiple_of(i * rows, rows)
            z = zbuf_ref[pl.ds(start, rows), :]
        else:
            # z did not fit VMEM: recompute fc1 for this tile (tiny MXU cost).
            z = jnp.dot(x_ref[...], w1f_ref[...], preferred_element_type=jnp.float32)
        y = jnp.maximum(z * scale_ref[...] + shift_ref[...], 0.0)
        out = jnp.dot(y, w2f_ref[...], preferred_element_type=jnp.float32) + b2f_ref[...]
        o_ref[...] = out.astype(o_ref.dtype)


def choose_fold(D, E, M):
    """Row-fold factor for 128-lane density (fold=4 preferred; larger folds only
    multiply wasted block-diagonal MXU FLOPs)."""
    for f in (4, 2, 8, 16):
        if (D * f) % 128 == 0 and (E * f) % 128 == 0 and M % (8 * f) == 0:
            return f
    return 1


def prepare_params(w1, b1, gamma, beta, w2, b2, *, fold):
    """Hoisted (once-per-model) weight folding. b1 cancels exactly under
    training-mode BatchNorm, so it never enters the kernel."""
    del b1
    eye = jnp.eye(fold, dtype=w1.dtype)
    w1f = jnp.kron(eye, w1)                 # (D*fold, H*fold) block-diagonal
    w2f = jnp.kron(eye, w2)                 # (H*fold, E*fold) block-diagonal
    b2f = jnp.tile(b2, (1, fold))           # (1, E*fold)
    gammaf = jnp.tile(gamma, (1, fold))     # (1, H*fold)
    betaf = jnp.tile(beta, (1, fold))       # (1, H*fold)
    return w1f, w2f, b2f, gammaf, betaf


def node_decoder_forward(x, w1f, w2f, b2f, gammaf, betaf, *, fold,
                         block_rows=8192, eps=1e-5):
    """x: (B, N, D) float32; prepared (folded) params from prepare_params.
    Returns (B, N, E)."""
    B, N, D = x.shape
    Df, Hf = w1f.shape
    Ef = w2f.shape[1]
    H = Hf // fold
    E = Ef // fold
    M = B * N
    assert Df == D * fold and Hf == H * fold and Ef == E * fold

    step = 8 * fold
    if M % step == 0:
        # Cap the tile so it stays well inside the scoped VMEM limit on all gens
        # (v7x has half the VMEM of v5e/v6e).
        per_row = 4 * (2 * Df + 3 * Hf + 2 * Ef)
        max_rows = max(8, ((12 * 1024 * 1024) // per_row) // 8 * 8)
        rows_req = min(min(block_rows, M) // fold, max_rows)
        tm = max(step, (rows_req * fold // step) * step)
        while M % tm:
            tm -= step
    else:
        # TODO(synk): ragged M (not a multiple of 8*fold) needs row-masked stats;
        # fall back to a single full-extent block (fold is 1 in this case).
        tm = M

    rows = tm // fold
    ntiles = M // tm

    # Keep z = x@W1 resident in VMEM scratch when it fits; otherwise recompute
    # fc1 in phase 1 (static switch) so the kernel scales to large M.
    keep_z = (M // fold) * Hf * 4 <= 8 * 1024 * 1024
    zbuf_rows = (M // fold) if keep_z else 8

    # Folded (lane-dense) view: `fold` consecutive rows packed along lanes.
    x4 = x.reshape(M // fold, Df)

    if keep_z:
        # Phase 1 does not need x: pin its block to the last phase-0 tile so no
        # redundant DMA is issued.
        x_map = lambda p_, i_: (i_ * (1 - p_) + (ntiles - 1) * p_, 0)
    else:
        x_map = lambda p_, i_: (i_, 0)

    def _const(r, c):
        return pl.BlockSpec((r, c), lambda p_, i_: (0, 0))

    in_specs = [
        pl.BlockSpec((rows, Df), x_map),
        _const(Df, Hf),   # w1f
        _const(Hf, Ef),   # w2f
        _const(1, Ef),    # b2f
        _const(1, Hf),    # gammaf
        _const(1, Hf),    # betaf
    ]
    # Output block pinned to 0 during phase 0 (never written there, so no
    # garbage writeback); written once per tile in phase 1.
    out_specs = pl.BlockSpec((rows, Ef), lambda p_, i_: (i_ * p_, 0))

    scratch_shapes = [
        pltpu.VMEM((zbuf_rows, Hf), jnp.float32),   # z buffer (or tiny dummy)
        pltpu.VMEM((1, Hf), jnp.float32),           # sum(z)
        pltpu.VMEM((1, Hf), jnp.float32),           # sum(z*z)
        pltpu.VMEM((1, Hf), jnp.float32),           # scale
        pltpu.VMEM((1, Hf), jnp.float32),           # shift
    ]

    fc1_passes = 1 if keep_z else 2
    cost = pl.CostEstimate(
        flops=2 * (M // fold) * (Df * Hf * fc1_passes + Hf * Ef),
        transcendentals=Hf,
        bytes_accessed=4 * (M * D * fc1_passes + M * E + Df * Hf + Hf * Ef
                            + Ef + 2 * Hf),
    )

    kernel = functools.partial(_fused_kernel, rows=rows, H=H, fold=fold, M=M,
                               eps=eps, keep_z=keep_z)

    out4 = pl.pallas_call(
        kernel,
        out_shape=jax.ShapeDtypeStruct((M // fold, Ef), jnp.float32),
        grid=(2, ntiles),
        in_specs=in_specs,
        out_specs=out_specs,
        scratch_shapes=scratch_shapes,
        compiler_params=pltpu.CompilerParams(
            dimension_semantics=("arbitrary", "arbitrary")),
        cost_estimate=cost,
    )(x4, w1f, w2f, b2f, gammaf, betaf)

    return out4.reshape(B, N, E)


def init_params(key, input_dim, intermediate_layer, embedding_size):
    """Deterministic init mimicking PyTorch nn.Linear defaults (uniform)."""
    k1, k2, k3, k4 = jax.random.split(key, 4)
    lim1 = 1.0 / jnp.sqrt(input_dim)
    lim2 = 1.0 / jnp.sqrt(intermediate_layer)
    w1 = jax.random.uniform(k1, (input_dim, intermediate_layer),
                            minval=-lim1, maxval=lim1, dtype=jnp.float32)
    b1 = jax.random.uniform(k2, (1, intermediate_layer),
                            minval=-lim1, maxval=lim1, dtype=jnp.float32)
    w2 = jax.random.uniform(k3, (intermediate_layer, embedding_size),
                            minval=-lim2, maxval=lim2, dtype=jnp.float32)
    b2 = jax.random.uniform(k4, (1, embedding_size),
                            minval=-lim2, maxval=lim2, dtype=jnp.float32)
    gamma = jnp.ones((1, intermediate_layer), jnp.float32)   # BN weight
    beta = jnp.zeros((1, intermediate_layer), jnp.float32)   # BN bias
    return w1, b1, gamma, beta, w2, b2


def reference_forward(x, w1, b1, gamma, beta, w2, b2):
    """Pure-JAX reference of the PyTorch forward (use_norm='use_bn', training)."""
    h = jnp.einsum('bnd,dh->bnh', x, w1) + b1[0]
    mean = jnp.mean(h, axis=(0, 1), keepdims=True)
    var = jnp.mean((h - mean) ** 2, axis=(0, 1), keepdims=True)
    y = (h - mean) / jnp.sqrt(var + 1e-5) * gamma[0] + beta[0]
    y = jnp.maximum(y, 0.0)
    return jnp.einsum('bnh,he->bne', y, w2) + b2[0]


if __name__ == "__main__":
    # x is (batch, num_nodes, input_dim)
    B, N = 2, 1024
    input_dim, intermediate_layer, embedding_size = 32, 64, 32

    key = jax.random.PRNGKey(0)
    kx, kp = jax.random.split(key)
    x = jax.random.normal(kx, (B, N, input_dim), dtype=jnp.float32)
    params = init_params(kp, input_dim, intermediate_layer, embedding_size)
    w1, b1, gamma, beta, w2, b2 = params

    # Hoisted once: fold choice + weight folding (kron / tile) out of the forward.
    fold = choose_fold(input_dim, embedding_size, B * N)
    prep = prepare_params(w1, b1, gamma, beta, w2, b2, fold=fold)

    ref = reference_forward(x, *params)

    # Fast path: single fused kernel, one row tile per phase (2 grid steps).
    fwd = jax.jit(functools.partial(node_decoder_forward, fold=fold))
    out = jax.block_until_ready(fwd(x, *prep))
    assert out.shape == (B, N, embedding_size)
    assert jnp.allclose(out, ref, atol=1e-3, rtol=1e-3), "mismatch vs reference"

    # Multi-tile path (4 row tiles): exercises global-stat accumulation across
    # tiles and the resident-z reuse in phase 1.
    fwd_tiled = jax.jit(functools.partial(node_decoder_forward, fold=fold,
                                          block_rows=512))
    out_t = jax.block_until_ready(fwd_tiled(x, *prep))
    assert jnp.allclose(out_t, ref, atol=1e-3, rtol=1e-3), "mismatch (tiled)"

    print("KERNEL_OK")
</pallas_src>

<mosaic_0001>
module attributes {stable_mosaic.version = 11 : i64} {
  func.func @_fused_kernel(%arg0: i32, %arg1: i32, %arg2: memref<512x128xf32, #tpu.memory_space<vmem>>, %arg3: memref<128x256xf32, #tpu.memory_space<vmem>>, %arg4: memref<256x128xf32, #tpu.memory_space<vmem>>, %arg5: memref<1x128xf32, #tpu.memory_space<vmem>>, %arg6: memref<1x256xf32, #tpu.memory_space<vmem>>, %arg7: memref<1x256xf32, #tpu.memory_space<vmem>>, %arg8: memref<512x128xf32, #tpu.memory_space<vmem>>, %arg9: memref<512x256xf32, #tpu.memory_space<vmem>>, %arg10: memref<1x256xf32, #tpu.memory_space<vmem>>, %arg11: memref<1x256xf32, #tpu.memory_space<vmem>>, %arg12: memref<1x256xf32, #tpu.memory_space<vmem>>, %arg13: memref<1x256xf32, #tpu.memory_space<vmem>>) attributes {dimension_semantics = [#tpu.dimension_semantics<arbitrary>, #tpu.dimension_semantics<arbitrary>], iteration_bounds = array<i64: 2, 1>, scalar_prefetch = 0 : i64, scratch_operands = 5 : i64, tpu.core_type = #tpu.core_type<tc>, window_params = [{transform_indices = @transform_0, window_bounds = array<i64: 512, 128>}, {pipeline_mode = #tpu.pipeline_mode<synchronous>, transform_indices = @transform_1, window_bounds = array<i64: 128, 256>}, {pipeline_mode = #tpu.pipeline_mode<synchronous>, transform_indices = @transform_2, window_bounds = array<i64: 256, 128>}, {pipeline_mode = #tpu.pipeline_mode<synchronous>, transform_indices = @transform_3, window_bounds = array<i64: 1, 128>}, {pipeline_mode = #tpu.pipeline_mode<synchronous>, transform_indices = @transform_4, window_bounds = array<i64: 1, 256>}, {pipeline_mode = #tpu.pipeline_mode<synchronous>, transform_indices = @transform_5, window_bounds = array<i64: 1, 256>}, {transform_indices = @transform_6, window_bounds = array<i64: 512, 128>}]} {
    %c0_i32 = arith.constant 0 : i32
    %0 = arith.cmpi eq, %arg0, %c0_i32 : i32
    %c0_i32_0 = arith.constant 0 : i32
    %1 = arith.cmpi eq, %arg1, %c0_i32_0 : i32
    %2 = arith.andi %0, %1 : i1
    %3 = arith.extui %2 : i1 to i32
    %c0_i32_1 = arith.constant 0 : i32
    %4 = arith.cmpi ne, %3, %c0_i32_1 : i32
    scf.if %4 {
      %cst = arith.constant 0.000000e+00 : f32
      %16 = vector.broadcast %cst : f32 to vector<1x256xf32>
      %c0 = arith.constant 0 : index
      %c0_8 = arith.constant 0 : index
      %17 = vector.load %arg10[%c0, %c0_8] : memref<1x256xf32, #tpu.memory_space<vmem>>, vector<1x256xf32>
      tpu.vector_store %arg10[%c0, %c0_8], %16 {strides = array<i32>} : memref<1x256xf32, #tpu.memory_space<vmem>>, vector<1x256xf32>,
      %cst_9 = arith.constant 0.000000e+00 : f32
      %18 = vector.broadcast %cst_9 : f32 to vector<1x256xf32>
      %c0_10 = arith.constant 0 : index
      %c0_11 = arith.constant 0 : index
      %19 = vector.load %arg11[%c0_10, %c0_11] : memref<1x256xf32, #tpu.memory_space<vmem>>, vector<1x256xf32>
      tpu.vector_store %arg11[%c0_10, %c0_11], %18 {strides = array<i32>} : memref<1x256xf32, #tpu.memory_space<vmem>>, vector<1x256xf32>,
    } else {
    }
    %c0_i32_2 = arith.constant 0 : i32
    %5 = arith.cmpi eq, %arg0, %c0_i32_2 : i32
    %6 = arith.extui %5 : i1 to i32
    %c0_i32_3 = arith.constant 0 : i32
    %7 = arith.cmpi ne, %6, %c0_i32_3 : i32
    scf.if %7 {
      %c0 = arith.constant 0 : index
      %c0_8 = arith.constant 0 : index
      %16 = vector.load %arg2[%c0, %c0_8] : memref<512x128xf32, #tpu.memory_space<vmem>>, vector<512x128xf32>
      %c0_9 = arith.constant 0 : index
      %c0_10 = arith.constant 0 : index
      %17 = vector.load %arg3[%c0_9, %c0_10] : memref<128x256xf32, #tpu.memory_space<vmem>>, vector<128x256xf32>
      %cst = arith.constant dense<0.000000e+00> : vector<512x256xf32>
      %18 = tpu.matmul %16, %17, %cst {dimension_numbers = #tpu.dot_dimension_numbers<[1], [0], [0], [1], [0, 0, 1, 1], [], []>} : vector<512x128xf32>, vector<128x256xf32>, vector<512x256xf32> -> vector<512x256xf32>
      %c512_i32 = arith.constant 512 : i32
      %19 = arith.muli %arg1, %c512_i32 : i32
      %20 = tpu.assume_multiple %19, 512 : i32
      %21 = arith.index_cast %20 : i32 to index
      %c0_11 = arith.constant 0 : index
      %22 = vector.load %arg9[%21, %c0_11] : memref<512x256xf32, #tpu.memory_space<vmem>>, vector<512x256xf32>
      tpu.vector_store %arg9[%21, %c0_11], %18 {strides = array<i32>} : memref<512x256xf32, #tpu.memory_space<vmem>>, vector<512x256xf32>,
      %c0_12 = arith.constant 0 : index
      %c0_13 = arith.constant 0 : index
      %23 = vector.load %arg10[%c0_12, %c0_13] : memref<1x256xf32, #tpu.memory_space<vmem>>, vector<1x256xf32>
      %cst_14 = arith.constant dense<0.000000e+00> : vector<256xf32>
      %24 = vector.multi_reduction <add>, %18, %cst_14 [0] : vector<512x256xf32> to vector<256xf32>
      %25 = vector.shape_cast %24 : vector<256xf32> to vector<1x256xf32>
      %26 = arith.addf %23, %25 : vector<1x256xf32>
      %c0_15 = arith.constant 0 : index
      %c0_16 = arith.constant 0 : index
      %27 = vector.load %arg10[%c0_15, %c0_16] : memref<1x256xf32, #tpu.memory_space<vmem>>, vector<1x256xf32>
      tpu.vector_store %arg10[%c0_15, %c0_16], %26 {strides = array<i32>} : memref<1x256xf32, #tpu.memory_space<vmem>>, vector<1x256xf32>,
      %c0_17 = arith.constant 0 : index
      %c0_18 = arith.constant 0 : index
      %28 = vector.load %arg11[%c0_17, %c0_18] : memref<1x256xf32, #tpu.memory_space<vmem>>, vector<1x256xf32>
      %29 = arith.mulf %18, %18 : vector<512x256xf32>
      %cst_19 = arith.constant dense<0.000000e+00> : vector<256xf32>
      %30 = vector.multi_reduction <add>, %29, %cst_19 [0] : vector<512x256xf32> to vector<256xf32>
      %31 = vector.shape_cast %30 : vector<256xf32> to vector<1x256xf32>
      %32 = arith.addf %28, %31 : vector<1x256xf32>
      %c0_20 = arith.constant 0 : index
      %c0_21 = arith.constant 0 : index
      %33 = vector.load %arg11[%c0_20, %c0_21] : memref<1x256xf32, #tpu.memory_space<vmem>>, vector<1x256xf32>
      tpu.vector_store %arg11[%c0_20, %c0_21], %32 {strides = array<i32>} : memref<1x256xf32, #tpu.memory_space<vmem>>, vector<1x256xf32>,
    } else {
    }
    %c1_i32 = arith.constant 1 : i32
    %8 = arith.cmpi eq, %arg0, %c1_i32 : i32
    %c0_i32_4 = arith.constant 0 : i32
    %9 = arith.cmpi eq, %arg1, %c0_i32_4 : i32
    %10 = arith.andi %8, %9 : i1
    %11 = arith.extui %10 : i1 to i32
    %c0_i32_5 = arith.constant 0 : i32
    %12 = arith.cmpi ne, %11, %c0_i32_5 : i32
    scf.if %12 {
      %c0 = arith.constant 0 : index
      %c0_8 = arith.constant 0 : index
      %16 = vector.load %arg10[%c0, %c0_8] : memref<1x256xf32, #tpu.memory_space<vmem>>, vector<1x256xf32>
      %c0_9 = arith.constant 0 : index
      %c0_10 = arith.constant 0 : index
      %17 = vector.load %arg11[%c0_9, %c0_10] : memref<1x256xf32, #tpu.memory_space<vmem>>, vector<1x256xf32>
      %18 = tpu.iota {dimensions = array<i32: 0>} : vector<256x256xi32>
      %19 = tpu.iota {dimensions = array<i32: 1>} : vector<256x256xi32>
      %20 = arith.subi %18, %19 : vector<256x256xi32>
      %cst = arith.constant 0.000000e+00 : f32
      %21 = vector.broadcast %cst : f32 to vector<256x256xf32>
      %c-192_i32 = arith.constant -192 : i32
      %22 = vector.broadcast %c-192_i32 : i32 to vector<256x256xi32>
      %23 = arith.cmpi eq, %20, %22 : vector<256x256xi32>
      %24 = arith.extui %23 : vector<256x256xi1> to vector<256x256xi32>
      %25 = arith.sitofp %24 : vector<256x256xi32> to vector<256x256xf32>
      %26 = arith.addf %21, %25 : vector<256x256xf32>
      %c-128_i32 = arith.constant -128 : i32
      %27 = vector.broadcast %c-128_i32 : i32 to vector<256x256xi32>
      %28 = arith.cmpi eq, %20, %27 : vector<256x256xi32>
      %29 = arith.extui %28 : vector<256x256xi1> to vector<256x256xi32>
      %30 = arith.sitofp %29 : vector<256x256xi32> to vector<256x256xf32>
      %31 = arith.addf %26, %30 : vector<256x256xf32>
      %c-64_i32 = arith.constant -64 : i32
      %32 = vector.broadcast %c-64_i32 : i32 to vector<256x256xi32>
      %33 = arith.cmpi eq, %20, %32 : vector<256x256xi32>
      %34 = arith.extui %33 : vector<256x256xi1> to vector<256x256xi32>
      %35 = arith.sitofp %34 : vector<256x256xi32> to vector<256x256xf32>
      %36 = arith.addf %31, %35 : vector<256x256xf32>
      %c0_i32_11 = arith.constant 0 : i32
      %37 = vector.broadcast %c0_i32_11 : i32 to vector<256x256xi32>
      %38 = arith.cmpi eq, %20, %37 : vector<256x256xi32>
      %39 = arith.extui %38 : vector<256x256xi1> to vector<256x256xi32>
      %40 = arith.sitofp %39 : vector<256x256xi32> to vector<256x256xf32>
      %41 = arith.addf %36, %40 : vector<256x256xf32>
      %c64_i32 = arith.constant 64 : i32
      %42 = vector.broadcast %c64_i32 : i32 to vector<256x256xi32>
      %43 = arith.cmpi eq, %20, %42 : vector<256x256xi32>
      %44 = arith.extui %43 : vector<256x256xi1> to vector<256x256xi32>
      %45 = arith.sitofp %44 : vector<256x256xi32> to vector<256x256xf32>
      %46 = arith.addf %41, %45 : vector<256x256xf32>
      %c128_i32 = arith.constant 128 : i32
      %47 = vector.broadcast %c128_i32 : i32 to vector<256x256xi32>
      %48 = arith.cmpi eq, %20, %47 : vector<256x256xi32>
      %49 = arith.extui %48 : vector<256x256xi1> to vector<256x256xi32>
      %50 = arith.sitofp %49 : vector<256x256xi32> to vector<256x256xf32>
      %51 = arith.addf %46, %50 : vector<256x256xf32>
      %c192_i32 = arith.constant 192 : i32
      %52 = vector.broadcast %c192_i32 : i32 to vector<256x256xi32>
      %53 = arith.cmpi eq, %20, %52 : vector<256x256xi32>
      %54 = arith.extui %53 : vector<256x256xi1> to vector<256x256xi32>
      %55 = arith.sitofp %54 : vector<256x256xi32> to vector<256x256xf32>
      %56 = arith.addf %51, %55 : vector<256x256xf32>
      %cst_12 = arith.constant dense<0.000000e+00> : vector<1x256xf32>
      %57 = tpu.matmul %16, %56, %cst_12 {dimension_numbers = #tpu.dot_dimension_numbers<[1], [0], [0], [1], [0, 0, 1, 1], [], []>} : vector<1x256xf32>, vector<256x256xf32>, vector<1x256xf32> -> vector<1x256xf32>
      %cst_13 = arith.constant dense<0.000000e+00> : vector<1x256xf32>
      %58 = tpu.matmul %17, %56, %cst_13 {dimension_numbers = #tpu.dot_dimension_numbers<[1], [0], [0], [1], [0, 0, 1, 1], [], []>} : vector<1x256xf32>, vector<256x256xf32>, vector<1x256xf32> -> vector<1x256xf32>
      %cst_14 = arith.constant 4.8828125E-4 : f32
      %59 = vector.broadcast %cst_14 : f32 to vector<1x256xf32>
      %60 = arith.mulf %57, %59 : vector<1x256xf32>
      %cst_15 = arith.constant 4.8828125E-4 : f32
      %61 = vector.broadcast %cst_15 : f32 to vector<1x256xf32>
      %62 = arith.mulf %58, %61 : vector<1x256xf32>
      %63 = arith.mulf %60, %60 : vector<1x256xf32>
      %64 = arith.subf %62, %63 : vector<1x256xf32>
      %cst_16 = arith.constant 0.000000e+00 : f32
      %65 = vector.broadcast %cst_16 : f32 to vector<1x256xf32>
      %66 = arith.maximumf %64, %65 : vector<1x256xf32>
      %c0_17 = arith.constant 0 : index
      %c0_18 = arith.constant 0 : index
      %67 = vector.load %arg6[%c0_17, %c0_18] : memref<1x256xf32, #tpu.memory_space<vmem>>, vector<1x256xf32>
      %cst_19 = arith.constant 9.99999974E-6 : f32
      %68 = vector.broadcast %cst_19 : f32 to vector<1x256xf32>
      %69 = arith.addf %66, %68 : vector<1x256xf32>
      %70 = math.rsqrt %69 : vector<1x256xf32>
      %71 = arith.mulf %67, %70 : vector<1x256xf32>
      %c0_20 = arith.constant 0 : index
      %c0_21 = arith.constant 0 : index
      %72 = vector.load %arg12[%c0_20, %c0_21] : memref<1x256xf32, #tpu.memory_space<vmem>>, vector<1x256xf32>
      tpu.vector_store %arg12[%c0_20, %c0_21], %71 {strides = array<i32>} : memref<1x256xf32, #tpu.memory_space<vmem>>, vector<1x256xf32>,
      %c0_22 = arith.constant 0 : index
      %c0_23 = arith.constant 0 : index
      %73 = vector.load %arg7[%c0_22, %c0_23] : memref<1x256xf32, #tpu.memory_space<vmem>>, vector<1x256xf32>
      %74 = arith.mulf %60, %71 : vector<1x256xf32>
      %75 = arith.subf %73, %74 : vector<1x256xf32>
      %c0_24 = arith.constant 0 : index
      %c0_25 = arith.constant 0 : index
      %76 = vector.load %arg13[%c0_24, %c0_25] : memref<1x256xf32, #tpu.memory_space<vmem>>, vector<1x256xf32>
      tpu.vector_store %arg13[%c0_24, %c0_25], %75 {strides = array<i32>} : memref<1x256xf32, #tpu.memory_space<vmem>>, vector<1x256xf32>,
    } else {
    }
    %c1_i32_6 = arith.constant 1 : i32
    %13 = arith.cmpi eq, %arg0, %c1_i32_6 : i32
    %14 = arith.extui %13 : i1 to i32
    %c0_i32_7 = arith.constant 0 : i32
    %15 = arith.cmpi ne, %14, %c0_i32_7 : i32
    scf.if %15 {
      %c512_i32 = arith.constant 512 : i32
      %16 = arith.muli %arg1, %c512_i32 : i32
      %17 = tpu.assume_multiple %16, 512 : i32
      %18 = arith.index_cast %17 : i32 to index
      %c0 = arith.constant 0 : index
      %19 = vector.load %arg9[%18, %c0] : memref<512x256xf32, #tpu.memory_space<vmem>>, vector<512x256xf32>
      %c0_8 = arith.constant 0 : index
      %c0_9 = arith.constant 0 : index
      %20 = vector.load %arg12[%c0_8, %c0_9] : memref<1x256xf32, #tpu.memory_space<vmem>>, vector<1x256xf32>
      %21 = vector.broadcast %20 : vector<1x256xf32> to vector<512x256xf32>
      %22 = arith.mulf %19, %21 : vector<512x256xf32>
      %c0_10 = arith.constant 0 : index
      %c0_11 = arith.constant 0 : index
      %23 = vector.load %arg13[%c0_10, %c0_11] : memref<1x256xf32, #tpu.memory_space<vmem>>, vector<1x256xf32>
      %24 = vector.broadcast %23 : vector<1x256xf32> to vector<512x256xf32>
      %25 = arith.addf %22, %24 : vector<512x256xf32>
      %cst = arith.constant 0.000000e+00 : f32
      %26 = vector.broadcast %cst : f32 to vector<512x256xf32>
      %27 = arith.maximumf %25, %26 : vector<512x256xf32>
      %c0_12 = arith.constant 0 : index
      %c0_13 = arith.constant 0 : index
      %28 = vector.load %arg4[%c0_12, %c0_13] : memref<256x128xf32, #tpu.memory_space<vmem>>, vector<256x128xf32>
      %cst_14 = arith.constant dense<0.000000e+00> : vector<512x128xf32>
      %29 = tpu.matmul %27, %28, %cst_14 {dimension_numbers = #tpu.dot_dimension_numbers<[1], [0], [0], [1], [0, 0, 1, 1], [], []>} : vector<512x256xf32>, vector<256x128xf32>, vector<512x128xf32> -> vector<512x128xf32>
      %c0_15 = arith.constant 0 : index
      %c0_16 = arith.constant 0 : index
      %30 = vector.load %arg5[%c0_15, %c0_16] : memref<1x128xf32, #tpu.memory_space<vmem>>, vector<1x128xf32>
      %31 = vector.broadcast %30 : vector<1x128xf32> to vector<512x128xf32>
      %32 = arith.addf %29, %31 : vector<512x128xf32>
      %c0_17 = arith.constant 0 : index
      %c0_18 = arith.constant 0 : index
      %33 = vector.load %arg8[%c0_17, %c0_18] : memref<512x128xf32, #tpu.memory_space<vmem>>, vector<512x128xf32>
      tpu.vector_store %arg8[%c0_17, %c0_18], %32 {strides = array<i32>} : memref<512x128xf32, #tpu.memory_space<vmem>>, vector<512x128xf32>,
    } else {
    }
    return
  }
  func.func @transform_0(%arg0: i32, %arg1: i32) -> (i32, i32) {
    %c1_i32 = arith.constant 1 : i32
    %0 = arith.subi %c1_i32, %arg0 : i32
    %1 = arith.muli %arg1, %0 : i32
    %c0_i32 = arith.constant 0 : i32
    %2 = arith.muli %c0_i32, %arg0 : i32
    %3 = arith.addi %1, %2 : i32
    %c0_i32_0 = arith.constant 0 : i32
    %c0_i32_1 = arith.constant 0 : i32
    return %3, %c0_i32_0 : i32, i32
  }
  func.func @transform_1(%arg0: i32, %arg1: i32) -> (i32, i32) {
    %c0_i32 = arith.constant 0 : i32
    %c0_i32_0 = arith.constant 0 : i32
    %c0_i32_1 = arith.constant 0 : i32
    return %c0_i32, %c0_i32_0 : i32, i32
  }
  func.func @transform_2(%arg0: i32, %arg1: i32) -> (i32, i32) {
    %c0_i32 = arith.constant 0 : i32
    %c0_i32_0 = arith.constant 0 : i32
    %c0_i32_1 = arith.constant 0 : i32
    return %c0_i32, %c0_i32_0 : i32, i32
  }
  func.func @transform_3(%arg0: i32, %arg1: i32) -> (i32, i32) {
    %c0_i32 = arith.constant 0 : i32
    %c0_i32_0 = arith.constant 0 : i32
    %c0_i32_1 = arith.constant 0 : i32
    return %c0_i32, %c0_i32_0 : i32, i32
  }
  func.func @transform_4(%arg0: i32, %arg1: i32) -> (i32, i32) {
    %c0_i32 = arith.constant 0 : i32
    %c0_i32_0 = arith.constant 0 : i32
    %c0_i32_1 = arith.constant 0 : i32
    return %c0_i32, %c0_i32_0 : i32, i32
  }
  func.func @transform_5(%arg0: i32, %arg1: i32) -> (i32, i32) {
    %c0_i32 = arith.constant 0 : i32
    %c0_i32_0 = arith.constant 0 : i32
    %c0_i32_1 = arith.constant 0 : i32
    return %c0_i32, %c0_i32_0 : i32, i32
  }
  func.func @transform_6(%arg0: i32, %arg1: i32) -> (i32, i32) {
    %0 = arith.muli %arg1, %arg0 : i32
    %c0_i32 = arith.constant 0 : i32
    %c0_i32_0 = arith.constant 0 : i32
    return %0, %c0_i32 : i32, i32
  }
}

</mosaic_0001>

<bundles_post_ra>
// kernel: node_decoder_forward.1
= control target key start
LH: loop header
LB: loop body
LE: loop exit
PB: predicated region body
PF: predicated region fallthrough
CT: control target
= control target key end

     0   :  { %s5011_s21 = smov 0   ;;  %s5013_s22 = smov 0   ;;  %s7051_s0 = inlined_call_operand.vmem [shape: f32[512,128], index: 0, kind: input, shape index: {}]   ;;  %s7052_s1 = inlined_call_operand.vmem [shape: f32[128,256], index: 1, kind: input, shape index: {}]   ;;  %s7053_s2 = inlined_call_operand.vmem [shape: f32[256,128], index: 2, kind: input, shape index: {}]   ;;  %s7054_s3 = inlined_call_operand.vmem [shape: f32[1,128], index: 3, kind: input, shape index: {}]   ;;  %s7055_s4 = inlined_call_operand.vmem [shape: f32[1,256], index: 4, kind: input, shape index: {}]   ;;  %s7056_s5 = inlined_call_operand.vmem [shape: f32[1,256], index: 5, kind: input, shape index: {}]   ;;  %s7057_s6 = inlined_call_operand.vmem [shape: f32[512,128], index: 6, kind: output, shape index: {}]  }
   0x1   :  { %s5015_s23 = smov 0  }
   0x2 LB: > { %s28_s24 = sadd.s32 1, %s4964_s22  ;;  %p4676_p0 = scmp.ge.s32.totalorder %s4968_s23, 1  ;;  %s4968_s23 = sphi %s5015_s23, %s16_s23   ;;  %s4964_s22 = sphi %s5013_s22, %s7143_s22   ;;  %s4960_s21 = sphi %s5011_s21, %s7142_s21  }
   0x3   : > { %p30_p1 = scmp.ge.s32.totalorder %s28_s24, 2  ;;  %p235_p2 = scmp.lt.s32.totalorder %s4968_s23, 3 }
   0x5   : > { %s7145_s24 = smov (%p30_p1, %s28_s24), 0  ;;  %p236_p3 = pnand %p4676_p0, %p235_p2 }
   0x6   : > { %p286_p4 = scmp.eq.s32.totalorder (!%p236_p3), %s4960_s21, 0 }
   0x7   : > { %239 = sbr.rel (%p236_p3) target bundleno = 1212 (0x4bc), region = 44 }
   0xc   : > { %291 = sbr.rel (!%p286_p4) target bundleno = 17 (0x11), region = 48  ;;  %v292_v0 = vlaneseq (%p286_p4)  ;;  %v4970_v1 = vmov (%p286_p4), 0.0  }
   0xe   : > { %vm294_vm0 = vcmp.lt.s32.totalorder (%p286_p4), %v292_v0, 256 }
   0xf   : > { %296 = vst.msk [vmem:[#allocation3] sm:$0x3] (%p286_p4), %vm294_vm0, %v4970_v1  ;;  %297 = vst.msk [vmem:[#allocation4] sm:$0x3] (%p286_p4), %vm294_vm0, %v4970_v1 }
  0x11 PF: > { %p4678_p5 = scmp.ne.s32.totalorder %s4960_s21, 0 }
  0x13   : > { %300 = sbr.rel (%p4678_p5) target bundleno = 465 (0x1d1), region = 52 }
  0x18   : > { %v396_v2 = vld [vmem:[%s7052_s1 + $0xf8] sm:$0xff]  ;;  %v395_v3 = vld [vmem:[%s7052_s1 + $0xf0] sm:$0xff]  ;;  %v394_v4 = vld [vmem:[%s7052_s1 + $0xe8] sm:$0xff]  ;;  %v4971_v6 = vmov 0.0  }
  0x19   : > { %397 = vmatprep.subr.mxu0 %v396_v2  ;;  %v393_v5 = vld [vmem:[%s7052_s1 + $0xe0] sm:$0xff]  ;;  %461 = vmatprep.mubr.f32.mxu0 %v4971_v6  ;;  %v392_v7 = vld [vmem:[%s7052_s1 + $0xd8] sm:$0xff]  ;;  %v391_v8 = vld [vmem:[%s7052_s1 + $0xd0] sm:$0xff] }
  0x1a   : > { %398 = vmatpush1.msra.mxu0 %v395_v3  ;;  %4816 = vmatprep.subr.mxu1 %v396_v2  ;;  %v390_v9 = vld [vmem:[%s7052_s1 + $0xc8] sm:$0xff]  ;;  %v389_v10 = vld [vmem:[%s7052_s1 + $0xc0] sm:$0xff]  ;;  %v388_v11 = vld [vmem:[%s7052_s1 + $0xb8] sm:$0xff] }
  0x1b   : > { %399 = vmatprep.subr.mxu0 %v394_v4  ;;  %4832 = vmatpush1.msra.mxu1 %v395_v3  ;;  %v387_v12 = vld [vmem:[%s7052_s1 + $0xb0] sm:$0xff]  ;;  %v386_v13 = vld [vmem:[%s7052_s1 + $0xa8] sm:$0xff]  ;;  %v385_v14 = vld [vmem:[%s7052_s1 + $0xa0] sm:$0xff] }
  0x1c   : > { %400 = vmatpush1.msra.mxu0 %v393_v5  ;;  %4817 = vmatprep.subr.mxu1 %v394_v4  ;;  %v384_v15 = vld [vmem:[%s7052_s1 + $0x98] sm:$0xff]  ;;  %v383_v16 = vld [vmem:[%s7052_s1 + $0x90] sm:$0xff]  ;;  %v382_v17 = vld [vmem:[%s7052_s1 + $0x88] sm:$0xff] }
  0x1d   : > { %401 = vmatprep.subr.mxu0 %v392_v7  ;;  %4833 = vmatpush1.msra.mxu1 %v393_v5  ;;  %v381_v18 = vld [vmem:[%s7052_s1 + $0x80] sm:$0xff]  ;;  %v380_v19 = vld [vmem:[%s7052_s1 + $0x78] sm:$0xff]  ;;  %v379_v20 = vld [vmem:[%s7052_s1 + $0x70] sm:$0xff] }
  0x1e   : > { %402 = vmatpush1.msra.mxu0 %v391_v8  ;;  %4818 = vmatprep.subr.mxu1 %v392_v7  ;;  %v378_v21 = vld [vmem:[%s7052_s1 + $0x68] sm:$0xff]  ;;  %v377_v22 = vld [vmem:[%s7052_s1 + $0x60] sm:$0xff]  ;;  %v376_v23 = vld [vmem:[%s7052_s1 + $0x58] sm:$0xff] }
  0x1f   : > { %403 = vmatprep.subr.mxu0 %v390_v9  ;;  %4834 = vmatpush1.msra.mxu1 %v391_v8  ;;  %v375_v24 = vld [vmem:[%s7052_s1 + $0x50] sm:$0xff]  ;;  %v374_v25 = vld [vmem:[%s7052_s1 + $0x48] sm:$0xff]  ;;  %v373_v26 = vld [vmem:[%s7052_s1 + $0x40] sm:$0xff] }
  0x20   : > { %404 = vmatpush1.msra.mxu0 %v389_v10  ;;  %4819 = vmatprep.subr.mxu1 %v390_v9  ;;  %v372_v27 = vld [vmem:[%s7052_s1 + $0x38] sm:$0xff]  ;;  %v371_v28 = vld [vmem:[%s7052_s1 + $0x30] sm:$0xff]  ;;  %v370_v29 = vld [vmem:[%s7052_s1 + $0x28] sm:$0xff] }
  0x21   : > { %405 = vmatprep.subr.mxu0 %v388_v11  ;;  %4835 = vmatpush1.msra.mxu1 %v389_v10  ;;  %v369_v30 = vld [vmem:[%s7052_s1 + $0x20] sm:$0xff]  ;;  %v368_v31 = vld [vmem:[%s7052_s1 + $0x18] sm:$0xff]  ;;  %v367_v32 = vld [vmem:[%s7052_s1 + $0x10] sm:$0xff] }
  0x22   : > { %406 = vmatpush1.msra.mxu0 %v387_v12  ;;  %4820 = vmatprep.subr.mxu1 %v388_v11  ;;  %v366_v33 = vld [vmem:[%s7052_s1 + $0x8] sm:$0xff]  ;;  %v365_v34 = vld [vmem:[%s7052_s1] sm:$0xff]  ;;  %v303_v39 = vld [vmem:[%s7051_s0 + $0x10] sm:$0xff] }
  0x23   : > { %407 = vmatprep.subr.mxu0 %v386_v13  ;;  %4836 = vmatpush1.msra.mxu1 %v387_v12  ;;  %v301_v35 = vld [vmem:[%s7051_s0] sm:$0xff]  ;;  %v302_v37 = vld [vmem:[%s7051_s0 + $0x8] sm:$0xff]  ;;  %v335_v40 = vld [vmem:[%s7051_s0 + $0x110] sm:$0xff] }
  0x24   : > { %408 = vmatpush1.msra.mxu0 %v385_v14  ;;  %4821 = vmatprep.subr.mxu1 %v386_v13  ;;  %v333_v36 = vld [vmem:[%s7051_s0 + $0x100] sm:$0xff]  ;;  %v334_v38 = vld [vmem:[%s7051_s0 + $0x108] sm:$0xff]  ;;  %v304_v41 = vld [vmem:[%s7051_s0 + $0x18] sm:$0xff] }
  0x25   : > { %409 = vmatprep.subr.mxu0 %v384_v15  ;;  %4837 = vmatpush1.msra.mxu1 %v385_v14  ;;  %v336_v42 = vld [vmem:[%s7051_s0 + $0x118] sm:$0xff]  ;;  %v305_v43 = vld [vmem:[%s7051_s0 + $0x20] sm:$0xff]  ;;  %v306_v45 = vld [vmem:[%s7051_s0 + $0x28] sm:$0xff] }
  0x26   : > { %410 = vmatpush1.msra.mxu0 %v383_v16  ;;  %4822 = vmatprep.subr.mxu1 %v384_v15  ;;  %v337_v44 = vld [vmem:[%s7051_s0 + $0x120] sm:$0xff]  ;;  %v338_v46 = vld [vmem:[%s7051_s0 + $0x128] sm:$0xff]  ;;  %v307_v47 = vld [vmem:[%s7051_s0 + $0x30] sm:$0xff] }
  0x27   : > { %411 = vmatprep.subr.mxu0 %v382_v17  ;;  %4838 = vmatpush1.msra.mxu1 %v383_v16  ;;  %v339_v48 = vld [vmem:[%s7051_s0 + $0x130] sm:$0xff]  ;;  %v308_v49 = vld [vmem:[%s7051_s0 + $0x38] sm:$0xff]  ;;  %v309_v51 = vld [vmem:[%s7051_s0 + $0x40] sm:$0xff] }
  0x28   : > { %412 = vmatpush1.msra.mxu0 %v381_v18  ;;  %4823 = vmatprep.subr.mxu1 %v382_v17  ;;  %v340_v50 = vld [vmem:[%s7051_s0 + $0x138] sm:$0xff]  ;;  %v341_v52 = vld [vmem:[%s7051_s0 + $0x140] sm:$0xff]  ;;  %v310_v53 = vld [vmem:[%s7051_s0 + $0x48] sm:$0xff] }
  0x29   : > { %413 = vmatprep.subr.mxu0 %v380_v19  ;;  %4839 = vmatpush1.msra.mxu1 %v381_v18  ;;  %v342_v54 = vld [vmem:[%s7051_s0 + $0x148] sm:$0xff]  ;;  %v311_v55 = vld [vmem:[%s7051_s0 + $0x50] sm:$0xff]  ;;  %v312_v57 = vld [vmem:[%s7051_s0 + $0x58] sm:$0xff] }
  0x2a   : > { %414 = vmatpush1.msra.mxu0 %v379_v20  ;;  %4824 = vmatprep.subr.mxu1 %v380_v19  ;;  %v343_v56 = vld [vmem:[%s7051_s0 + $0x150] sm:$0xff]  ;;  %v344_v58 = vld [vmem:[%s7051_s0 + $0x158] sm:$0xff]  ;;  %v313_v59 = vld [vmem:[%s7051_s0 + $0x60] sm:$0xff] }
  0x2b   : > { %415 = vmatprep.subr.mxu0 %v378_v21  ;;  %4840 = vmatpush1.msra.mxu1 %v379_v20  ;;  %v345_v60 = vld [vmem:[%s7051_s0 + $0x160] sm:$0xff]  ;;  %v314_v61 = vld [vmem:[%s7051_s0 + $0x68] sm:$0xff]  ;;  %v315_v63 = vld [vmem:[%s7051_s0 + $0x70] sm:$0xff] }
  0x2c   : > { %416 = vmatpush1.msra.mxu0 %v377_v22  ;;  %4825 = vmatprep.subr.mxu1 %v378_v21  ;;  %v346_v62 = vld [vmem:[%s7051_s0 + $0x168] sm:$0xff]  ;;  %v347_v0 = vld [vmem:[%s7051_s0 + $0x170] sm:$0xff]  ;;  %v316_v1 = vld [vmem:[%s7051_s0 + $0x78] sm:$0xff] }
  0x2d   : > { %417 = vmatprep.subr.mxu0 %v376_v23  ;;  %4841 = vmatpush1.msra.mxu1 %v377_v22  ;;  %v348_v2 = vld [vmem:[%s7051_s0 + $0x178] sm:$0xff]  ;;  %v317_v3 = vld [vmem:[%s7051_s0 + $0x80] sm:$0xff]  ;;  %v318_v5 = vld [vmem:[%s7051_s0 + $0x88] sm:$0xff] }
  0x2e   : > { %418 = vmatpush1.msra.mxu0 %v375_v24  ;;  %4826 = vmatprep.subr.mxu1 %v376_v23  ;;  %v349_v4 = vld [vmem:[%s7051_s0 + $0x180] sm:$0xff]  ;;  %v350_v7 = vld [vmem:[%s7051_s0 + $0x188] sm:$0xff]  ;;  %v319_v8 = vld [vmem:[%s7051_s0 + $0x90] sm:$0xff] }
  0x2f   : > { %419 = vmatprep.subr.mxu0 %v374_v25  ;;  %4842 = vmatpush1.msra.mxu1 %v375_v24  ;;  %v351_v9 = vld [vmem:[%s7051_s0 + $0x190] sm:$0xff]  ;;  %v320_v10 = vld [vmem:[%s7051_s0 + $0x98] sm:$0xff]  ;;  %v321_v12 = vld [vmem:[%s7051_s0 + $0xa0] sm:$0xff] }
  0x30   : > { %420 = vmatpush1.msra.mxu0 %v373_v26  ;;  %4827 = vmatprep.subr.mxu1 %v374_v25  ;;  %v352_v11 = vld [vmem:[%s7051_s0 + $0x198] sm:$0xff]  ;;  %v353_v13 = vld [vmem:[%s7051_s0 + $0x1a0] sm:$0xff]  ;;  %v322_v14 = vld [vmem:[%s7051_s0 + $0xa8] sm:$0xff] }
  0x31   : > { %421 = vmatprep.subr.mxu0 %v372_v27  ;;  %4843 = vmatpush1.msra.mxu1 %v373_v26  ;;  %v354_v15 = vld [vmem:[%s7051_s0 + $0x1a8] sm:$0xff]  ;;  %v323_v16 = vld [vmem:[%s7051_s0 + $0xb0] sm:$0xff]  ;;  %v324_v18 = vld [vmem:[%s7051_s0 + $0xb8] sm:$0xff] }
  0x32   : > { %422 = vmatpush1.msra.mxu0 %v371_v28  ;;  %4828 = vmatprep.subr.mxu1 %v372_v27  ;;  %v355_v17 = vld [vmem:[%s7051_s0 + $0x1b0] sm:$0xff]  ;;  %v356_v19 = vld [vmem:[%s7051_s0 + $0x1b8] sm:$0xff]  ;;  %v325_v20 = vld [vmem:[%s7051_s0 + $0xc0] sm:$0xff] }
  0x33   : > { %423 = vmatprep.subr.mxu0 %v370_v29  ;;  %4844 = vmatpush1.msra.mxu1 %v371_v28  ;;  %v357_v21 = vld [vmem:[%s7051_s0 + $0x1c0] sm:$0xff]  ;;  %v326_v22 = vld [vmem:[%s7051_s0 + $0xc8] sm:$0xff]  ;;  %v327_v24 = vld [vmem:[%s7051_s0 + $0xd0] sm:$0xff] }
  0x34   : > { %424 = vmatpush1.msra.mxu0 %v369_v30  ;;  %4829 = vmatprep.subr.mxu1 %v370_v29  ;;  %v358_v23 = vld [vmem:[%s7051_s0 + $0x1c8] sm:$0xff]  ;;  %v359_v25 = vld [vmem:[%s7051_s0 + $0x1d0] sm:$0xff]  ;;  %v328_v26 = vld [vmem:[%s7051_s0 + $0xd8] sm:$0xff] }
  0x35   : > { %425 = vmatprep.subr.mxu0 %v368_v31  ;;  %4845 = vmatpush1.msra.mxu1 %v369_v30  ;;  %v360_v27 = vld [vmem:[%s7051_s0 + $0x1d8] sm:$0xff]  ;;  %v329_v28 = vld [vmem:[%s7051_s0 + $0xe0] sm:$0xff]  ;;  %v330_v30 = vld [vmem:[%s7051_s0 + $0xe8] sm:$0xff] }
  0x36   : > { %426 = vmatpush1.msra.mxu0 %v367_v32  ;;  %4830 = vmatprep.subr.mxu1 %v368_v31  ;;  %v361_v29 = vld [vmem:[%s7051_s0 + $0x1e0] sm:$0xff]  ;;  %v362_v31 = vld [vmem:[%s7051_s0 + $0x1e8] sm:$0xff] }
  0x37   : > { %427 = vmatprep.subr.mxu0 %v366_v33  ;;  %4846 = vmatpush1.msra.mxu1 %v367_v32  ;;  %v331_v32 = vld [vmem:[%s7051_s0 + $0xf0] sm:$0xff] }
  0x38   : > { %428 = vmatpush1.msra.mxu0 %v365_v34  ;;  %4831 = vmatprep.subr.mxu1 %v366_v33  ;;  %v363_v33 = vld [vmem:[%s7051_s0 + $0x1f0] sm:$0xff] }
  0x39   : > { %462 = vmatmul.mubr.f32.vlgmr.msra.gmra.mxu0 %v301_v35  ;;  %4847 = vmatpush1.msra.mxu1 %v365_v34  ;;  %v332_v34 = vld [vmem:[%s7051_s0 + $0xf8] sm:$0xff] }
  0x3a   : > { %467 = vmatprep.mubr.f32.mxu0 %v4971_v6  ;;  %653 = vmatprep.mubr.f32.mxu1 %v4971_v6  ;;  %v364_v35 = vld [vmem:[%s7051_s0 + $0x1f8] sm:$0xff] }
  0x3b   : > { %654 = vmatmul.mubr.f32.vlgmr.msra.gmra.mxu1 %v333_v36 }
  0x3c   : > { %659 = vmatprep.mubr.f32.mxu1 %v4971_v6 }
  0x3d   : > { %468 = vmatmul.mubr.f32.gmra.mxu0 %v302_v37 }
  0x3e   : > { %473 = vmatprep.mubr.f32.mxu0 %v4971_v6 }
  0x3f   : > { %660 = vmatmul.mubr.f32.gmra.mxu1 %v334_v38 }
  0x40   : > { %665 = vmatprep.mubr.f32.mxu1 %v4971_v6 }
  0x41   : > { %474 = vmatmul.mubr.f32.gmra.mxu0 %v303_v39 }
  0x42   : > { %479 = vmatprep.mubr.f32.mxu0 %v4971_v6 }
  0x43   : > { %666 = vmatmul.mubr.f32.gmra.mxu1 %v335_v40 }
  0x44   : > { %671 = vmatprep.mubr.f32.mxu1 %v4971_v6 }
  0x45   : > { %480 = vmatmul.mubr.f32.gmra.mxu0 %v304_v41 }
  0x46   : > { %485 = vmatprep.mubr.f32.mxu0 %v4971_v6 }
  0x47   : > { %672 = vmatmul.mubr.f32.gmra.mxu1 %v336_v42 }
  0x48   : > { %677 = vmatprep.mubr.f32.mxu1 %v4971_v6 }
  0x49   : > { %486 = vmatmul.mubr.f32.gmra.mxu0 %v305_v43 }
  0x4a   : > { %491 = vmatprep.mubr.f32.mxu0 %v4971_v6 }
  0x4b   : > { %678 = vmatmul.mubr.f32.gmra.mxu1 %v337_v44 }
  0x4c   : > { %683 = vmatprep.mubr.f32.mxu1 %v4971_v6 }
  0x4d   : > { %492 = vmatmul.mubr.f32.gmra.mxu0 %v306_v45 }
  0x4e   : > { %497 = vmatprep.mubr.f32.mxu0 %v4971_v6 }
  0x4f   : > { %684 = vmatmul.mubr.f32.gmra.mxu1 %v338_v46 }
  0x50   : > { %689 = vmatprep.mubr.f32.mxu1 %v4971_v6 }
  0x51   : > { %498 = vmatmul.mubr.f32.gmra.mxu0 %v307_v47 }
  0x52   : > { %503 = vmatprep.mubr.f32.mxu0 %v4971_v6 }
  0x53   : > { %690 = vmatmul.mubr.f32.gmra.mxu1 %v339_v48 }
  0x54   : > { %695 = vmatprep.mubr.f32.mxu1 %v4971_v6 }
  0x55   : > { %504 = vmatmul.mubr.f32.gmra.mxu0 %v308_v49 }
  0x56   : > { %509 = vmatprep.mubr.f32.mxu0 %v4971_v6 }
  0x57   : > { %696 = vmatmul.mubr.f32.gmra.mxu1 %v340_v50 }
  0x58   : > { %701 = vmatprep.mubr.f32.mxu1 %v4971_v6 }
  0x59   : > { %510 = vmatmul.mubr.f32.gmra.mxu0 %v309_v51 }
  0x5a   : > { %515 = vmatprep.mubr.f32.mxu0 %v4971_v6 }
  0x5b   : > { %702 = vmatmul.mubr.f32.gmra.mxu1 %v341_v52 }
  0x5c   : > { %707 = vmatprep.mubr.f32.mxu1 %v4971_v6 }
  0x5d   : > { %516 = vmatmul.mubr.f32.gmra.mxu0 %v310_v53 }
  0x5e   : > { %521 = vmatprep.mubr.f32.mxu0 %v4971_v6 }
  0x5f   : > { %708 = vmatmul.mubr.f32.gmra.mxu1 %v342_v54 }
  0x60   : > { %713 = vmatprep.mubr.f32.mxu1 %v4971_v6 }
  0x61   : > { %522 = vmatmul.mubr.f32.gmra.mxu0 %v311_v55 }
  0x62   : > { %527 = vmatprep.mubr.f32.mxu0 %v4971_v6 }
  0x63   : > { %714 = vmatmul.mubr.f32.gmra.mxu1 %v343_v56 }
  0x64   : > { %719 = vmatprep.mubr.f32.mxu1 %v4971_v6 }
  0x65   : > { %528 = vmatmul.mubr.f32.gmra.mxu0 %v312_v57 }
  0x66   : > { %533 = vmatprep.mubr.f32.mxu0 %v4971_v6 }
  0x67   : > { %720 = vmatmul.mubr.f32.gmra.mxu1 %v344_v58 }
  0x68   : > { %725 = vmatprep.mubr.f32.mxu1 %v4971_v6 }
  0x69   : > { %534 = vmatmul.mubr.f32.gmra.mxu0 %v313_v59 }
  0x6a   : > { %539 = vmatprep.mubr.f32.mxu0 %v4971_v6 }
  0x6b   : > { %726 = vmatmul.mubr.f32.gmra.mxu1 %v345_v60 }
  0x6c   : > { %731 = vmatprep.mubr.f32.mxu1 %v4971_v6 }
  0x6d   : > { %540 = vmatmul.mubr.f32.gmra.mxu0 %v314_v61 }
  0x6e   : > { %545 = vmatprep.mubr.f32.mxu0 %v4971_v6 }
  0x6f   : > { %732 = vmatmul.mubr.f32.gmra.mxu1 %v346_v62 }
  0x70   : > { %737 = vmatprep.mubr.f32.mxu1 %v4971_v6 }
  0x71   : > { %546 = vmatmul.mubr.f32.gmra.mxu0 %v315_v63 }
  0x72   : > { %551 = vmatprep.mubr.f32.mxu0 %v4971_v6 }
  0x73   : > { %738 = vmatmul.mubr.f32.gmra.mxu1 %v347_v0 }
  0x74   : > { %743 = vmatprep.mubr.f32.mxu1 %v4971_v6 }
  0x75   : > { %552 = vmatmul.mubr.f32.gmra.mxu0 %v316_v1 }
  0x76   : > { %557 = vmatprep.mubr.f32.mxu0 %v4971_v6 }
  0x77   : > { %744 = vmatmul.mubr.f32.gmra.mxu1 %v348_v2 }
  0x78   : > { %749 = vmatprep.mubr.f32.mxu1 %v4971_v6 }
  0x79   : > { %558 = vmatmul.mubr.f32.gmra.mxu0 %v317_v3 }
  0x7a   : > { %563 = vmatprep.mubr.f32.mxu0 %v4971_v6 }
  0x7b   : > { %750 = vmatmul.mubr.f32.gmra.mxu1 %v349_v4 }
  0x7c   : > { %755 = vmatprep.mubr.f32.mxu1 %v4971_v6 }
  0x7d   : > { %564 = vmatmul.mubr.f32.gmra.mxu0 %v318_v5 }
  0x7e   : > { %569 = vmatprep.mubr.f32.mxu0 %v4971_v6 }
  0x7f   : > { %756 = vmatmul.mubr.f32.gmra.mxu1 %v350_v7 }
  0x80   : > { %761 = vmatprep.mubr.f32.mxu1 %v4971_v6 }
  0x81   : > { %570 = vmatmul.mubr.f32.gmra.mxu0 %v319_v8 }
  0x82   : > { %575 = vmatprep.mubr.f32.mxu0 %v4971_v6 }
  0x83   : > { %762 = vmatmul.mubr.f32.gmra.mxu1 %v351_v9 }
  0x84   : > { %767 = vmatprep.mubr.f32.mxu1 %v4971_v6 }
  0x85   : > { %576 = vmatmul.mubr.f32.gmra.mxu0 %v320_v10 }
  0x86   : > { %581 = vmatprep.mubr.f32.mxu0 %v4971_v6 }
  0x87   : > { %768 = vmatmul.mubr.f32.gmra.mxu1 %v352_v11 }
  0x88   : > { %773 = vmatprep.mubr.f32.mxu1 %v4971_v6 }
  0x89   : > { %582 = vmatmul.mubr.f32.gmra.mxu0 %v321_v12 }
  0x8a   : > { %587 = vmatprep.mubr.f32.mxu0 %v4971_v6 }
  0x8b   : > { %774 = vmatmul.mubr.f32.gmra.mxu1 %v353_v13 }
  0x8c   : > { %779 = vmatprep.mubr.f32.mxu1 %v4971_v6 }
  0x8d   : > { %588 = vmatmul.mubr.f32.gmra.mxu0 %v322_v14 }
  0x8e   : > { %593 = vmatprep.mubr.f32.mxu0 %v4971_v6 }
  0x8f   : > { %780 = vmatmul.mubr.f32.gmra.mxu1 %v354_v15 }
  0x90   : > { %785 = vmatprep.mubr.f32.mxu1 %v4971_v6 }
  0x91   : > { %594 = vmatmul.mubr.f32.gmra.mxu0 %v323_v16 }
  0x92   : > { %599 = vmatprep.mubr.f32.mxu0 %v4971_v6 }
  0x93   : > { %786 = vmatmul.mubr.f32.gmra.mxu1 %v355_v17 }
  0x94   : > { %791 = vmatprep.mubr.f32.mxu1 %v4971_v6 }
  0x95   : > { %600 = vmatmul.mubr.f32.gmra.mxu0 %v324_v18 }
  0x96   : > { %605 = vmatprep.mubr.f32.mxu0 %v4971_v6 }
  0x97   : > { %792 = vmatmul.mubr.f32.gmra.mxu1 %v356_v19 }
  0x98   : > { %797 = vmatprep.mubr.f32.mxu1 %v4971_v6 }
  0x99   : > { %606 = vmatmul.mubr.f32.gmra.mxu0 %v325_v20 }
  0x9a   : > { %611 = vmatprep.mubr.f32.mxu0 %v4971_v6 }
  0x9b   : > { %798 = vmatmul.mubr.f32.gmra.mxu1 %v357_v21 }
  0x9c   : > { %803 = vmatprep.mubr.f32.mxu1 %v4971_v6 }
  0x9d   : > { %612 = vmatmul.mubr.f32.gmra.mxu0 %v326_v22 }
  0x9e   : > { %617 = vmatprep.mubr.f32.mxu0 %v4971_v6 }
  0x9f   : > { %804 = vmatmul.mubr.f32.gmra.mxu1 %v358_v23 }
  0xa0   : > { %809 = vmatprep.mubr.f32.mxu1 %v4971_v6 }
  0xa1   : > { %618 = vmatmul.mubr.f32.gmra.mxu0 %v327_v24 }
  0xa2   : > { %623 = vmatprep.mubr.f32.mxu0 %v4971_v6 }
  0xa3   : > { %810 = vmatmul.mubr.f32.gmra.mxu1 %v359_v25 }
  0xa4   : > { %815 = vmatprep.mubr.f32.mxu1 %v4971_v6 }
  0xa5   : > { %624 = vmatmul.mubr.f32.gmra.mxu0 %v328_v26 }
  0xa6   : > { %629 = vmatprep.mubr.f32.mxu0 %v4971_v6 }
  0xa7   : > { %816 = vmatmul.mubr.f32.gmra.mxu1 %v360_v27 }
  0xa8   : > { %821 = vmatprep.mubr.f32.mxu1 %v4971_v6 }
  0xa9   : > { %630 = vmatmul.mubr.f32.gmra.mxu0 %v329_v28 }
  0xaa   : > { %635 = vmatprep.mubr.f32.mxu0 %v4971_v6 }
  0xab   : > { %822 = vmatmul.mubr.f32.gmra.mxu1 %v361_v29 }
  0xac   : > { %827 = vmatprep.mubr.f32.mxu1 %v4971_v6 }
  0xad   : > { %636 = vmatmul.mubr.f32.gmra.mxu0 %v330_v30 }
  0xae   : > { %641 = vmatprep.mubr.f32.mxu0 %v4971_v6 }
  0xaf   : > { %828 = vmatmul.mubr.f32.gmra.mxu1 %v362_v31 }
  0xb0   : > { %833 = vmatprep.mubr.f32.mxu1 %v4971_v6 }
  0xb1   : > { %642 = vmatmul.mubr.f32.gmra.mxu0 %v331_v32 }
  0xb2   : > { %647 = vmatprep.mubr.f32.mxu0 %v4971_v6 }
  0xb3   : > { %834 = vmatmul.mubr.f32.gmra.mxu1 %v363_v33 }
  0xb4   : > { %839 = vmatprep.mubr.f32.mxu1 %v4971_v6 }
  0xb5   : > { %648 = vmatmul.mubr.f32.gmra.mxu0 %v332_v34 }
  0xb7   : > { %840 = vmatmul.mubr.f32.gmra.mxu1 %v364_v35 }
  0xf9   : > { %v5385_v36 = vpop.f32.mrf.mxu0 }
  0xfa   : > { %852 = vst [vmem:[#allocation2 + $0x2b0] sm:$0xff] %v5385_v36 }
  0xfb   : > { %v5388_v37 = vpop.f32.mrf.mxu0  ;;  %v5390_v38 = vpop.f32.mrf.mxu1 }
  0xfc   : > { %853 = vst [vmem:[#allocation2 + $0x3b0] sm:$0xff] %v5388_v37  ;;  %916 = vst [vmem:[#allocation2 + $0x130] sm:$0xff] %v5390_v38 }
  0xfd   : > { %v5394_v39 = vpop.f32.mrf.mxu0  ;;  %v5396_v6 = vpop.f32.mrf.mxu1 }
  0xfe   : > { %854 = vst [vmem:[#allocation2 + $0xd8] sm:$0xff] %v5394_v39  ;;  %917 = vst [vmem:[#allocation2 + $0x200] sm:$0xff] %v5396_v6  ;;  %v1146_v35 = vmul.f32 %v5394_v39, %v5394_v39 }
  0xff   : > { %v5400_v40 = vpop.f32.mrf.mxu0  ;;  %v5402_v41 = vpop.f32.mrf.mxu1 }
 0x100   : > { %855 = vst [vmem:[#allocation2 + $0x18] sm:$0xff] %v5400_v40  ;;  %918 = vst [vmem:[#allocation2 + $0x318] sm:$0xff] %v5402_v41 }
 0x101   : > { %v5406_v42 = vpop.f32.mrf.mxu0  ;;  %v5408_v43 = vpop.f32.mrf.mxu1 }
 0x102   : > { %856 = vst [vmem:[#allocation2 + $0x50] sm:$0xff] %v5406_v42  ;;  %919 = vst [vmem:[#allocation2 + $0x220] sm:$0xff] %v5408_v43 }
 0x103   : > { %v5412_v44 = vpop.f32.mrf.mxu0  ;;  %v5414_v45 = vpop.f32.mrf.mxu1 }
 0x104   : > { %857 = vst [vmem:[#allocation2 + $0x368] sm:$0xff] %v5412_v44  ;;  %920 = vst [vmem:[#allocation2 + $0x70] sm:$0xff] %v5414_v45 }
 0x105   : > { %v5418_v46 = vpop.f32.mrf.mxu0  ;;  %v5420_v47 = vpop.f32.mrf.mxu1 }
 0x106   : > { %858 = vst [vmem:[#allocation2 + $0x330] sm:$0xff] %v5418_v46  ;;  %921 = vst [vmem:[#allocation2 + $0x300] sm:$0xff] %v5420_v47 }
 0x107   : > { %v5424_v48 = vpop.f32.mrf.mxu0  ;;  %v5426_v49 = vpop.f32.mrf.mxu1 }
 0x108   : > { %859 = vst [vmem:[#allocation2 + $0x48] sm:$0xff] %v5424_v48  ;;  %922 = vst [vmem:[#allocation2 + $0xe0] sm:$0xff] %v5426_v49 }
 0x109   : > { %v5430_v50 = vpop.f32.mrf.mxu0  ;;  %v5432_v51 = vpop.f32.mrf.mxu1 }
 0x10a   : > { %860 = vst [vmem:[#allocation2 + $0x380] sm:$0xff] %v5430_v50  ;;  %923 = vst [vmem:[#allocation2 + $0x178] sm:$0xff] %v5432_v51 }
 0x10b   : > { %v5436_v52 = vpop.f32.mrf.mxu0  ;;  %v5438_v53 = vpop.f32.mrf.mxu1 }
 0x10c   : > { %861 = vst [vmem:[#allocation2 + $0x110] sm:$0xff] %v5436_v52  ;;  %924 = vst [vmem:[#allocation2 + $0x328] sm:$0xff] %v5438_v53 }
 0x10d   : > { %v5442_v54 = vpop.f32.mrf.mxu0  ;;  %v5444_v55 = vpop.f32.mrf.mxu1 }
 0x10e   : > { %862 = vst [vmem:[#allocation2 + $0x118] sm:$0xff] %v5442_v54  ;;  %925 = vst [vmem:[#allocation2 + $0x260] sm:$0xff] %v5444_v55 }
 0x10f   : > { %v5448_v56 = vpop.f32.mrf.mxu0  ;;  %v5450_v57 = vpop.f32.mrf.mxu1 }
 0x110   : > { %863 = vst [vmem:[#allocation2 + $0x98] sm:$0xff] %v5448_v56  ;;  %926 = vst [vmem:[#allocation2 + $0x3b8] sm:$0xff] %v5450_v57 }
 0x111   : > { %v5454_v58 = vpop.f32.mrf.mxu0  ;;  %v5456_v59 = vpop.f32.mrf.mxu1 }
 0x112   : > { %864 = vst [vmem:[#allocation2 + $0x320] sm:$0xff] %v5454_v58  ;;  %927 = vst [vmem:[#allocation2 + $0x2b8] sm:$0xff] %v5456_v59 }
 0x113   : > { %v5460_v60 = vpop.f32.mrf.mxu0  ;;  %v5462_v61 = vpop.f32.mrf.mxu1 }
 0x114   : > { %865 = vst [vmem:[#allocation2 + $0x150] sm:$0xff] %v5460_v60  ;;  %928 = vst [vmem:[#allocation2 + $0x248] sm:$0xff] %v5462_v61 }
 0x115   : > { %v5466_v62 = vpop.f32.mrf.mxu0  ;;  %v5468_v63 = vpop.f32.mrf.mxu1 }
 0x116   : > { %866 = vst [vmem:[#allocation2 + $0x108] sm:$0xff] %v5466_v62  ;;  %929 = vst [vmem:[#allocation2 + $0x40] sm:$0xff] %v5468_v63 }
 0x117   : > { %v5472_v0 = vpop.f32.mrf.mxu0  ;;  %v5474_v1 = vpop.f32.mrf.mxu1 }
 0x118   : > { %867 = vst [vmem:[#allocation2 + $0x60] sm:$0xff] %v5472_v0  ;;  %930 = vst [vmem:[#allocation2 + $0x20] sm:$0xff] %v5474_v1 }
 0x119   : > { %v5478_v2 = vpop.f32.mrf.mxu0  ;;  %v5480_v3 = vpop.f32.mrf.mxu1 }
 0x11a   : > { %868 = vst [vmem:[#allocation2 + $0x2e0] sm:$0xff] %v5478_v2  ;;  %931 = vst [vmem:[#allocation2 + $0xe8] sm:$0xff] %v5480_v3 }
 0x11b   : > { %v5484_v4 = vpop.f32.mrf.mxu0  ;;  %v5486_v5 = vpop.f32.mrf.mxu1 }
 0x11c   : > { %7100 = vst [vmem:[#allocation7_spill] sm:$0xff] %v5486_v5  ;;  %869 = vst [vmem:[#allocation2 + $0x388] sm:$0xff] %v5484_v4 }
 0x11d   : > { %932 = vst [vmem:[#allocation2 + $0x288] sm:$0xff] %v5486_v5  ;;  %v5490_v7 = vpop.f32.mrf.mxu0  ;;  %v5492_v8 = vpop.f32.mrf.mxu1 }
 0x11e   : > { %7101 = vst [vmem:[#allocation8_spill] sm:$0xff] %v5492_v8  ;;  %870 = vst [vmem:[#allocation2 + $0x338] sm:$0xff] %v5490_v7 }
 0x11f   : > { %933 = vst [vmem:[#allocation2 + $0x3a8] sm:$0xff] %v5492_v8  ;;  %v5496_v9 = vpop.f32.mrf.mxu0  ;;  %v5498_v10 = vpop.f32.mrf.mxu1 }
 0x120   : > { %7102 = vst [vmem:[#allocation9_spill] sm:$0xff] %v5498_v10  ;;  %871 = vst [vmem:[#allocation2 + $0x340] sm:$0xff] %v5496_v9 }
 0x121   : > { %934 = vst [vmem:[#allocation2 + $0x3c8] sm:$0xff] %v5498_v10  ;;  %v5502_v11 = vpop.f32.mrf.mxu0  ;;  %v5504_v12 = vpop.f32.mrf.mxu1  ;;  %v1151_v10 = vmul.f32 %v5424_v48, %v5424_v48 }
 0x122   : > { %7103 = vst [vmem:[#allocation10_spill] sm:$0xff] %v5504_v12  ;;  %872 = vst [vmem:[#allocation2 + $0x80] sm:$0xff] %v5502_v11 }
 0x123   : > { %935 = vst [vmem:[#allocation2 + $0x160] sm:$0xff] %v5504_v12  ;;  %v5508_v13 = vpop.f32.mrf.mxu0  ;;  %v5510_v14 = vpop.f32.mrf.mxu1  ;;  %v1150_v12 = vmul.f32 %v5418_v46, %v5418_v46 }
 0x124   : > { %7104 = vst [vmem:[#allocation11_spill] sm:$0xff] %v5510_v14  ;;  %873 = vst [vmem:[#allocation2 + $0x1a8] sm:$0xff] %v5508_v13 }
 0x125   : > { %936 = vst [vmem:[#allocation2 + $0x2c8] sm:$0xff] %v5510_v14  ;;  %v5514_v15 = vpop.f32.mrf.mxu0  ;;  %v5516_v16 = vpop.f32.mrf.mxu1 }
 0x126   : > { %7105 = vst [vmem:[#allocation12_spill] sm:$0xff] %v5516_v16  ;;  %874 = vst [vmem:[#allocation2 + $0x1b8] sm:$0xff] %v5514_v15 }
 0x127   : > { %937 = vst [vmem:[#allocation2 + $0x210] sm:$0xff] %v5516_v16  ;;  %v5520_v17 = vpop.f32.mrf.mxu0  ;;  %v5522_v18 = vpop.f32.mrf.mxu1 }
 0x128   : > { %7106 = vst [vmem:[#allocation13_spill] sm:$0xff] %v5522_v18  ;;  %875 = vst [vmem:[#allocation2 + $0x168] sm:$0xff] %v5520_v17 }
 0x129   : > { %938 = vst [vmem:[#allocation2 + $0x3d8] sm:$0xff] %v5522_v18  ;;  %v5526_v19 = vpop.f32.mrf.mxu0  ;;  %v5528_v20 = vpop.f32.mrf.mxu1 }
 0x12a   : > { %7107 = vst [vmem:[#allocation14_spill] sm:$0xff] %v5528_v20  ;;  %876 = vst [vmem:[#allocation2 + $0x3e8] sm:$0xff] %v5526_v19 }
 0x12b   : > { %939 = vst [vmem:[#allocation2 + $0x1e8] sm:$0xff] %v5528_v20  ;;  %v5532_v21 = vpop.f32.mrf.mxu0  ;;  %v5534_v22 = vpop.f32.mrf.mxu1  ;;  %v1149_v20 = vmul.f32 %v5412_v44, %v5412_v44 }
 0x12c   : > { %7108 = vst [vmem:[#allocation15_spill] sm:$0xff] %v5534_v22  ;;  %877 = vst [vmem:[#allocation2 + $0x2f8] sm:$0xff] %v5532_v21 }
 0x12d   : > { %940 = vst [vmem:[#allocation2 + $0x1b0] sm:$0xff] %v5534_v22  ;;  %v5538_v23 = vpop.f32.mrf.mxu0  ;;  %v5540_v24 = vpop.f32.mrf.mxu1  ;;  %v1148_v22 = vmul.f32 %v5406_v42, %v5406_v42 }
 0x12e   : > { %7109 = vst [vmem:[#allocation16_spill] sm:$0xff] %v5540_v24  ;;  %878 = vst [vmem:[#allocation2 + $0x290] sm:$0xff] %v5538_v23 }
 0x12f   : > { %941 = vst [vmem:[#allocation2 + $0x1c8] sm:$0xff] %v5540_v24  ;;  %v5544_v25 = vpop.f32.mrf.mxu0  ;;  %v5546_v26 = vpop.f32.mrf.mxu1  ;;  %v981_v24 = vadd.f32 %v5394_v39, %v5385_v36 }
 0x130   : > { %7110 = vst [vmem:[#allocation17_spill] sm:$0xff] %v5546_v26  ;;  %879 = vst [vmem:[#allocation2 + $0x28] sm:$0xff] %v5544_v25 }
 0x131   : > { %942 = vst [vmem:[#allocation2 + $0x2d0] sm:$0xff] %v5546_v26  ;;  %v5550_v27 = vpop.f32.mrf.mxu0  ;;  %v5552_v28 = vpop.f32.mrf.mxu1  ;;  %v982_v39 = vadd.f32 %v981_v24, %v5406_v42  ;;  %v1152_v42 = vmul.f32 %v5430_v50, %v5430_v50 }
 0x132   : > { %7111 = vst [vmem:[#allocation18_spill] sm:$0xff] %v5552_v28  ;;  %880 = vst [vmem:[#allocation2 + $0x138] sm:$0xff] %v5550_v27 }
 0x133   : > { %943 = vst [vmem:[#allocation2 + $0x1d0] sm:$0xff] %v5552_v28  ;;  %v5556_v29 = vpop.f32.mrf.mxu0  ;;  %v5558_v30 = vpop.f32.mrf.mxu1 }
 0x134   : > { %7112 = vst [vmem:[#allocation19_spill] sm:$0xff] %v5558_v30  ;;  %881 = vst [vmem:[#allocation2 + $0xc0] sm:$0xff] %v5556_v29 }
 0x135   : > { %944 = vst [vmem:[#allocation2 + $0x58] sm:$0xff] %v5558_v30  ;;  %v5562_v31 = vpop.f32.mrf.mxu0  ;;  %v5564_v32 = vpop.f32.mrf.mxu1  ;;  %v1147_v30 = vmul.f32 %v5400_v40, %v5400_v40 }
 0x136   : > { %7113 = vst [vmem:[#allocation20_spill] sm:$0xff] %v5564_v32  ;;  %882 = vst [vmem:[#allocation2 + $0x1c0] sm:$0xff] %v5562_v31 }
 0x137   : > { %945 = vst [vmem:[#allocation2 + $0x120] sm:$0xff] %v5564_v32  ;;  %v5568_v33 = vpop.f32.mrf.mxu0  ;;  %v5570_v34 = vpop.f32.mrf.mxu1  ;;  %v1144_v32 = vmul.f32 %v5385_v36, %v5385_v36  ;;  %v1050_v36 = vadd.f32 %v5400_v40, %v5388_v37  ;;  %v983_v40 = vadd.f32 %v982_v39, %v5418_v46 }
 0x138   : > { %7114 = vst [vmem:[#allocation21_spill] sm:$0xff] %v5570_v34  ;;  %883 = vst [vmem:[#allocation2 + $0x280] sm:$0xff] %v5568_v33 }
 0x139   : > { %946 = vst [vmem:[#allocation2 + $0x198] sm:$0xff] %v5570_v34  ;;  %v5578_v28 = vpop.f32.mrf.mxu0  ;;  %v5580_v26 = vpop.f32.mrf.mxu1  ;;  %v1145_v34 = vmul.f32 %v5388_v37, %v5388_v37  ;;  %v1272_v14 = vadd.f32 %v1146_v35, %v1144_v32  ;;  %v1051_v37 = vadd.f32 %v1050_v36, %v5412_v44  ;;  %v984_v46 = vadd.f32 %v983_v40, %v5430_v50 }
 0x13a   : > { %7115 = vst [vmem:[#allocation22_spill] sm:$0xff] %v5580_v26  ;;  %884 = vst [vmem:[#allocation2 + $0x100] sm:$0xff] %v5578_v28 }
 0x13b   : > { %947 = vst [vmem:[#allocation2 + $0x2e8] sm:$0xff] %v5580_v26  ;;  %v5594_v18 = vpop.f32.mrf.mxu0  ;;  %v5596_v16 = vpop.f32.mrf.mxu1  ;;  %v1341_v26 = vadd.f32 %v1147_v30, %v1145_v34  ;;  %v1273_v32 = vadd.f32 %v1272_v14, %v1148_v22  ;;  %v1153_v30 = vmul.f32 %v5436_v52, %v5436_v52  ;;  %v1052_v44 = vadd.f32 %v1051_v37, %v5424_v48 }
 0x13c   : > { %885 = vst [vmem:[#allocation2 + $0x3c0] sm:$0xff] %v5594_v18  ;;  %948 = vst [vmem:[#allocation2 + $0x1f8] sm:$0xff] %v5596_v16  ;;  %v1154_v22 = vmul.f32 %v5442_v54, %v5442_v54  ;;  %v985_v50 = vadd.f32 %v984_v46, %v5442_v54  ;;  %v1157_v37 = vmul.f32 %v5460_v60, %v5460_v60 }
 0x13d   : > { %v5607_v8 = vpop.f32.mrf.mxu0  ;;  %v5609_v5 = vpop.f32.mrf.mxu1  ;;  %v1342_v24 = vadd.f32 %v1341_v26, %v1149_v20  ;;  %v1274_v14 = vadd.f32 %v1273_v32, %v1150_v12  ;;  %v1155_v26 = vmul.f32 %v5448_v56, %v5448_v56  ;;  %v1053_v48 = vadd.f32 %v1052_v44, %v5436_v52 }
 0x13e   : > { %886 = vst [vmem:[#allocation2 + $0x158] sm:$0xff] %v5607_v8  ;;  %949 = vst [vmem:[#allocation2 + $0x238] sm:$0xff] %v5609_v5  ;;  %v1156_v32 = vmul.f32 %v5454_v58, %v5454_v58  ;;  %v986_v54 = vadd.f32 %v985_v50, %v5454_v58  ;;  %v1159_v44 = vmul.f32 %v5472_v0, %v5472_v0 }
 0x13f   : > { %v5619_v34 = vpop.f32.mrf.mxu0  ;;  %v5621_v35 = vpop.f32.mrf.mxu1  ;;  %v1343_v20 = vadd.f32 %v1342_v24, %v1151_v10  ;;  %v1275_v12 = vadd.f32 %v1274_v14, %v1152_v42  ;;  %v1054_v52 = vadd.f32 %v1053_v48, %v5448_v56  ;;  %v1158_v14 = vmul.f32 %v5466_v62, %v5466_v62 }
 0x140   : > { %887 = vst [vmem:[#allocation2 + $0x3e0] sm:$0xff] %v5619_v34  ;;  %950 = vst [vmem:[#allocation2 + $0x398] sm:$0xff] %v5621_v35  ;;  %v987_v58 = vadd.f32 %v986_v54, %v5466_v62  ;;  %v1161_v48 = vmul.f32 %v5484_v4, %v5484_v4 }
 0x141   : > { %v5631_v36 = vpop.f32.mrf.mxu0  ;;  %v5633_v39 = vpop.f32.mrf.mxu1  ;;  %v1344_v10 = vadd.f32 %v1343_v20, %v1153_v30  ;;  %v1276_v42 = vadd.f32 %v1275_v12, %v1154_v22  ;;  %v1055_v56 = vadd.f32 %v1054_v52, %v5460_v60  ;;  %v1160_v12 = vmul.f32 %v5478_v2, %v5478_v2 }
 0x142   : > { %888 = vst [vmem:[#allocation2 + $0x218] sm:$0xff] %v5631_v36  ;;  %951 = vst [vmem:[#allocation2 + $0x390] sm:$0xff] %v5633_v39  ;;  %v988_v62 = vadd.f32 %v987_v58, %v5478_v2  ;;  %v1163_v52 = vmul.f32 %v5496_v9, %v5496_v9 }
 0x143   : > { %v5643_v40 = vpop.f32.mrf.mxu0  ;;  %v5645_v24 = vpop.f32.mrf.mxu1  ;;  %v1345_v30 = vadd.f32 %v1344_v10, %v1155_v26  ;;  %v1277_v22 = vadd.f32 %v1276_v42, %v1156_v32  ;;  %v1056_v60 = vadd.f32 %v1055_v56, %v5472_v0  ;;  %v1162_v42 = vmul.f32 %v5490_v7, %v5490_v7 }
 0x144   : > { %889 = vst [vmem:[#allocation2 + $0x3f8] sm:$0xff] %v5643_v40  ;;  %952 = vst [vmem:[#allocation2 + $0x1a0] sm:$0xff] %v5645_v24  ;;  %v989_v2 = vadd.f32 %v988_v62, %v5490_v7  ;;  %v1165_v56 = vmul.f32 %v5508_v13, %v5508_v13 }
 0x145   : > { %v5655_v46 = vpop.f32.mrf.mxu0  ;;  %v5657_v20 = vpop.f32.mrf.mxu1  ;;  %v1346_v26 = vadd.f32 %v1345_v30, %v1157_v37  ;;  %v1278_v32 = vadd.f32 %v1277_v22, %v1158_v14  ;;  %v1057_v0 = vadd.f32 %v1056_v60, %v5484_v4  ;;  %v1164_v22 = vmul.f32 %v5502_v11, %v5502_v11 }
 0x146   : > { %890 = vst [vmem:[#allocation2 + $0x8] sm:$0xff] %v5655_v46  ;;  %953 = vst [vmem:[#allocation2 + $0xa8] sm:$0xff] %v5657_v20  ;;  %v990_v7 = vadd.f32 %v989_v2, %v5502_v11  ;;  %v1167_v60 = vmul.f32 %v5520_v17, %v5520_v17 }
 0x147   : > { %v5667_v50 = vpop.f32.mrf.mxu0  ;;  %v5669_v10 = vpop.f32.mrf.mxu1  ;;  %v1347_v37 = vadd.f32 %v1346_v26, %v1159_v44  ;;  %v1279_v14 = vadd.f32 %v1278_v32, %v1160_v12  ;;  %v1058_v4 = vadd.f32 %v1057_v0, %v5496_v9  ;;  %v1166_v32 = vmul.f32 %v5514_v15, %v5514_v15 }
 0x148   : > { %891 = vst [vmem:[#allocation2 + $0x128] sm:$0xff] %v5667_v50  ;;  %954 = vst [vmem:[#allocation2 + $0x258] sm:$0xff] %v5669_v10  ;;  %v991_v11 = vadd.f32 %v990_v7, %v5514_v15  ;;  %v1169_v0 = vmul.f32 %v5532_v21, %v5532_v21 }
 0x149   : > { %v5679_v54 = vpop.f32.mrf.mxu0  ;;  %v5681_v30 = vpop.f32.mrf.mxu1  ;;  %v1348_v44 = vadd.f32 %v1347_v37, %v1161_v48  ;;  %v1280_v12 = vadd.f32 %v1279_v14, %v1162_v42  ;;  %v1059_v9 = vadd.f32 %v1058_v4, %v5508_v13  ;;  %v1168_v14 = vmul.f32 %v5526_v19, %v5526_v19 }
 0x14a   : > { %892 = vst [vmem:[#allocation2 + $0x2a0] sm:$0xff] %v5679_v54  ;;  %955 = vst [vmem:[#allocation2 + $0x2d8] sm:$0xff] %v5681_v30  ;;  %v992_v15 = vadd.f32 %v991_v11, %v5526_v19  ;;  %v1171_v4 = vmul.f32 %v5544_v25, %v5544_v25 }
 0x14b   : > { %v5691_v58 = vpop.f32.mrf.mxu0  ;;  %v5693_v26 = vpop.f32.mrf.mxu1  ;;  %v1349_v48 = vadd.f32 %v1348_v44, %v1163_v52  ;;  %v1281_v42 = vadd.f32 %v1280_v12, %v1164_v22  ;;  %v1060_v13 = vadd.f32 %v1059_v9, %v5520_v17  ;;  %v1170_v12 = vmul.f32 %v5538_v23, %v5538_v23 }
 0x14c   : > { %893 = vst [vmem:[#allocation2 + $0x3f0] sm:$0xff] %v5691_v58  ;;  %956 = vst [vmem:[#allocation2 + $0xf0] sm:$0xff] %v5693_v26  ;;  %v993_v19 = vadd.f32 %v992_v15, %v5538_v23  ;;  %v1173_v9 = vmul.f32 %v5556_v29, %v5556_v29 }
 0x14d   : > { %v5703_v62 = vpop.f32.mrf.mxu0  ;;  %v5705_v37 = vpop.f32.mrf.mxu1  ;;  %v1350_v52 = vadd.f32 %v1349_v48, %v1165_v56  ;;  %v1282_v22 = vadd.f32 %v1281_v42, %v1166_v32  ;;  %v1061_v17 = vadd.f32 %v1060_v13, %v5532_v21  ;;  %v1172_v42 = vmul.f32 %v5550_v27, %v5550_v27 }
 0x14e   : > { %894 = vst [vmem:[#allocation2 + $0xa0] sm:$0xff] %v5703_v62  ;;  %957 = vst [vmem:[#allocation2 + $0x180] sm:$0xff] %v5705_v37  ;;  %v994_v23 = vadd.f32 %v993_v19, %v5550_v27  ;;  %v1175_v13 = vmul.f32 %v5568_v33, %v5568_v33 }
 0x14f   : > { %v5715_v2 = vpop.f32.mrf.mxu0  ;;  %v5717_v44 = vpop.f32.mrf.mxu1  ;;  %v1351_v56 = vadd.f32 %v1350_v52, %v1167_v60  ;;  %v1283_v32 = vadd.f32 %v1282_v22, %v1168_v14  ;;  %v1062_v21 = vadd.f32 %v1061_v17, %v5544_v25  ;;  %v1174_v22 = vmul.f32 %v5562_v31, %v5562_v31 }
 0x150   : > { %895 = vst [vmem:[#allocation2 + $0x2c0] sm:$0xff] %v5715_v2  ;;  %958 = vst [vmem:[#allocation2 + $0x170] sm:$0xff] %v5717_v44  ;;  %v995_v27 = vadd.f32 %v994_v23, %v5562_v31  ;;  %v1177_v17 = vmul.f32 %v5594_v18, %v5594_v18 }
 0x151   : > { %v5727_v7 = vpop.f32.mrf.mxu0  ;;  %v5729_v48 = vpop.f32.mrf.mxu1  ;;  %v1352_v60 = vadd.f32 %v1351_v56, %v1169_v0  ;;  %v1284_v14 = vadd.f32 %v1283_v32, %v1170_v12  ;;  %v1063_v25 = vadd.f32 %v1062_v21, %v5556_v29  ;;  %v1176_v32 = vmul.f32 %v5578_v28, %v5578_v28 }
 0x152   : > { %896 = vst [vmem:[#allocation2 + $0xb0] sm:$0xff] %v5727_v7  ;;  %959 = vst [vmem:[#allocation2 + $0x3d0] sm:$0xff] %v5729_v48  ;;  %v996_v31 = vadd.f32 %v995_v27, %v5578_v28  ;;  %v1179_v21 = vmul.f32 %v5619_v34, %v5619_v34 }
 0x153   : > { %v5739_v11 = vpop.f32.mrf.mxu0  ;;  %v5741_v52 = vpop.f32.mrf.mxu1  ;;  %v1353_v0 = vadd.f32 %v1352_v60, %v1171_v4  ;;  %v1285_v12 = vadd.f32 %v1284_v14, %v1172_v42  ;;  %v1064_v29 = vadd.f32 %v1063_v25, %v5568_v33  ;;  %v1178_v14 = vmul.f32 %v5607_v8, %v5607_v8 }
 0x154   : > { %897 = vst [vmem:[#allocation2 + $0x1e0] sm:$0xff] %v5739_v11  ;;  %960 = vst [vmem:[#allocation2 + $0x250] sm:$0xff] %v5741_v52  ;;  %v997_v28 = vadd.f32 %v996_v31, %v5607_v8  ;;  %v1181_v25 = vmul.f32 %v5643_v40, %v5643_v40 }
 0x155   : > { %v5751_v15 = vpop.f32.mrf.mxu0  ;;  %v5753_v56 = vpop.f32.mrf.mxu1  ;;  %v1354_v4 = vadd.f32 %v1353_v0, %v1173_v9  ;;  %v1286_v42 = vadd.f32 %v1285_v12, %v1174_v22  ;;  %v1065_v33 = vadd.f32 %v1064_v29, %v5594_v18  ;;  %v1180_v12 = vmul.f32 %v5631_v36, %v5631_v36 }
 0x156   : > { %898 = vst [vmem:[#allocation2 + $0x1f0] sm:$0xff] %v5751_v15  ;;  %961 = vst [vmem:[#allocation2 + $0x378] sm:$0xff] %v5753_v56  ;;  %v998_v8 = vadd.f32 %v997_v28, %v5631_v36  ;;  %v1183_v29 = vmul.f32 %v5667_v50, %v5667_v50 }
 0x157   : > { %v5763_v19 = vpop.f32.mrf.mxu0  ;;  %v5765_v60 = vpop.f32.mrf.mxu1  ;;  %v1355_v9 = vadd.f32 %v1354_v4, %v1175_v13  ;;  %v1287_v22 = vadd.f32 %v1286_v42, %v1176_v32  ;;  %v1066_v18 = vadd.f32 %v1065_v33, %v5619_v34  ;;  %v1182_v42 = vmul.f32 %v5655_v46, %v5655_v46 }
 0x158   : > { %899 = vst [vmem:[#allocation2 + $0x10] sm:$0xff] %v5763_v19  ;;  %962 = vst [vmem:[#allocation2 + $0xb8] sm:$0xff] %v5765_v60  ;;  %v999_v36 = vadd.f32 %v998_v8, %v5655_v46  ;;  %v1185_v33 = vmul.f32 %v5691_v58, %v5691_v58 }
 0x159   : > { %v5775_v23 = vpop.f32.mrf.mxu0  ;;  %v5777_v0 = vpop.f32.mrf.mxu1  ;;  %v1356_v13 = vadd.f32 %v1355_v9, %v1177_v17  ;;  %v1288_v32 = vadd.f32 %v1287_v22, %v1178_v14  ;;  %v1067_v34 = vadd.f32 %v1066_v18, %v5643_v40  ;;  %v1184_v22 = vmul.f32 %v5679_v54, %v5679_v54 }
 0x15a   : > { %900 = vst [vmem:[#allocation2 + $0x230] sm:$0xff] %v5775_v23  ;;  %963 = vst [vmem:[#allocation2 + $0x38] sm:$0xff] %v5777_v0  ;;  %v1000_v46 = vadd.f32 %v999_v36, %v5679_v54  ;;  %v1187_v18 = vmul.f32 %v5715_v2, %v5715_v2  ;;  %v1188_v54 = vmul.f32 %v5727_v7, %v5727_v7 }
 0x15b   : > { %v5787_v27 = vpop.f32.mrf.mxu0  ;;  %v5789_v4 = vpop.f32.mrf.mxu1  ;;  %v1357_v17 = vadd.f32 %v1356_v13, %v1179_v21  ;;  %v1289_v14 = vadd.f32 %v1288_v32, %v1180_v12  ;;  %v1068_v40 = vadd.f32 %v1067_v34, %v5667_v50  ;;  %v1186_v32 = vmul.f32 %v5703_v62, %v5703_v62 }
 0x15c   : > { %901 = vst [vmem:[#allocation2 + $0x240] sm:$0xff] %v5787_v27  ;;  %964 = vst [vmem:[#allocation2 + $0x78] sm:$0xff] %v5789_v4  ;;  %v1001_v50 = vadd.f32 %v1000_v46, %v5703_v62  ;;  %v1190_v62 = vmul.f32 %v5751_v15, %v5751_v15 }
 0x15d   : > { %v5799_v31 = vpop.f32.mrf.mxu0  ;;  %v5801_v9 = vpop.f32.mrf.mxu1  ;;  %v1358_v21 = vadd.f32 %v1357_v17, %v1181_v25  ;;  %v1290_v12 = vadd.f32 %v1289_v14, %v1182_v42  ;;  %v1069_v42 = vadd.f32 %v1068_v40, %v5691_v58 }
 0x15e   : > { %7116 = vst [vmem:[#allocation23_spill] sm:$0xff] %v5801_v9  ;;  %902 = vst [vmem:[#allocation2 + $0x90] sm:$0xff] %v5799_v31  ;;  %v1002_v58 = vadd.f32 %v1001_v50, %v5727_v7  ;;  %v1192_v7 = vmul.f32 %v5775_v23, %v5775_v23 }
 0x15f   : > { %965 = vst [vmem:[#allocation2 + $0x308] sm:$0xff] %v5801_v9  ;;  %v5811_v28 = vpop.f32.mrf.mxu0  ;;  %v5813_v13 = vpop.f32.mrf.mxu1  ;;  %v1359_v25 = vadd.f32 %v1358_v21, %v1183_v29  ;;  %v1291_v9 = vadd.f32 %v1290_v12, %v1184_v22  ;;  %v1189_v29 = vmul.f32 %v5739_v11, %v5739_v11  ;;  %v1070_v22 = vadd.f32 %v1069_v42, %v5715_v2 }
 0x160   : > { %903 = vst [vmem:[#allocation2 + $0x3a0] sm:$0xff] %v5811_v28  ;;  %966 = vst [vmem:[#allocation2 + $0x370] sm:$0xff] %v5813_v13  ;;  %v1003_v2 = vadd.f32 %v1002_v58, %v5751_v15  ;;  %v1194_v15 = vmul.f32 %v5799_v31, %v5799_v31 }
 0x161   : > { %v619_v8 = vpop.f32.mrf.mxu0  ;;  %v5823_v17 = vpop.f32.mrf.mxu1  ;;  %v1360_v14 = vadd.f32 %v1359_v25, %v1185_v33  ;;  %v1292_v21 = vadd.f32 %v1291_v9, %v1186_v32  ;;  %v1191_v33 = vmul.f32 %v5763_v19, %v5763_v19  ;;  %v1071_v9 = vadd.f32 %v1070_v22, %v5739_v11 }
 0x162   : > { %904 = vst [vmem:[#allocation2 + $0x208] sm:$0xff] %v619_v8  ;;  %967 = vst [vmem:[#allocation2 + $0xc8] sm:$0xff] %v5823_v17  ;;  %v1004_v11 = vadd.f32 %v1003_v2, %v5775_v23 }
 0x163   : > { %v621_v34 = vpop.f32.mrf.mxu0  ;;  %v5832_v36 = vpop.f32.mrf.mxu1  ;;  %v1361_v12 = vadd.f32 %v1360_v14, %v1187_v18  ;;  %v1293_v25 = vadd.f32 %v1292_v21, %v1188_v54  ;;  %v1193_v18 = vmul.f32 %v5787_v27, %v5787_v27  ;;  %v1072_v54 = vadd.f32 %v1071_v9, %v5763_v19 }
 0x164   : > { %7117 = vst [vmem:[#allocation24_spill] sm:$0xff] %v5832_v36  ;;  %905 = vst [vmem:[#allocation2 + $0xd0] sm:$0xff] %v621_v34  ;;  %v1005_v19 = vadd.f32 %v1004_v11, %v5799_v31  ;;  %v1197_v9 = vmul.f32 %v621_v34, %v621_v34 }
 0x165   : > { %968 = vst [vmem:[#allocation2 + $0x278] sm:$0xff] %v5832_v36  ;;  %v625_v40 = vpop.f32.mrf.mxu0  ;;  %v5841_v46 = vpop.f32.mrf.mxu1  ;;  %v1362_v32 = vadd.f32 %v1361_v12, %v1189_v29  ;;  %v1294_v14 = vadd.f32 %v1293_v25, %v1190_v62  ;;  %v1195_v29 = vmul.f32 %v5811_v28, %v5811_v28  ;;  %v1073_v62 = vadd.f32 %v1072_v54, %v5787_v27 }
 0x166   : > { %7118 = vst [vmem:[#allocation25_spill] sm:$0xff] %v5841_v46  ;;  %906 = vst [vmem:[#allocation2 + $0x88] sm:$0xff] %v625_v40  ;;  %v1196_v25 = vmul.f32 %v619_v8, %v619_v8  ;;  %v1198_v36 = vmul.f32 %v625_v40, %v625_v40 }
 0x167   : > { %969 = vst [vmem:[#allocation2 + $0x360] sm:$0xff] %v5841_v46  ;;  %v627_v42 = vpop.f32.mrf.mxu0  ;;  %v5850_v50 = vpop.f32.mrf.mxu1  ;;  %v1363_v21 = vadd.f32 %v1362_v32, %v1191_v33  ;;  %v1295_v12 = vadd.f32 %v1294_v14, %v1192_v7  ;;  %v1074_v32 = vadd.f32 %v1073_v62, %v5811_v28  ;;  %v1006_v46 = vadd.f32 %v1005_v19, %v619_v8 }
 0x168   : > { %7119 = vst [vmem:[#allocation26_spill] sm:$0xff] %v5850_v50  ;;  %907 = vst [vmem:[#allocation2 + $0x2f0] sm:$0xff] %v627_v42  ;;  %v1199_v7 = vmul.f32 %v627_v42, %v627_v42 }
 0x169   : > { %970 = vst [vmem:[#allocation2 + $0x228] sm:$0xff] %v5850_v50  ;;  %v631_v22 = vpop.f32.mrf.mxu0  ;;  %v5859_v58 = vpop.f32.mrf.mxu1  ;;  %v1364_v23 = vadd.f32 %v1363_v21, %v1193_v18  ;;  %v1296_v33 = vadd.f32 %v1295_v12, %v1194_v15  ;;  %v1075_v11 = vadd.f32 %v1074_v32, %v621_v34  ;;  %v1007_v18 = vadd.f32 %v1006_v46, %v625_v40 }
 0x16a   : > { %908 = vst [vmem:[#allocation2 + $0x358] sm:$0xff] %v631_v22  ;;  %971 = vst [vmem:[#allocation2 + $0x348] sm:$0xff] %v5859_v58  ;;  %v1200_v21 = vmul.f32 %v631_v22, %v631_v22 }
 0x16b   : > { %v633_v2 = vpop.f32.mrf.mxu0  ;;  %v5864_v50 = vpop.f32.mrf.mxu1  ;;  %v1365_v27 = vadd.f32 %v1364_v23, %v1195_v29  ;;  %v1297_v54 = vadd.f32 %v1296_v33, %v1196_v25  ;;  %v1076_v19 = vadd.f32 %v1075_v11, %v627_v42 }
 0x16c   : > { %7120 = vst [vmem:[#allocation27_spill] sm:$0xff] %v5864_v50  ;;  %909 = vst [vmem:[#allocation2 + $0x268] sm:$0xff] %v633_v2  ;;  %v1201_v12 = vmul.f32 %v633_v2, %v633_v2 }
 0x16d   : > { %972 = vst [vmem:[#allocation2 + $0x148] sm:$0xff] %v5864_v50  ;;  %v637_v31 = vpop.f32.mrf.mxu0  ;;  %v5868_v14 = vpop.f32.mrf.mxu1  ;;  %v1366_v15 = vadd.f32 %v1365_v27, %v1197_v9  ;;  %v1298_v62 = vadd.f32 %v1297_v54, %v1198_v36  ;;  %v1008_v50 = vadd.f32 %v1007_v18, %v631_v22  ;;  %v1077_v33 = vadd.f32 %v1076_v19, %v633_v2 }
 0x16e   : > { %910 = vst [vmem:[#allocation2 + $0x350] sm:$0xff] %v637_v31  ;;  %973 = vst [vmem:[#allocation2 + $0xf8] sm:$0xff] %v5868_v14  ;;  %v1202_v29 = vmul.f32 %v637_v31, %v637_v31 }
 0x16f   : > { %v639_v28 = vpop.f32.mrf.mxu0  ;;  %v5871_v8 = vpop.f32.mrf.mxu1  ;;  %v1367_v23 = vadd.f32 %v1366_v15, %v1199_v7  ;;  %v1299_v46 = vadd.f32 %v1298_v62, %v1200_v21  ;;  %v1009_v32 = vadd.f32 %v1008_v50, %v637_v31 }
 0x170   : > { %911 = vst [vmem:[#allocation2 + $0x188] sm:$0xff] %v639_v28  ;;  %974 = vst [vmem:[#allocation2 + $0x68] sm:$0xff] %v5871_v8  ;;  %v1203_v25 = vmul.f32 %v639_v28, %v639_v28  ;;  %v1078_v54 = vadd.f32 %v1077_v33, %v639_v28  ;;  %v1209_v33 = vmul.f32 %v5396_v6, %v5396_v6 }
 0x171   : > { %v643_v34 = vpop.f32.mrf.mxu0  ;;  %v5874_v40 = vpop.f32.mrf.mxu1  ;;  %v1368_v27 = vadd.f32 %v1367_v23, %v1201_v12  ;;  %v1300_v22 = vadd.f32 %v1299_v46, %v1202_v29  ;;  %v1208_v12 = vmul.f32 %v5390_v38, %v5390_v38 }
 0x172   : > { %912 = vst [vmem:[#allocation2 + $0x1d8] sm:$0xff] %v643_v34  ;;  %v1204_v9 = vmul.f32 %v643_v34, %v643_v34  ;;  %975 = vst [vmem:[#allocation2] sm:$0xff] %v5874_v40  ;;  %v1010_v11 = vadd.f32 %v1009_v32, %v643_v34  ;;  %v1210_v32 = vmul.f32 %v5402_v41, %v5402_v41 }
 0x173   : > { %v645_v36 = vpop.f32.mrf.mxu0  ;;  %v5877_v42 = vpop.f32.mrf.mxu1  ;;  %v1369_v18 = vadd.f32 %v1368_v27, %v1203_v25 }
 0x174   : > { %913 = vst [vmem:[#allocation2 + $0x30] sm:$0xff] %v645_v36  ;;  %v1205_v7 = vmul.f32 %v645_v36, %v645_v36  ;;  %976 = vst [vmem:[#allocation2 + $0x298] sm:$0xff] %v5877_v42  ;;  %v1301_v50 = vadd.f32 %v1300_v22, %v1204_v9  ;;  %v1079_v2 = vadd.f32 %v1078_v54, %v645_v36 }
 0x175   : > { %v649_v15 = vpop.f32.mrf.mxu0  ;;  %v5880_v21 = vpop.f32.mrf.mxu1  ;;  %v1211_v54 = vmul.f32 %v5408_v43, %v5408_v43 }
 0x176   : > { %914 = vst [vmem:[#allocation2 + $0x140] sm:$0xff] %v649_v15  ;;  %v1011_v31 = vadd.f32 %v1010_v11, %v649_v15  ;;  %v1206_v62 = vmul.f32 %v649_v15, %v649_v15  ;;  %977 = vst [vmem:[#allocation2 + $0x270] sm:$0xff] %v5880_v21  ;;  %v1370_v28 = vadd.f32 %v1369_v18, %v1205_v7 }
 0x177   : > { %v651_v19 = vpop.f32.mrf.mxu0  ;;  %v5885_v29 = vpop.f32.mrf.mxu1  ;;  %v1212_v11 = vmul.f32 %v5414_v45, %v5414_v45 }
 0x178   : > { %v1012_v23 = vadd.f32 %v1011_v31, %v5390_v38  ;;  %v1302_v25 = vadd.f32 %v1301_v50, %v1206_v62  ;;  %915 = vst [vmem:[#allocation2 + $0x2a8] sm:$0xff] %v651_v19  ;;  %v1080_v34 = vadd.f32 %v1079_v2, %v651_v19  ;;  %v1207_v46 = vmul.f32 %v651_v19, %v651_v19 }
 0x179   : > { %978 = vst [vmem:[#allocation2 + $0x310] sm:$0xff] %v5885_v29  ;;  %v5893_v9 = vpop.f32.mrf.mxu1 }
 0x17a   : > { %v1013_v27 = vadd.f32 %v1012_v23, %v5402_v41  ;;  %v1303_v36 = vadd.f32 %v1302_v25, %v1208_v12  ;;  %v1081_v22 = vadd.f32 %v1080_v34, %v5396_v6  ;;  %v1371_v38 = vadd.f32 %v1370_v28, %v1207_v46  ;;  %979 = vst [vmem:[#allocation2 + $0x190] sm:$0xff] %v5893_v9 }
 0x17b   : > { %v1213_v41 = vmul.f32 %v5420_v47, %v5420_v47  ;;  %v1214_v6 = vmul.f32 %v5426_v49, %v5426_v49  ;;  %v1215_v28 = vmul.f32 %v5432_v51, %v5432_v51  ;;  %v1217_v34 = vmul.f32 %v5444_v55, %v5444_v55 }
 0x17c   : > { %v1014_v7 = vadd.f32 %v1013_v27, %v5414_v45  ;;  %v1304_v18 = vadd.f32 %v1303_v36, %v1210_v32  ;;  %v1082_v15 = vadd.f32 %v1081_v22, %v5408_v43  ;;  %v1372_v50 = vadd.f32 %v1371_v38, %v1209_v33 }
 0x17d   : > { %v1216_v45 = vmul.f32 %v5438_v53, %v5438_v53  ;;  %v1219_v27 = vmul.f32 %v5456_v59, %v5456_v59 }
 0x17e   : > { %v1015_v2 = vadd.f32 %v1014_v7, %v5426_v49  ;;  %v1305_v31 = vadd.f32 %v1304_v18, %v1212_v11  ;;  %v1083_v62 = vadd.f32 %v1082_v15, %v5420_v47  ;;  %v1373_v12 = vadd.f32 %v1372_v50, %v1211_v54 }
 0x17f   : > { %v1218_v49 = vmul.f32 %v5450_v57, %v5450_v57  ;;  %v1221_v54 = vmul.f32 %v5468_v63, %v5468_v63  ;;  %v1223_v15 = vmul.f32 %v5480_v3, %v5480_v3 }
 0x180   : > { %v1016_v43 = vadd.f32 %v1015_v2, %v5438_v53  ;;  %v1306_v19 = vadd.f32 %v1305_v31, %v1214_v6  ;;  %v1084_v23 = vadd.f32 %v1083_v62, %v5432_v51  ;;  %v1374_v25 = vadd.f32 %v1373_v12, %v1213_v41  ;;  %v7122_v31 = vld [vmem:[#allocation8_spill] sm:$0xff] }
 0x181   : > { %v1220_v53 = vmul.f32 %v5462_v61, %v5462_v61  ;;  %v1225_v62 = vmul.f32 %v7122_v31, %v7122_v31 }
 0x182   : > { %v1017_v47 = vadd.f32 %v1016_v43, %v5450_v57  ;;  %v1307_v46 = vadd.f32 %v1306_v19, %v1216_v45  ;;  %v1085_v33 = vadd.f32 %v1084_v23, %v5444_v55  ;;  %v1375_v32 = vadd.f32 %v1374_v25, %v1215_v28  ;;  %v7124_v19 = vld [vmem:[#allocation10_spill] sm:$0xff]  ;;  %v7125_v25 = vld [vmem:[#allocation11_spill] sm:$0xff] }
 0x183   : > { %v1222_v57 = vmul.f32 %v5474_v1, %v5474_v1  ;;  %v1227_v23 = vmul.f32 %v7124_v19, %v7124_v19 }
 0x184   : > { %v1018_v51 = vadd.f32 %v1017_v47, %v5462_v61  ;;  %v1308_v36 = vadd.f32 %v1307_v46, %v1218_v49  ;;  %v1086_v22 = vadd.f32 %v1085_v33, %v5456_v59  ;;  %v1376_v38 = vadd.f32 %v1375_v32, %v1217_v34  ;;  %v7121_v61 = vld [vmem:[#allocation7_spill] sm:$0xff]  ;;  %v7126_v33 = vld [vmem:[#allocation12_spill] sm:$0xff] }
 0x185   : > { %v1224_v50 = vmul.f32 %v7121_v61, %v7121_v61  ;;  %v1229_v32 = vmul.f32 %v7126_v33, %v7126_v33 }
 0x186   : > { %v1019_v55 = vadd.f32 %v1018_v51, %v5474_v1  ;;  %v1309_v11 = vadd.f32 %v1308_v36, %v1220_v53  ;;  %v1087_v7 = vadd.f32 %v1086_v22, %v5468_v63  ;;  %v1377_v18 = vadd.f32 %v1376_v38, %v1219_v27  ;;  %v7123_v1 = vld [vmem:[#allocation9_spill] sm:$0xff] }
 0x187   : > { %v1226_v12 = vmul.f32 %v7123_v1, %v7123_v1  ;;  %v7127_v27 = vld [vmem:[#allocation13_spill] sm:$0xff] }
 0x188   : > { %v1310_v59 = vadd.f32 %v1309_v11, %v1222_v57  ;;  %v1088_v41 = vadd.f32 %v1087_v7, %v5480_v3  ;;  %v1378_v6 = vadd.f32 %v1377_v18, %v1221_v54  ;;  %v1020_v2 = vadd.f32 %v1019_v55, %v7121_v61  ;;  %v7128_v54 = vld [vmem:[#allocation14_spill] sm:$0xff]  ;;  %v7129_v55 = vld [vmem:[#allocation15_spill] sm:$0xff] }
 0x189   : > { %v1228_v3 = vmul.f32 %v7125_v25, %v7125_v25  ;;  %v1230_v53 = vmul.f32 %v7127_v27, %v7127_v27  ;;  %v1231_v57 = vmul.f32 %v7128_v54, %v7128_v54  ;;  %v1232_v11 = vmul.f32 %v7129_v55, %v7129_v55 }
 0x18a   : > { %v1379_v63 = vadd.f32 %v1378_v6, %v1223_v15  ;;  %v1021_v28 = vadd.f32 %v1020_v2, %v7123_v1  ;;  %v1311_v45 = vadd.f32 %v1310_v59, %v1224_v50  ;;  %v1089_v43 = vadd.f32 %v1088_v41, %v7122_v31  ;;  %v7130_v50 = vld [vmem:[#allocation16_spill] sm:$0xff]  ;;  %v7131_v41 = vld [vmem:[#allocation17_spill] sm:$0xff] }
 0x18b   : > { %v1233_v59 = vmul.f32 %v7130_v50, %v7130_v50  ;;  %v1234_v6 = vmul.f32 %v7131_v41, %v7131_v41 }
 0x18c   : > { %v1022_v34 = vadd.f32 %v1021_v28, %v7125_v25  ;;  %v1312_v49 = vadd.f32 %v1311_v45, %v1226_v12  ;;  %v1090_v47 = vadd.f32 %v1089_v43, %v7124_v19  ;;  %v1380_v46 = vadd.f32 %v1379_v63, %v1225_v62  ;;  %v7132_v12 = vld [vmem:[#allocation18_spill] sm:$0xff]  ;;  %v7133_v28 = vld [vmem:[#allocation19_spill] sm:$0xff] }
 0x18d   : > { %v1235_v63 = vmul.f32 %v7132_v12, %v7132_v12  ;;  %v1236_v45 = vmul.f32 %v7133_v28, %v7133_v28 }
 0x18e   : > { %v1023_v51 = vadd.f32 %v1022_v34, %v7127_v27  ;;  %v1313_v36 = vadd.f32 %v1312_v49, %v1228_v3  ;;  %v1091_v22 = vadd.f32 %v1090_v47, %v7126_v33  ;;  %v1381_v38 = vadd.f32 %v1380_v46, %v1227_v23  ;;  %v7134_v3 = vld [vmem:[#allocation20_spill] sm:$0xff]  ;;  %v7135_v49 = vld [vmem:[#allocation21_spill] sm:$0xff] }
 0x18f   : > { %v1237_v34 = vmul.f32 %v7134_v3, %v7134_v3  ;;  %v1238_v47 = vmul.f32 %v7135_v49, %v7135_v49 }
 0x190   : > { %v1024_v7 = vadd.f32 %v1023_v51, %v7129_v55  ;;  %v1314_v18 = vadd.f32 %v1313_v36, %v1230_v53  ;;  %v1092_v15 = vadd.f32 %v1091_v22, %v7128_v54  ;;  %v1382_v61 = vadd.f32 %v1381_v38, %v1229_v32  ;;  %v7136_v53 = vld [vmem:[#allocation22_spill] sm:$0xff] }
 0x191   : > { %v1239_v51 = vmul.f32 %v7136_v53, %v7136_v53  ;;  %v1240_v36 = vmul.f32 %v5596_v16, %v5596_v16  ;;  %v1241_v55 = vmul.f32 %v5609_v5, %v5609_v5 }
 0x192   : > { %v1025_v2 = vadd.f32 %v1024_v7, %v7131_v41  ;;  %v1315_v31 = vadd.f32 %v1314_v18, %v1232_v11  ;;  %v1093_v62 = vadd.f32 %v1092_v15, %v7130_v50  ;;  %v1383_v1 = vadd.f32 %v1382_v61, %v1231_v57 }
 0x193   : > { %v1242_v11 = vmul.f32 %v5621_v35, %v5621_v35  ;;  %v1243_v50 = vmul.f32 %v5633_v39, %v5633_v39 }
 0x194   : > { %v1026_v43 = vadd.f32 %v1025_v2, %v7133_v28  ;;  %v1316_v19 = vadd.f32 %v1315_v31, %v1234_v6  ;;  %v1094_v23 = vadd.f32 %v1093_v62, %v7132_v12  ;;  %v1384_v25 = vadd.f32 %v1383_v1, %v1233_v59 }
 0x195   : > { %v1245_v31 = vmul.f32 %v5657_v20, %v5657_v20 }
 0x196   : > { %v1027_v46 = vadd.f32 %v1026_v43, %v7135_v49  ;;  %v1317_v33 = vadd.f32 %v1316_v19, %v1236_v45  ;;  %v1095_v32 = vadd.f32 %v1094_v23, %v7134_v3  ;;  %v1385_v27 = vadd.f32 %v1384_v25, %v1235_v63 }
 0x197   : > { %v1247_v63 = vmul.f32 %v5681_v30, %v5681_v30  ;;  %v1249_v19 = vmul.f32 %v5705_v37, %v5705_v37 }
 0x198   : > { %v1028_v22 = vadd.f32 %v1027_v46, %v5596_v16  ;;  %v1318_v38 = vadd.f32 %v1317_v33, %v1238_v47  ;;  %v1096_v54 = vadd.f32 %v1095_v32, %v7136_v53  ;;  %v1386_v57 = vadd.f32 %v1385_v27, %v1237_v34 }
 0x199   : > { %v1244_v16 = vmul.f32 %v5645_v24, %v5645_v24  ;;  %v1251_v34 = vmul.f32 %v5729_v48, %v5729_v48  ;;  %v1253_v33 = vmul.f32 %v5753_v56, %v5753_v56 }
 0x19a   : > { %v1319_v7 = vadd.f32 %v1318_v38, %v1240_v36  ;;  %v1097_v18 = vadd.f32 %v1096_v54, %v5609_v5  ;;  %v1387_v15 = vadd.f32 %v1386_v57, %v1239_v51  ;;  %v1029_v61 = vadd.f32 %v1028_v22, %v5621_v35  ;;  %v7137_v54 = vld [vmem:[#allocation23_spill] sm:$0xff] }
 0x19b   : > { %v1246_v5 = vmul.f32 %v5669_v10, %v5669_v10  ;;  %v1255_v51 = vmul.f32 %v5777_v0, %v5777_v0  ;;  %v1257_v57 = vmul.f32 %v7137_v54, %v7137_v54 }
 0x19c   : > { %v1388_v59 = vadd.f32 %v1387_v15, %v1241_v55  ;;  %v1320_v41 = vadd.f32 %v1319_v7, %v1242_v11  ;;  %v1098_v6 = vadd.f32 %v1097_v18, %v5633_v39  ;;  %v1030_v2 = vadd.f32 %v1029_v61, %v5645_v24  ;;  %v7138_v15 = vld [vmem:[#allocation24_spill] sm:$0xff] }
 0x19d   : > { %v1248_v39 = vmul.f32 %v5693_v26, %v5693_v26  ;;  %v1259_v18 = vmul.f32 %v5823_v17, %v5823_v17 }
 0x19e   : > { %v1389_v62 = vadd.f32 %v1388_v59, %v1243_v50  ;;  %v1321_v35 = vadd.f32 %v1320_v41, %v1244_v16  ;;  %v1099_v1 = vadd.f32 %v1098_v6, %v5657_v20  ;;  %v1031_v12 = vadd.f32 %v1030_v2, %v5669_v10  ;;  %v7139_v59 = vld [vmem:[#allocation25_spill] sm:$0xff]  ;;  %v7140_v6 = vld [vmem:[#allocation26_spill] sm:$0xff] }
 0x19f   : > { %v1250_v20 = vmul.f32 %v5717_v44, %v5717_v44  ;;  %v1261_v41 = vmul.f32 %v7139_v59, %v7139_v59  ;;  %v1262_v2 = vmul.f32 %v7140_v6, %v7140_v6 }
 0x1a0   : > { %v1390_v28 = vadd.f32 %v1389_v62, %v1245_v31  ;;  %v1322_v24 = vadd.f32 %v1321_v35, %v1246_v5  ;;  %v1100_v45 = vadd.f32 %v1099_v1, %v5681_v30  ;;  %v1032_v43 = vadd.f32 %v1031_v12, %v5693_v26  ;;  %v7141_v1 = vld [vmem:[#allocation27_spill] sm:$0xff] }
 0x1a1   : > { %v1252_v30 = vmul.f32 %v5741_v52, %v5741_v52  ;;  %v1263_v35 = vmul.f32 %v5859_v58, %v5859_v58 }
 0x1a2   : > { %v1391_v23 = vadd.f32 %v1390_v28, %v1247_v63  ;;  %v1323_v10 = vadd.f32 %v1322_v24, %v1248_v39  ;;  %v1101_v25 = vadd.f32 %v1100_v45, %v5705_v37  ;;  %v1033_v3 = vadd.f32 %v1032_v43, %v5717_v44 }
 0x1a3   : > { %v1254_v37 = vmul.f32 %v5765_v60, %v5765_v60  ;;  %v1265_v24 = vmul.f32 %v5868_v14, %v5868_v14  ;;  %v1266_v45 = vmul.f32 %v5871_v8, %v5871_v8 }
 0x1a4   : > { %v1392_v49 = vadd.f32 %v1391_v23, %v1249_v19  ;;  %v1324_v26 = vadd.f32 %v1323_v10, %v1250_v20  ;;  %v1102_v47 = vadd.f32 %v1101_v25, %v5729_v48  ;;  %v1034_v46 = vadd.f32 %v1033_v3, %v5741_v52 }
 0x1a5   : > { %v1256_v48 = vmul.f32 %v5789_v4, %v5789_v4  ;;  %v1267_v10 = vmul.f32 %v5874_v40, %v5874_v40  ;;  %v1270_v25 = vmul.f32 %v5885_v29, %v5885_v29 }
 0x1a6   : > { %v1393_v32 = vadd.f32 %v1392_v49, %v1251_v34  ;;  %v1325_v44 = vadd.f32 %v1324_v26, %v1252_v30  ;;  %v1103_v27 = vadd.f32 %v1102_v47, %v5753_v56  ;;  %v1035_v53 = vadd.f32 %v1034_v46, %v5765_v60 }
 0x1a7   : > { %v1258_v56 = vmul.f32 %v5813_v13, %v5813_v13 }
 0x1a8   : > { %v1394_v36 = vadd.f32 %v1393_v32, %v1253_v33  ;;  %v1326_v52 = vadd.f32 %v1325_v44, %v1254_v37  ;;  %v1104_v22 = vadd.f32 %v1103_v27, %v5777_v0  ;;  %v1036_v38 = vadd.f32 %v1035_v53, %v5789_v4 }
 0x1a9   : > { %v1260_v0 = vmul.f32 %v7138_v15, %v7138_v15  ;;  %v1271_v33 = vmul.f32 %v5893_v9, %v5893_v9 }
 0x1aa   : > { %v1395_v55 = vadd.f32 %v1394_v36, %v1255_v51  ;;  %v1327_v60 = vadd.f32 %v1326_v52, %v1256_v48  ;;  %v1105_v11 = vadd.f32 %v1104_v22, %v7137_v54  ;;  %v1037_v7 = vadd.f32 %v1036_v38, %v5813_v13 }
 0x1ab   : > { %v4972_v48 = vmov 1966171168   ;;  %v1125_v52 = vlaneseq }
 0x1ac   : > { %v1396_v61 = vadd.f32 %v1395_v55, %v1257_v57  ;;  %v1328_v4 = vadd.f32 %v1327_v60, %v1258_v56  ;;  %v1106_v50 = vadd.f32 %v1105_v11, %v5823_v17  ;;  %v1038_v16 = vadd.f32 %v1037_v7, %v7138_v15 }
 0x1ad   : > { %v1264_v17 = vmul.f32 %v7141_v1, %v7141_v1  ;;  %v1123_v36 = vunpack.c.l.s4 %v4972_v48  ;;  %v1126_v11 = vshrl.u32 %v1125_v52, 7  ;;  %vm1140_vm1 = vcmp.lt.s32.totalorder %v1125_v52, 256 }
 0x1ae   : > { %v1397_v31 = vadd.f32 %v1396_v61, %v1259_v18  ;;  %v1329_v13 = vadd.f32 %v1328_v4, %v1260_v0  ;;  %v1107_v5 = vadd.f32 %v1106_v50, %v7139_v59  ;;  %v1039_v62 = vadd.f32 %v1038_v16, %v7140_v6 }
 0x1af   : > { %v1124_v60 = vunpack.c.0.s8 %v1123_v36 }
 0x1b0   : > { %v1398_v12 = vadd.f32 %v1397_v31, %v1261_v41  ;;  %v1330_v63 = vadd.f32 %v1329_v13, %v1262_v2  ;;  %v1108_v39 = vadd.f32 %v1107_v5, %v5859_v58  ;;  %v1040_v28 = vadd.f32 %v1039_v62, %v7141_v1  ;;  %v980_v62 = vld [vmem:[#allocation3] sm:$0x3] }
 0x1b1   : > { %v1268_v58 = vmul.f32 %v5877_v42, %v5877_v42  ;;  %v1127_v59 = vsub.s32 %v1124_v60, %v1126_v11 }
 0x1b2   : > { %v1399_v43 = vadd.f32 %v1398_v12, %v1263_v35  ;;  %v1331_v19 = vadd.f32 %v1330_v63, %v1264_v17  ;;  %v1109_v20 = vadd.f32 %v1108_v39, %v5868_v14  ;;  %v1041_v23 = vadd.f32 %v1040_v28, %v5871_v8  ;;  %v1143_v17 = vld [vmem:[#allocation4] sm:$0x3] }
 0x1b3   : > { %v1269_v14 = vmul.f32 %v5880_v21, %v5880_v21 }
 0x1b4   : > { %v1400_v3 = vadd.f32 %v1399_v43, %v1265_v24  ;;  %v1332_v34 = vadd.f32 %v1331_v19, %v1266_v45  ;;  %v1110_v30 = vadd.f32 %v1109_v20, %v5874_v40  ;;  %v1042_v49 = vadd.f32 %v1041_v23, %v5877_v42 }
 0x1b6   : > { %v1401_v26 = vadd.f32 %v1400_v3, %v1267_v10  ;;  %v1333_v8 = vadd.f32 %v1332_v34, %v1268_v58  ;;  %v1111_v47 = vadd.f32 %v1110_v30, %v5880_v21  ;;  %v1043_v46 = vadd.f32 %v1042_v49, %v5885_v29 }
 0x1b8   : > { %v1402_v37 = vadd.f32 %v1401_v26, %v1269_v14  ;;  %v1044_v32 = vrot.slane %v1043_v46, 4  ;;  %v1334_v44 = vadd.f32 %v1333_v8, %v1270_v25  ;;  %v1112_v27 = vadd.f32 %v1111_v47, %v5893_v9 }
 0x1ba   : > { %v1045_v40 = vadd.f32 %v1044_v32, %v1043_v46  ;;  %v1335_v53 = vrot.slane %v1334_v44, 4  ;;  %v1113_v42 = vrot.slane %v1112_v27, 4  ;;  %v1403_v51 = vadd.f32 %v1402_v37, %v1271_v33 }
 0x1bc   : > { %v1046_v22 = vrot.slane %v1045_v40, 2  ;;  %v1336_v38 = vadd.f32 %v1335_v53, %v1334_v44  ;;  %v1114_v21 = vadd.f32 %v1113_v42, %v1112_v27  ;;  %v1404_v54 = vrot.slane %v1403_v51, 4 }
 0x1be   : > { %v1047_v29 = vadd.f32 %v1046_v22, %v1045_v40  ;;  %v1337_v57 = vrot.slane %v1336_v38, 2  ;;  %v1115_v56 = vrot.slane %v1114_v21, 2  ;;  %v1405_v55 = vadd.f32 %v1404_v54, %v1403_v51 }
 0x1c0   : > { %v1048_v7 = vrot.slane %v1047_v29, 1  ;;  %v1338_v18 = vadd.f32 %v1337_v57, %v1336_v38  ;;  %v1116_v9 = vadd.f32 %v1115_v56, %v1114_v21  ;;  %v1406_v15 = vrot.slane %v1405_v55, 2 }
 0x1c2   : > { %v1339_v0 = vrot.slane %v1338_v18, 1  ;;  %v1117_v61 = vrot.slane %v1116_v9, 1  ;;  %v1407_v4 = vadd.f32 %v1406_v15, %v1405_v55  ;;  %v1049_v50 = vadd.f32 %v1048_v7, %v1047_v29 }
 0x1c4   : > { %v1118_v16 = vadd.f32 %v1117_v61, %v1116_v9  ;;  %v1408_v41 = vrot.slane %v1407_v4, 1  ;;  %v1340_v6 = vadd.f32 %v1339_v0, %v1338_v18 }
 0x1c6   : > { %v1121_v2 = vcombine.low %v1049_v50, %v1118_v16  ;;  %v1409_v31 = vadd.f32 %v1408_v41, %v1407_v4 }
 0x1c8   : > { %v1128_v13 = vrot.slane %v1121_v2, %v1127_v59  ;;  %v1412_v5 = vcombine.low %v1340_v6, %v1409_v31 }
 0x1ca   : > { %v1135_v35 = vrot.slane %v1128_v13, %v1127_v59  ;;  %v1419_v1 = vrot.slane %v1412_v5, %v1127_v59 }
 0x1cc   : > { %v1137_v12 = vadd.f32 %v1135_v35, %v980_v62  ;;  %v1426_v63 = vrot.slane %v1419_v1, %v1127_v59 }
 0x1ce   : > { %1142 = vst.msk [vmem:[#allocation3] sm:$0x3] %vm1140_vm1, %v1137_v12  ;;  %v1428_v39 = vadd.f32 %v1426_v63, %v1143_v17 }
 0x1d0   : > { %1429 = vst.msk [vmem:[#allocation4] sm:$0x3] %vm1140_vm1, %v1428_v39 }
 0x1d1 PF: > { %p1430_p6 = scmp.eq.s32.totalorder %s4960_s21, 1 }
 0x1d2   : > { %v1437_v28 = vlaneseq (%p1430_p6)  ;;  %v4973_v33 = vmov (%p1430_p6), 0.0  }
 0x1d3   : > { %1434 = sbr.rel (!%p1430_p6) target bundleno = 819 (0x333), region = 56 }
 0x1d4   : > { %v6083_v24 = vshrl.u32 (%p1430_p6), %v1437_v28, 7  ;;  %v6086_v45 = vand.u32 (%p1430_p6), 127, %v1437_v28 }
 0x1d6   : > { %v1453_v43 = vadd.s32 (%p1430_p6), 120, %v6083_v24  ;;  %v6090_v19 = vadd.s32 (%p1430_p6), 128, %v6086_v45  ;;  %v1452_v20 = vadd.s32 (%p1430_p6), 112, %v6083_v24  ;;  %v1451_v23 = vadd.s32 (%p1430_p6), 104, %v6083_v24 }
 0x1d7   : > { %v1450_v10 = vadd.s32 (%p1430_p6), 96, %v6083_v24  ;;  %v6096_v58 = vadd.s32 (%p1430_p6), 88, %v6083_v24  ;;  %v6099_v25 = vadd.s32 (%p1430_p6), 80, %v6083_v24  ;;  %v6102_v3 = vadd.s32 (%p1430_p6), 72, %v6083_v24 }
 0x1d8   : > { %v1504_v34 = vsub.s32 %v1453_v43, %v6090_v19  ;;  %v1503_v30 = vsub.s32 %v1453_v43, %v6086_v45  ;;  %v1502_v49 = vsub.s32 %v1452_v20, %v6090_v19  ;;  %v1501_v14 = vsub.s32 %v1452_v20, %v6086_v45 }
 0x1d9   : > { %v1500_v26 = vsub.s32 %v1451_v23, %v6090_v19  ;;  %v1499_v8 = vsub.s32 %v1451_v23, %v6086_v45  ;;  %v1498_v47 = vsub.s32 %v1450_v10, %v6090_v19  ;;  %v1497_v46 = vsub.s32 %v1450_v10, %v6086_v45 }
 0x1da   : > { %vm1824_vm2 = vcmp.eq.s32.totalorder %v1504_v34, 4294967168  ;;  %vm2080_vm3 = vcmp.eq.s32.totalorder %v1504_v34, 4294967232  ;;  %vm2335_vm4 = vcmp.eq.s32.totalorder %v1503_v30, 0  ;;  %vm2591_vm5 = vcmp.eq.s32.totalorder %v1503_v30, 64 }
 0x1db   : > { %v4703_v37 = vsel %vm1824_vm2, 1.0, %v4973_v33  ;;  %v4719_v32 = vsel %vm2080_vm3, 1.0, %v4973_v33  ;;  %v4743_v44 = vsel %vm2335_vm4, 1.0, %v4973_v33  ;;  %v4767_v27 = vsel %vm2591_vm5, 1.0, %v4973_v33 }
 0x1dc   : > { %v2272_v40 = vadd.f32 %v4719_v32, %v4703_v37  ;;  %v2783_v53 = vadd.f32 %v4767_v27, %v4743_v44  ;;  %vm1822_vm6 = vcmp.eq.s32.totalorder %v1502_v49, 4294967168  ;;  %vm2078_vm7 = vcmp.eq.s32.totalorder %v1502_v49, 4294967232 }
 0x1dd   : > { %v4702_v42 = vsel %vm1822_vm6, 1.0, %v4973_v33  ;;  %v4718_v51 = vsel %vm2078_vm7, 1.0, %v4973_v33  ;;  %vm2333_vm8 = vcmp.eq.s32.totalorder %v1501_v14, 0  ;;  %vm2589_vm9 = vcmp.eq.s32.totalorder %v1501_v14, 64 }
 0x1de   : > { %3340 = vmatprep.subr.mxu0 %v2272_v40  ;;  %3422 = vmatprep.subr.mxu1 %v2272_v40  ;;  %v2270_v48 = vadd.f32 %v4718_v51, %v4702_v42  ;;  %v4742_v36 = vsel %vm2333_vm8, 1.0, %v4973_v33  ;;  %v4766_v52 = vsel %vm2589_vm9, 1.0, %v4973_v33  ;;  %vm1820_vm10 = vcmp.eq.s32.totalorder %v1500_v26, 4294967168 }
 0x1df   : > { %3341 = vmatpush1.msra.mxu0 %v2783_v53  ;;  %3423 = vmatpush1.msra.mxu1 %v2783_v53  ;;  %v2781_v22 = vadd.f32 %v4766_v52, %v4742_v36  ;;  %v4701_v38 = vsel %vm1820_vm10, 1.0, %v4973_v33  ;;  %vm2076_vm11 = vcmp.eq.s32.totalorder %v1500_v26, 4294967232  ;;  %vm2331_vm12 = vcmp.eq.s32.totalorder %v1499_v8, 0 }
 0x1e0   : > { %3342 = vmatprep.subr.mxu0 %v2270_v48  ;;  %3424 = vmatprep.subr.mxu1 %v2270_v48  ;;  %v4717_v21 = vsel %vm2076_vm11, 1.0, %v4973_v33  ;;  %v4741_v54 = vsel %vm2331_vm12, 1.0, %v4973_v33  ;;  %vm2587_vm13 = vcmp.eq.s32.totalorder %v1499_v8, 64  ;;  %vm1818_vm14 = vcmp.eq.s32.totalorder %v1498_v47, 4294967168 }
 0x1e1   : > { %3343 = vmatpush1.msra.mxu0 %v2781_v22  ;;  %3425 = vmatpush1.msra.mxu1 %v2781_v22  ;;  %v2268_v29 = vadd.f32 %v4717_v21, %v4701_v38  ;;  %v4765_v57 = vsel %vm2587_vm13, 1.0, %v4973_v33  ;;  %v4700_v56 = vsel %vm1818_vm14, 1.0, %v4973_v33  ;;  %vm2074_vm15 = vcmp.eq.s32.totalorder %v1498_v47, 4294967232 }
 0x1e2   : > { %v2779_v55 = vadd.f32 %v4765_v57, %v4741_v54  ;;  %v4716_v60 = vsel %vm2074_vm15, 1.0, %v4973_v33  ;;  %vm2329_vm0 = vcmp.eq.s32.totalorder %v1497_v46, 0  ;;  %vm2585_vm1 = vcmp.eq.s32.totalorder %v1497_v46, 64 }
 0x1e3   : > { %3344 = vmatprep.subr.mxu0 %v2268_v29  ;;  %3426 = vmatprep.subr.mxu1 %v2268_v29  ;;  %v2266_v11 = vadd.f32 %v4716_v60, %v4700_v56  ;;  %v4740_v7 = vsel %vm2329_vm0, 1.0, %v4973_v33  ;;  %v4764_v18 = vsel %vm2585_vm1, 1.0, %v4973_v33  ;;  %v1496_v9 = vsub.s32 %v6096_v58, %v6090_v19 }
 0x1e4   : > { %3345 = vmatpush1.msra.mxu0 %v2779_v55  ;;  %3427 = vmatpush1.msra.mxu1 %v2779_v55  ;;  %v2777_v15 = vadd.f32 %v4764_v18, %v4740_v7  ;;  %v1495_v0 = vsub.s32 %v6096_v58, %v6086_v45  ;;  %v1494_v61 = vsub.s32 %v6099_v25, %v6090_v19  ;;  %v1446_v4 = vadd.s32 64, %v6083_v24 }
 0x1e5   : > { %3346 = vmatprep.subr.mxu0 %v2266_v11  ;;  %3428 = vmatprep.subr.mxu1 %v2266_v11  ;;  %vm1816_vm2 = vcmp.eq.s32.totalorder %v1496_v9, 4294967168  ;;  %vm2072_vm3 = vcmp.eq.s32.totalorder %v1496_v9, 4294967232  ;;  %v1493_v50 = vsub.s32 %v6099_v25, %v6086_v45  ;;  %v1492_v16 = vsub.s32 %v6102_v3, %v6090_v19 }
 0x1e6   : > { %3347 = vmatpush1.msra.mxu0 %v2777_v15  ;;  %3429 = vmatpush1.msra.mxu1 %v2777_v15  ;;  %v4699_v59 = vsel %vm1816_vm2, 1.0, %v4973_v33  ;;  %v4715_v41 = vsel %vm2072_vm3, 1.0, %v4973_v33  ;;  %vm2327_vm4 = vcmp.eq.s32.totalorder %v1495_v0, 0  ;;  %vm2583_vm5 = vcmp.eq.s32.totalorder %v1495_v0, 64 }
 0x1e7   : > { %v2264_v6 = vadd.f32 %v4715_v41, %v4699_v59  ;;  %v4739_v2 = vsel %vm2327_vm4, 1.0, %v4973_v33  ;;  %v4763_v31 = vsel %vm2583_vm5, 1.0, %v4973_v33  ;;  %vm1814_vm6 = vcmp.eq.s32.totalorder %v1494_v61, 4294967168 }
 0x1e8   : > { %v2775_v13 = vadd.f32 %v4763_v31, %v4739_v2  ;;  %v4698_v5 = vsel %vm1814_vm6, 1.0, %v4973_v33  ;;  %vm2070_vm7 = vcmp.eq.s32.totalorder %v1494_v61, 4294967232  ;;  %vm2325_vm8 = vcmp.eq.s32.totalorder %v1493_v50, 0 }
 0x1e9   : > { %3348 = vmatprep.subr.mxu0 %v2264_v6  ;;  %3430 = vmatprep.subr.mxu1 %v2264_v6  ;;  %v4714_v62 = vsel %vm2070_vm7, 1.0, %v4973_v33  ;;  %v4738_v35 = vsel %vm2325_vm8, 1.0, %v4973_v33  ;;  %vm2581_vm9 = vcmp.eq.s32.totalorder %v1493_v50, 64  ;;  %vm1812_vm10 = vcmp.eq.s32.totalorder %v1492_v16, 4294967168 }
 0x1ea   : > { %3349 = vmatpush1.msra.mxu0 %v2775_v13  ;;  %3431 = vmatpush1.msra.mxu1 %v2775_v13  ;;  %v2262_v1 = vadd.f32 %v4714_v62, %v4698_v5  ;;  %v4762_v17 = vsel %vm2581_vm9, 1.0, %v4973_v33  ;;  %v4697_v12 = vsel %vm1812_vm10, 1.0, %v4973_v33  ;;  %vm2068_vm11 = vcmp.eq.s32.totalorder %v1492_v16, 4294967232 }
 0x1eb   : > { %v2773_v63 = vadd.f32 %v4762_v17, %v4738_v35  ;;  %v4713_v39 = vsel %vm2068_vm11, 1.0, %v4973_v33  ;;  %v1491_v43 = vsub.s32 %v6102_v3, %v6086_v45  ;;  %v1490_v20 = vsub.s32 %v1446_v4, %v6090_v19 }
 0x1ec   : > { %3350 = vmatprep.subr.mxu0 %v2262_v1  ;;  %3432 = vmatprep.subr.mxu1 %v2262_v1  ;;  %v2260_v23 = vadd.f32 %v4713_v39, %v4697_v12  ;;  %v1489_v10 = vsub.s32 %v1446_v4, %v6086_v45  ;;  %v1445_v58 = vadd.s32 56, %v6083_v24  ;;  %v1444_v25 = vadd.s32 48, %v6083_v24 }
 0x1ed   : > { %3351 = vmatpush1.msra.mxu0 %v2773_v63  ;;  %3433 = vmatpush1.msra.mxu1 %v2773_v63  ;;  %vm2323_vm12 = vcmp.eq.s32.totalorder %v1491_v43, 0  ;;  %vm2579_vm13 = vcmp.eq.s32.totalorder %v1491_v43, 64  ;;  %vm1810_vm14 = vcmp.eq.s32.totalorder %v1490_v20, 4294967168  ;;  %vm2066_vm15 = vcmp.eq.s32.totalorder %v1490_v20, 4294967232 }
 0x1ee   : > { %3352 = vmatprep.subr.mxu0 %v2260_v23  ;;  %3434 = vmatprep.subr.mxu1 %v2260_v23  ;;  %v4737_v3 = vsel %vm2323_vm12, 1.0, %v4973_v33  ;;  %v4761_v34 = vsel %vm2579_vm13, 1.0, %v4973_v33  ;;  %v4696_v30 = vsel %vm1810_vm14, 1.0, %v4973_v33  ;;  %v4712_v49 = vsel %vm2066_vm15, 1.0, %v4973_v33 }
 0x1ef   : > { %v2771_v14 = vadd.f32 %v4761_v34, %v4737_v3  ;;  %v2258_v26 = vadd.f32 %v4712_v49, %v4696_v30  ;;  %vm2321_vm0 = vcmp.eq.s32.totalorder %v1489_v10, 0  ;;  %vm2577_vm1 = vcmp.eq.s32.totalorder %v1489_v10, 64 }
 0x1f0   : > { %v4736_v8 = vsel %vm2321_vm0, 1.0, %v4973_v33  ;;  %v4760_v47 = vsel %vm2577_vm1, 1.0, %v4973_v33  ;;  %v1488_v46 = vsub.s32 %v1445_v58, %v6090_v19  ;;  %v1487_v37 = vsub.s32 %v1445_v58, %v6086_v45 }
 0x1f1   : > { %3353 = vmatpush1.msra.mxu0 %v2771_v14  ;;  %3435 = vmatpush1.msra.mxu1 %v2771_v14  ;;  %v2769_v32 = vadd.f32 %v4760_v47, %v4736_v8  ;;  %v1486_v44 = vsub.s32 %v1444_v25, %v6090_v19  ;;  %v1485_v27 = vsub.s32 %v1444_v25, %v6086_v45  ;;  %v1443_v40 = vadd.s32 40, %v6083_v24 }
 0x1f2   : > { %3354 = vmatprep.subr.mxu0 %v2258_v26  ;;  %3436 = vmatprep.subr.mxu1 %v2258_v26  ;;  %vm1552_vm2 = vcmp.eq.s32.totalorder %v1488_v46, 4294967104  ;;  %vm1808_vm3 = vcmp.eq.s32.totalorder %v1488_v46, 4294967168  ;;  %vm2063_vm4 = vcmp.eq.s32.totalorder %v1487_v37, 4294967232  ;;  %vm2319_vm5 = vcmp.eq.s32.totalorder %v1487_v37, 0 }
 0x1f3   : > { %3355 = vmatpush1.msra.mxu0 %v2769_v32  ;;  %3437 = vmatpush1.msra.mxu1 %v2769_v32  ;;  %v4687_v53 = vsel %vm1552_vm2, 1.0, %v4973_v33  ;;  %v4695_v42 = vsel %vm1808_vm3, 1.0, %v4973_v33  ;;  %v4711_v51 = vsel %vm2063_vm4, 1.0, %v4973_v33  ;;  %v4735_v48 = vsel %vm2319_vm5, 1.0, %v4973_v33 }
 0x1f4   : > { %v2000_v36 = vadd.f32 %v4695_v42, %v4687_v53  ;;  %v2511_v52 = vadd.f32 %v4735_v48, %v4711_v51  ;;  %vm1550_vm6 = vcmp.eq.s32.totalorder %v1486_v44, 4294967104  ;;  %vm1806_vm7 = vcmp.eq.s32.totalorder %v1486_v44, 4294967168 }
 0x1f5   : > { %v4686_v22 = vsel %vm1550_vm6, 1.0, %v4973_v33  ;;  %v4694_v38 = vsel %vm1806_vm7, 1.0, %v4973_v33  ;;  %vm2061_vm8 = vcmp.eq.s32.totalorder %v1485_v27, 4294967232  ;;  %vm2317_vm9 = vcmp.eq.s32.totalorder %v1485_v27, 0 }
 0x1f6   : > { %3356 = vmatprep.subr.mxu0 %v2000_v36  ;;  %3438 = vmatprep.subr.mxu1 %v2000_v36  ;;  %v1998_v21 = vadd.f32 %v4694_v38, %v4686_v22  ;;  %v4710_v54 = vsel %vm2061_vm8, 1.0, %v4973_v33  ;;  %v4734_v29 = vsel %vm2317_vm9, 1.0, %v4973_v33  ;;  %v1484_v57 = vsub.s32 %v1443_v40, %v6090_v19 }
 0x1f7   : > { %3357 = vmatpush1.msra.mxu0 %v2511_v52  ;;  %3439 = vmatpush1.msra.mxu1 %v2511_v52  ;;  %v2509_v56 = vadd.f32 %v4734_v29, %v4710_v54  ;;  %v1483_v55 = vsub.s32 %v1443_v40, %v6086_v45  ;;  %v1442_v60 = vadd.s32 32, %v6083_v24  ;;  %v1441_v11 = vadd.s32 24, %v6083_v24 }
 0x1f8   : > { %3358 = vmatprep.subr.mxu0 %v1998_v21  ;;  %3440 = vmatprep.subr.mxu1 %v1998_v21  ;;  %vm1548_vm10 = vcmp.eq.s32.totalorder %v1484_v57, 4294967104  ;;  %vm1804_vm11 = vcmp.eq.s32.totalorder %v1484_v57, 4294967168  ;;  %v1440_v7 = vadd.s32 16, %v6083_v24  ;;  %v1439_v18 = vadd.s32 8, %v6083_v24 }
 0x1f9   : > { %3359 = vmatpush1.msra.mxu0 %v2509_v56  ;;  %3441 = vmatpush1.msra.mxu1 %v2509_v56  ;;  %v4685_v9 = vsel %vm1548_vm10, 1.0, %v4973_v33  ;;  %v4693_v15 = vsel %vm1804_vm11, 1.0, %v4973_v33  ;;  %vm2059_vm12 = vcmp.eq.s32.totalorder %v1483_v55, 4294967232  ;;  %vm2315_vm13 = vcmp.eq.s32.totalorder %v1483_v55, 0 }
 0x1fa   : > { %v1996_v0 = vadd.f32 %v4693_v15, %v4685_v9  ;;  %v4709_v61 = vsel %vm2059_vm12, 1.0, %v4973_v33  ;;  %v4733_v4 = vsel %vm2315_vm13, 1.0, %v4973_v33  ;;  %v1482_v50 = vsub.s32 %v1442_v60, %v6090_v19 }
 0x1fb   : > { %v2507_v16 = vadd.f32 %v4733_v4, %v4709_v61  ;;  %v1481_v59 = vsub.s32 %v1442_v60, %v6086_v45  ;;  %v1480_v41 = vsub.s32 %v1441_v11, %v6090_v19  ;;  %v1479_v6 = vsub.s32 %v1441_v11, %v6086_v45 }
 0x1fc   : > { %3360 = vmatprep.subr.mxu0 %v1996_v0  ;;  %3442 = vmatprep.subr.mxu1 %v1996_v0  ;;  %vm1546_vm14 = vcmp.eq.s32.totalorder %v1482_v50, 4294967104  ;;  %vm1802_vm15 = vcmp.eq.s32.totalorder %v1482_v50, 4294967168  ;;  %v1478_v2 = vsub.s32 %v1440_v7, %v6090_v19  ;;  %v1477_v31 = vsub.s32 %v1440_v7, %v6086_v45 }
 0x1fd   : > { %3361 = vmatpush1.msra.mxu0 %v2507_v16  ;;  %3443 = vmatpush1.msra.mxu1 %v2507_v16  ;;  %v4684_v13 = vsel %vm1546_vm14, 1.0, %v4973_v33  ;;  %v4692_v5 = vsel %vm1802_vm15, 1.0, %v4973_v33  ;;  %vm2057_vm0 = vcmp.eq.s32.totalorder %v1481_v59, 4294967232  ;;  %vm2313_vm1 = vcmp.eq.s32.totalorder %v1481_v59, 0 }
 0x1fe   : > { %v1994_v62 = vadd.f32 %v4692_v5, %v4684_v13  ;;  %v4708_v35 = vsel %vm2057_vm0, 1.0, %v4973_v33  ;;  %v4732_v1 = vsel %vm2313_vm1, 1.0, %v4973_v33  ;;  %vm1544_vm2 = vcmp.eq.s32.totalorder %v1480_v41, 4294967104 }
 0x1ff   : > { %v2505_v17 = vadd.f32 %v4732_v1, %v4708_v35  ;;  %v4683_v12 = vsel %vm1544_vm2, 1.0, %v4973_v33  ;;  %vm1800_vm3 = vcmp.eq.s32.totalorder %v1480_v41, 4294967168  ;;  %vm2055_vm4 = vcmp.eq.s32.totalorder %v1479_v6, 4294967232 }
 0x200   : > { %3362 = vmatprep.subr.mxu0 %v1994_v62  ;;  %3444 = vmatprep.subr.mxu1 %v1994_v62  ;;  %v4691_v63 = vsel %vm1800_vm3, 1.0, %v4973_v33  ;;  %v4707_v39 = vsel %vm2055_vm4, 1.0, %v4973_v33  ;;  %vm2311_vm5 = vcmp.eq.s32.totalorder %v1479_v6, 0  ;;  %vm1542_vm6 = vcmp.eq.s32.totalorder %v1478_v2, 4294967104 }
 0x201   : > { %3363 = vmatpush1.msra.mxu0 %v2505_v17  ;;  %3445 = vmatpush1.msra.mxu1 %v2505_v17  ;;  %v1992_v43 = vadd.f32 %v4691_v63, %v4683_v12  ;;  %v4731_v20 = vsel %vm2311_vm5, 1.0, %v4973_v33  ;;  %v4682_v23 = vsel %vm1542_vm6, 1.0, %v4973_v33  ;;  %vm1798_vm7 = vcmp.eq.s32.totalorder %v1478_v2, 4294967168 }
 0x202   : > { %v2503_v10 = vadd.f32 %v4731_v20, %v4707_v39  ;;  %v4690_v58 = vsel %vm1798_vm7, 1.0, %v4973_v33  ;;  %vm2053_vm8 = vcmp.eq.s32.totalorder %v1477_v31, 4294967232  ;;  %vm2309_vm9 = vcmp.eq.s32.totalorder %v1477_v31, 0 }
 0x203   : > { %3364 = vmatprep.subr.mxu0 %v1992_v43  ;;  %3446 = vmatprep.subr.mxu1 %v1992_v43  ;;  %v1990_v25 = vadd.f32 %v4690_v58, %v4682_v23  ;;  %v4706_v3 = vsel %vm2053_vm8, 1.0, %v4973_v33  ;;  %v4730_v34 = vsel %vm2309_vm9, 1.0, %v4973_v33  ;;  %v1476_v30 = vsub.s32 %v1439_v18, %v6090_v19 }
 0x204   : > { %3365 = vmatpush1.msra.mxu0 %v2503_v10  ;;  %3447 = vmatpush1.msra.mxu1 %v2503_v10  ;;  %v2501_v49 = vadd.f32 %v4730_v34, %v4706_v3  ;;  %v1475_v14 = vsub.s32 %v1439_v18, %v6086_v45  ;;  %v1474_v26 = vsub.s32 %v6083_v24, %v6090_v19  ;;  %v1469_v8 = vadd.s32 248, %v6083_v24 }
 0x205   : > { %3366 = vmatprep.subr.mxu0 %v1990_v25  ;;  %3448 = vmatprep.subr.mxu1 %v1990_v25  ;;  %vm1540_vm10 = vcmp.eq.s32.totalorder %v1476_v30, 4294967104  ;;  %vm1796_vm11 = vcmp.eq.s32.totalorder %v1476_v30, 4294967168  ;;  %v1473_v47 = vsub.s32 %v6083_v24, %v6086_v45  ;;  %v1468_v46 = vadd.s32 240, %v6083_v24 }
 0x206   : > { %3367 = vmatpush1.msra.mxu0 %v2501_v49  ;;  %3449 = vmatpush1.msra.mxu1 %v2501_v49  ;;  %v4681_v37 = vsel %vm1540_vm10, 1.0, %v4973_v33  ;;  %v4689_v32 = vsel %vm1796_vm11, 1.0, %v4973_v33  ;;  %vm2051_vm12 = vcmp.eq.s32.totalorder %v1475_v14, 4294967232  ;;  %vm2307_vm13 = vcmp.eq.s32.totalorder %v1475_v14, 0 }
 0x207   : > { %v1988_v44 = vadd.f32 %v4689_v32, %v4681_v37  ;;  %v4705_v27 = vsel %vm2051_vm12, 1.0, %v4973_v33  ;;  %v4729_v40 = vsel %vm2307_vm13, 1.0, %v4973_v33  ;;  %vm1538_vm14 = vcmp.eq.s32.totalorder %v1474_v26, 4294967104 }
 0x208   : > { %v2499_v53 = vadd.f32 %v4729_v40, %v4705_v27  ;;  %v4680_v42 = vsel %vm1538_vm14, 1.0, %v4973_v33  ;;  %vm1794_vm15 = vcmp.eq.s32.totalorder %v1474_v26, 4294967168  ;;  %vm2049_vm0 = vcmp.eq.s32.totalorder %v1473_v47, 4294967232 }
 0x209   : > { %3368 = vmatprep.subr.mxu0 %v1988_v44  ;;  %3450 = vmatprep.subr.mxu1 %v1988_v44  ;;  %v4688_v51 = vsel %vm1794_vm15, 1.0, %v4973_v33  ;;  %v4704_v48 = vsel %vm2049_vm0, 1.0, %v4973_v33  ;;  %vm2305_vm1 = vcmp.eq.s32.totalorder %v1473_v47, 0  ;;  %v1536_v36 = vsub.s32 %v1469_v8, %v6090_v19 }
 0x20a   : > { %3369 = vmatpush1.msra.mxu0 %v2499_v53  ;;  %3451 = vmatpush1.msra.mxu1 %v2499_v53  ;;  %v1986_v52 = vadd.f32 %v4688_v51, %v4680_v42  ;;  %v4728_v22 = vsel %vm2305_vm1, 1.0, %v4973_v33  ;;  %v1535_v38 = vsub.s32 %v1469_v8, %v6086_v45  ;;  %v1534_v21 = vsub.s32 %v1468_v46, %v6090_v19 }
 0x20b   : > { %v2497_v54 = vadd.f32 %v4728_v22, %v4704_v48  ;;  %vm2368_vm2 = vcmp.eq.s32.totalorder %v1536_v36, 0  ;;  %vm2624_vm3 = vcmp.eq.s32.totalorder %v1536_v36, 64  ;;  %v1533_v29 = vsub.s32 %v1468_v46, %v6086_v45 }
 0x20c   : > { %3370 = vmatprep.subr.mxu0 %v1986_v52  ;;  %3452 = vmatprep.subr.mxu1 %v1986_v52  ;;  %v4759_v57 = vsel %vm2368_vm2, 1.0, %v4973_v33  ;;  %v4783_v56 = vsel %vm2624_vm3, 1.0, %v4973_v33  ;;  %vm2879_vm4 = vcmp.eq.s32.totalorder %v1535_v38, 128  ;;  %vm3135_vm5 = vcmp.eq.s32.totalorder %v1535_v38, 192 }
 0x20d   : > { %3371 = vmatpush1.msra.mxu0 %v2497_v54  ;;  %3453 = vmatpush1.msra.mxu1 %v2497_v54  ;;  %v2816_v55 = vadd.f32 %v4783_v56, %v4759_v57  ;;  %v4799_v60 = vsel %vm2879_vm4, 1.0, %v4973_v33  ;;  %v4807_v11 = vsel %vm3135_vm5, 1.0, %v4973_v33  ;;  %vm2366_vm6 = vcmp.eq.s32.totalorder %v1534_v21, 0 }
 0x20e   : > { %v3327_v7 = vadd.f32 %v4807_v11, %v4799_v60  ;;  %v4758_v18 = vsel %vm2366_vm6, 1.0, %v4973_v33  ;;  %vm2622_vm7 = vcmp.eq.s32.totalorder %v1534_v21, 64  ;;  %vm2877_vm8 = vcmp.eq.s32.totalorder %v1533_v29, 128 }
 0x20f   : > { %3372 = vmatprep.subr.mxu0 %v2816_v55  ;;  %3454 = vmatprep.subr.mxu1 %v2816_v55  ;;  %v4782_v9 = vsel %vm2622_vm7, 1.0, %v4973_v33  ;;  %v4798_v15 = vsel %vm2877_vm8, 1.0, %v4973_v33  ;;  %vm3133_vm9 = vcmp.eq.s32.totalorder %v1533_v29, 192  ;;  %v1467_v0 = vadd.s32 232, %v6083_v24 }
 0x210   : > { %3373 = vmatpush2.msra.mxu0 %v3327_v7  ;;  %3455 = vmatpush2.msra.mxu1 %v3327_v7  ;;  %v2814_v61 = vadd.f32 %v4782_v9, %v4758_v18  ;;  %v4806_v4 = vsel %vm3133_vm9, 1.0, %v4973_v33  ;;  %v1466_v50 = vadd.s32 224, %v6083_v24  ;;  %v1465_v16 = vadd.s32 216, %v6083_v24 }
 0x211   : > { %v3325_v59 = vadd.f32 %v4806_v4, %v4798_v15  ;;  %v1532_v41 = vsub.s32 %v1467_v0, %v6090_v19  ;;  %v1531_v6 = vsub.s32 %v1467_v0, %v6086_v45  ;;  %v1464_v2 = vadd.s32 208, %v6083_v24 }
 0x212   : > { %3374 = vmatprep.subr.mxu0 %v2814_v61  ;;  %3456 = vmatprep.subr.mxu1 %v2814_v61  ;;  %v1530_v31 = vsub.s32 %v1466_v50, %v6090_v19  ;;  %v1529_v13 = vsub.s32 %v1466_v50, %v6086_v45  ;;  %v1528_v5 = vsub.s32 %v1465_v16, %v6090_v19  ;;  %v1463_v62 = vadd.s32 200, %v6083_v24 }
 0x213   : > { %3375 = vmatpush2.msra.mxu0 %v3325_v59  ;;  %3457 = vmatpush2.msra.mxu1 %v3325_v59  ;;  %vm2364_vm10 = vcmp.eq.s32.totalorder %v1532_v41, 0  ;;  %vm2620_vm11 = vcmp.eq.s32.totalorder %v1532_v41, 64  ;;  %vm2875_vm12 = vcmp.eq.s32.totalorder %v1531_v6, 128  ;;  %vm3131_vm13 = vcmp.eq.s32.totalorder %v1531_v6, 192 }
 0x214   : > { %v4757_v35 = vsel %vm2364_vm10, 1.0, %v4973_v33  ;;  %v4781_v1 = vsel %vm2620_vm11, 1.0, %v4973_v33  ;;  %v4797_v17 = vsel %vm2875_vm12, 1.0, %v4973_v33  ;;  %v4805_v12 = vsel %vm3131_vm13, 1.0, %v4973_v33 }
 0x215   : > { %v2812_v63 = vadd.f32 %v4781_v1, %v4757_v35  ;;  %v3323_v39 = vadd.f32 %v4805_v12, %v4797_v17  ;;  %vm2362_vm14 = vcmp.eq.s32.totalorder %v1530_v31, 0  ;;  %vm2618_vm15 = vcmp.eq.s32.totalorder %v1530_v31, 64 }
 0x216   : > { %v4756_v43 = vsel %vm2362_vm14, 1.0, %v4973_v33  ;;  %v4780_v20 = vsel %vm2618_vm15, 1.0, %v4973_v33  ;;  %vm2873_vm0 = vcmp.eq.s32.totalorder %v1529_v13, 128  ;;  %vm3129_vm1 = vcmp.eq.s32.totalorder %v1529_v13, 192 }
 0x217   : > { %3376 = vmatprep.subr.mxu0 %v2812_v63  ;;  %3458 = vmatprep.subr.mxu1 %v2812_v63  ;;  %v2810_v23 = vadd.f32 %v4780_v20, %v4756_v43  ;;  %v4796_v10 = vsel %vm2873_vm0, 1.0, %v4973_v33  ;;  %v4804_v58 = vsel %vm3129_vm1, 1.0, %v4973_v33  ;;  %vm2360_vm2 = vcmp.eq.s32.totalorder %v1528_v5, 0 }
 0x218   : > { %3377 = vmatpush2.msra.mxu0 %v3323_v39  ;;  %3459 = vmatpush2.msra.mxu1 %v3323_v39  ;;  %v3321_v25 = vadd.f32 %v4804_v58, %v4796_v10  ;;  %v4755_v3 = vsel %vm2360_vm2, 1.0, %v4973_v33  ;;  %vm2616_vm3 = vcmp.eq.s32.totalorder %v1528_v5, 64  ;;  %v1527_v34 = vsub.s32 %v1465_v16, %v6086_v45 }
 0x219   : > { %3378 = vmatprep.subr.mxu0 %v2810_v23  ;;  %3460 = vmatprep.subr.mxu1 %v2810_v23  ;;  %v4779_v30 = vsel %vm2616_vm3, 1.0, %v4973_v33  ;;  %v1526_v49 = vsub.s32 %v1464_v2, %v6090_v19  ;;  %v1525_v14 = vsub.s32 %v1464_v2, %v6086_v45  ;;  %v1524_v26 = vsub.s32 %v1463_v62, %v6090_v19 }
 0x21a   : > { %3379 = vmatpush2.msra.mxu0 %v3321_v25  ;;  %3461 = vmatpush2.msra.mxu1 %v3321_v25  ;;  %v2808_v8 = vadd.f32 %v4779_v30, %v4755_v3  ;;  %vm2871_vm4 = vcmp.eq.s32.totalorder %v1527_v34, 128  ;;  %vm3127_vm5 = vcmp.eq.s32.totalorder %v1527_v34, 192  ;;  %v1523_v47 = vsub.s32 %v1463_v62, %v6086_v45 }
 0x21b   : > { %v4795_v46 = vsel %vm2871_vm4, 1.0, %v4973_v33  ;;  %v4803_v37 = vsel %vm3127_vm5, 1.0, %v4973_v33  ;;  %vm2358_vm6 = vcmp.eq.s32.totalorder %v1526_v49, 0  ;;  %vm2614_vm7 = vcmp.eq.s32.totalorder %v1526_v49, 64 }
 0x21c   : > { %3380 = vmatprep.subr.mxu0 %v2808_v8  ;;  %3462 = vmatprep.subr.mxu1 %v2808_v8  ;;  %v3319_v32 = vadd.f32 %v4803_v37, %v4795_v46  ;;  %v4754_v44 = vsel %vm2358_vm6, 1.0, %v4973_v33  ;;  %v4778_v27 = vsel %vm2614_vm7, 1.0, %v4973_v33  ;;  %vm2869_vm8 = vcmp.eq.s32.totalorder %v1525_v14, 128 }
 0x21d   : > { %v2806_v40 = vadd.f32 %v4778_v27, %v4754_v44  ;;  %v4794_v53 = vsel %vm2869_vm8, 1.0, %v4973_v33  ;;  %vm3125_vm9 = vcmp.eq.s32.totalorder %v1525_v14, 192  ;;  %vm2356_vm10 = vcmp.eq.s32.totalorder %v1524_v26, 0 }
 0x21e   : > { %3381 = vmatpush2.msra.mxu0 %v3319_v32  ;;  %3463 = vmatpush2.msra.mxu1 %v3319_v32  ;;  %v4802_v42 = vsel %vm3125_vm9, 1.0, %v4973_v33  ;;  %v4753_v51 = vsel %vm2356_vm10, 1.0, %v4973_v33  ;;  %vm2612_vm11 = vcmp.eq.s32.totalorder %v1524_v26, 64  ;;  %vm2867_vm12 = vcmp.eq.s32.totalorder %v1523_v47, 128 }
 0x21f   : > { %3382 = vmatprep.subr.mxu0 %v2806_v40  ;;  %3464 = vmatprep.subr.mxu1 %v2806_v40  ;;  %v3317_v48 = vadd.f32 %v4802_v42, %v4794_v53  ;;  %v4777_v36 = vsel %vm2612_vm11, 1.0, %v4973_v33  ;;  %v4793_v52 = vsel %vm2867_vm12, 1.0, %v4973_v33  ;;  %vm3123_vm13 = vcmp.eq.s32.totalorder %v1523_v47, 192 }
 0x220   : > { %v2804_v22 = vadd.f32 %v4777_v36, %v4753_v51  ;;  %v4801_v38 = vsel %vm3123_vm13, 1.0, %v4973_v33  ;;  %v1462_v21 = vadd.s32 192, %v6083_v24  ;;  %v1461_v54 = vadd.s32 184, %v6083_v24 }
 0x221   : > { %3383 = vmatpush2.msra.mxu0 %v3317_v48  ;;  %3465 = vmatpush2.msra.mxu1 %v3317_v48  ;;  %v3315_v29 = vadd.f32 %v4801_v38, %v4793_v52  ;;  %v1460_v57 = vadd.s32 176, %v6083_v24  ;;  %v1459_v56 = vadd.s32 168, %v6083_v24  ;;  %v1458_v55 = vadd.s32 160, %v6083_v24 }
 0x222   : > { %3384 = vmatprep.subr.mxu0 %v2804_v22  ;;  %3466 = vmatprep.subr.mxu1 %v2804_v22  ;;  %v1522_v60 = vsub.s32 %v1462_v21, %v6090_v19  ;;  %v1521_v11 = vsub.s32 %v1462_v21, %v6086_v45  ;;  %v1520_v7 = vsub.s32 %v1461_v54, %v6090_v19  ;;  %v6274_v18 = vadd.s32 152, %v6083_v24 }
 0x223   : > { %3385 = vmatpush2.msra.mxu0 %v3315_v29  ;;  %3467 = vmatpush2.msra.mxu1 %v3315_v29  ;;  %v1519_v9 = vsub.s32 %v1461_v54, %v6086_v45  ;;  %v1518_v15 = vsub.s32 %v1460_v57, %v6090_v19  ;;  %v1517_v0 = vsub.s32 %v1460_v57, %v6086_v45  ;;  %v6280_v61 = vadd.s32 144, %v6083_v24  ;;  %v1435_v57 = vld [vmem:[#allocation3] sm:$0x3] }
 0x224   : > { %vm2354_vm14 = vcmp.eq.s32.totalorder %v1522_v60, 0  ;;  %vm2610_vm15 = vcmp.eq.s32.totalorder %v1522_v60, 64  ;;  %vm2865_vm0 = vcmp.eq.s32.totalorder %v1521_v11, 128  ;;  %vm3121_vm1 = vcmp.eq.s32.totalorder %v1521_v11, 192 }
 0x225   : > { %v4752_v4 = vsel %vm2354_vm14, 1.0, %v4973_v33  ;;  %v4776_v50 = vsel %vm2610_vm15, 1.0, %v4973_v33  ;;  %v4792_v16 = vsel %vm2865_vm0, 1.0, %v4973_v33  ;;  %v4800_v59 = vsel %vm3121_vm1, 1.0, %v4973_v33 }
 0x226   : > { %v2802_v41 = vadd.f32 %v4776_v50, %v4752_v4  ;;  %v3313_v6 = vadd.f32 %v4800_v59, %v4792_v16  ;;  %vm2096_vm2 = vcmp.eq.s32.totalorder %v1520_v7, 4294967232  ;;  %vm2352_vm3 = vcmp.eq.s32.totalorder %v1520_v7, 0 }
 0x227   : > { %v4727_v2 = vsel %vm2096_vm2, 1.0, %v4973_v33  ;;  %v4751_v31 = vsel %vm2352_vm3, 1.0, %v4973_v33  ;;  %vm2607_vm4 = vcmp.eq.s32.totalorder %v1519_v9, 64  ;;  %vm2863_vm5 = vcmp.eq.s32.totalorder %v1519_v9, 128 }
 0x228   : > { %3386 = vmatprep.subr.mxu0 %v2802_v41  ;;  %3468 = vmatprep.subr.mxu1 %v2802_v41  ;;  %v2544_v13 = vadd.f32 %v4751_v31, %v4727_v2  ;;  %v4775_v5 = vsel %vm2607_vm4, 1.0, %v4973_v33  ;;  %v4791_v62 = vsel %vm2863_vm5, 1.0, %v4973_v33  ;;  %vm2094_vm6 = vcmp.eq.s32.totalorder %v1518_v15, 4294967232 }
 0x229   : > { %3387 = vmatpush2.msra.mxu0 %v3313_v6  ;;  %3469 = vmatpush2.msra.mxu1 %v3313_v6  ;;  %v3055_v35 = vadd.f32 %v4791_v62, %v4775_v5  ;;  %v4726_v1 = vsel %vm2094_vm6, 1.0, %v4973_v33  ;;  %vm2350_vm7 = vcmp.eq.s32.totalorder %v1518_v15, 0  ;;  %vm2605_vm8 = vcmp.eq.s32.totalorder %v1517_v0, 64  ;;  %v1436_v6 = vld [vmem:[#allocation4] sm:$0x3] }
 0x22a   : > { %3388 = vmatprep.subr.mxu0 %v2544_v13  ;;  %3470 = vmatprep.subr.mxu1 %v2544_v13  ;;  %v4750_v17 = vsel %vm2350_vm7, 1.0, %v4973_v33  ;;  %v4774_v12 = vsel %vm2605_vm8, 1.0, %v4973_v33  ;;  %vm2861_vm9 = vcmp.eq.s32.totalorder %v1517_v0, 128  ;;  %v1516_v63 = vsub.s32 %v1459_v56, %v6090_v19 }
 0x22b   : > { %3389 = vmatpush2.msra.mxu0 %v3055_v35  ;;  %3471 = vmatpush2.msra.mxu1 %v3055_v35  ;;  %v2542_v39 = vadd.f32 %v4750_v17, %v4726_v1  ;;  %v4790_v43 = vsel %vm2861_vm9, 1.0, %v4973_v33  ;;  %v1515_v20 = vsub.s32 %v1459_v56, %v6086_v45  ;;  %v1514_v23 = vsub.s32 %v1458_v55, %v6090_v19 }
 0x22c   : > { %v3053_v10 = vadd.f32 %v4790_v43, %v4774_v12  ;;  %vm2092_vm10 = vcmp.eq.s32.totalorder %v1516_v63, 4294967232  ;;  %vm2348_vm11 = vcmp.eq.s32.totalorder %v1516_v63, 0  ;;  %v1513_v58 = vsub.s32 %v1458_v55, %v6086_v45 }
 0x22d   : > { %3390 = vmatprep.subr.mxu0 %v2542_v39  ;;  %3472 = vmatprep.subr.mxu1 %v2542_v39  ;;  %v4725_v25 = vsel %vm2092_vm10, 1.0, %v4973_v33  ;;  %v4749_v3 = vsel %vm2348_vm11, 1.0, %v4973_v33  ;;  %vm2603_vm12 = vcmp.eq.s32.totalorder %v1515_v20, 64  ;;  %vm2859_vm13 = vcmp.eq.s32.totalorder %v1515_v20, 128 }
 0x22e   : > { %3391 = vmatpush2.msra.mxu0 %v3053_v10  ;;  %3473 = vmatpush2.msra.mxu1 %v3053_v10  ;;  %v2540_v34 = vadd.f32 %v4749_v3, %v4725_v25  ;;  %v4773_v30 = vsel %vm2603_vm12, 1.0, %v4973_v33  ;;  %v4789_v49 = vsel %vm2859_vm13, 1.0, %v4973_v33  ;;  %vm2090_vm14 = vcmp.eq.s32.totalorder %v1514_v23, 4294967232 }
 0x22f   : > { %v3051_v14 = vadd.f32 %v4789_v49, %v4773_v30  ;;  %v4724_v26 = vsel %vm2090_vm14, 1.0, %v4973_v33  ;;  %vm2346_vm15 = vcmp.eq.s32.totalorder %v1514_v23, 0  ;;  %vm2601_vm0 = vcmp.eq.s32.totalorder %v1513_v58, 64 }
 0x230   : > { %3392 = vmatprep.subr.mxu0 %v2540_v34  ;;  %3474 = vmatprep.subr.mxu1 %v2540_v34  ;;  %v4748_v8 = vsel %vm2346_vm15, 1.0, %v4973_v33  ;;  %v4772_v47 = vsel %vm2601_vm0, 1.0, %v4973_v33  ;;  %vm2857_vm1 = vcmp.eq.s32.totalorder %v1513_v58, 128  ;;  %v1512_v46 = vsub.s32 %v6274_v18, %v6090_v19 }
 0x231   : > { %3393 = vmatpush2.msra.mxu0 %v3051_v14  ;;  %3475 = vmatpush2.msra.mxu1 %v3051_v14  ;;  %v2538_v37 = vadd.f32 %v4748_v8, %v4724_v26  ;;  %v4788_v32 = vsel %vm2857_vm1, 1.0, %v4973_v33  ;;  %v1511_v44 = vsub.s32 %v6274_v18, %v6086_v45  ;;  %v1510_v27 = vsub.s32 %v6280_v61, %v6090_v19 }
 0x232   : > { %v3049_v40 = vadd.f32 %v4788_v32, %v4772_v47  ;;  %vm2088_vm2 = vcmp.eq.s32.totalorder %v1512_v46, 4294967232  ;;  %vm2344_vm3 = vcmp.eq.s32.totalorder %v1512_v46, 0  ;;  %v1509_v53 = vsub.s32 %v6280_v61, %v6086_v45 }
 0x233   : > { %3394 = vmatprep.subr.mxu0 %v2538_v37  ;;  %3476 = vmatprep.subr.mxu1 %v2538_v37  ;;  %v4723_v42 = vsel %vm2088_vm2, 1.0, %v4973_v33  ;;  %v4747_v51 = vsel %vm2344_vm3, 1.0, %v4973_v33  ;;  %vm2599_vm4 = vcmp.eq.s32.totalorder %v1511_v44, 64  ;;  %vm2855_vm5 = vcmp.eq.s32.totalorder %v1511_v44, 128 }
 0x234   : > { %3395 = vmatpush2.msra.mxu0 %v3049_v40  ;;  %3477 = vmatpush2.msra.mxu1 %v3049_v40  ;;  %v2536_v48 = vadd.f32 %v4747_v51, %v4723_v42  ;;  %v4771_v36 = vsel %vm2599_vm4, 1.0, %v4973_v33  ;;  %v4787_v52 = vsel %vm2855_vm5, 1.0, %v4973_v33  ;;  %vm2086_vm6 = vcmp.eq.s32.totalorder %v1510_v27, 4294967232  ;;  %v3503_v42 = vld [vmem:[%s7055_s4] sm:$0x3] }
 0x235   : > { %v3047_v22 = vadd.f32 %v4787_v52, %v4771_v36  ;;  %v4722_v38 = vsel %vm2086_vm6, 1.0, %v4973_v33  ;;  %vm2342_vm7 = vcmp.eq.s32.totalorder %v1510_v27, 0  ;;  %vm2597_vm8 = vcmp.eq.s32.totalorder %v1509_v53, 64 }
 0x236   : > { %3396 = vmatprep.subr.mxu0 %v2536_v48  ;;  %3478 = vmatprep.subr.mxu1 %v2536_v48  ;;  %v4746_v21 = vsel %vm2342_vm7, 1.0, %v4973_v33  ;;  %v4770_v54 = vsel %vm2597_vm8, 1.0, %v4973_v33  ;;  %vm2853_vm9 = vcmp.eq.s32.totalorder %v1509_v53, 128  ;;  %v1455_v29 = vadd.s32 136, %v6083_v24 }
 0x237   : > { %3397 = vmatpush2.msra.mxu0 %v3047_v22  ;;  %3479 = vmatpush2.msra.mxu1 %v3047_v22  ;;  %v2534_v56 = vadd.f32 %v4746_v21, %v4722_v38  ;;  %v4786_v55 = vsel %vm2853_vm9, 1.0, %v4973_v33  ;;  %v1454_v60 = vadd.s32 128, %v6083_v24  ;;  %v6325_v11 = vsub.s32 0, %v6083_v24 }
 0x238   : > { %v3045_v7 = vadd.f32 %v4786_v55, %v4770_v54  ;;  %v1508_v18 = vsub.s32 %v1455_v29, %v6090_v19  ;;  %v1507_v9 = vsub.s32 %v1455_v29, %v6086_v45  ;;  %v6333_v4 = vsub.s32 1, %v6083_v24  ;;  %v3532_v54 = vld [vmem:[%s7056_s5] sm:$0x3] }
 0x239   : > { %3398 = vmatprep.subr.mxu0 %v2534_v56  ;;  %3480 = vmatprep.subr.mxu1 %v2534_v56  ;;  %v1506_v15 = vsub.s32 %v1454_v60, %v6090_v19  ;;  %v1505_v0 = vsub.s32 %v1454_v60, %v6086_v45  ;;  %v3333_v61 = vrot.slane %v1435_v57, %v6325_v11  ;;  %v4974_v47 = vmov 1966171168  }
 0x23a   : > { %3399 = vmatpush2.msra.mxu0 %v3045_v7  ;;  %3481 = vmatpush2.msra.mxu1 %v3045_v7  ;;  %vm2084_vm10 = vcmp.eq.s32.totalorder %v1508_v18, 4294967232  ;;  %vm2340_vm11 = vcmp.eq.s32.totalorder %v1508_v18, 0  ;;  %vm2595_vm12 = vcmp.eq.s32.totalorder %v1507_v9, 64  ;;  %vm2851_vm13 = vcmp.eq.s32.totalorder %v1507_v9, 128 }
 0x23b   : > { %v4721_v50 = vsel %vm2084_vm10, 1.0, %v4973_v33  ;;  %v4745_v16 = vsel %vm2340_vm11, 1.0, %v4973_v33  ;;  %v4769_v59 = vsel %vm2595_vm12, 1.0, %v4973_v33  ;;  %v4785_v19 = vsel %vm2851_vm13, 1.0, %v4973_v33 }
 0x23c   : > { %v2532_v45 = vadd.f32 %v4745_v16, %v4721_v50  ;;  %v3043_v41 = vadd.f32 %v4785_v19, %v4769_v59  ;;  %vm2082_vm14 = vcmp.eq.s32.totalorder %v1506_v15, 4294967232  ;;  %vm2338_vm15 = vcmp.eq.s32.totalorder %v1506_v15, 0 }
 0x23d   : > { %v4720_v2 = vsel %vm2082_vm14, 1.0, %v4973_v33  ;;  %v4744_v31 = vsel %vm2338_vm15, 1.0, %v4973_v33  ;;  %vm2593_vm0 = vcmp.eq.s32.totalorder %v1505_v0, 64  ;;  %vm2849_vm1 = vcmp.eq.s32.totalorder %v1505_v0, 128 }
 0x23e   : > { %3400 = vmatprep.subr.mxu0 %v2532_v45  ;;  %3482 = vmatprep.subr.mxu1 %v2532_v45  ;;  %v2530_v13 = vadd.f32 %v4744_v31, %v4720_v2  ;;  %v4768_v5 = vsel %vm2593_vm0, 1.0, %v4973_v33  ;;  %v4784_v62 = vsel %vm2849_vm1, 1.0, %v4973_v33  ;;  %v3337_v35 = vrot.slane %v1435_v57, %v6333_v4 }
 0x23f   : > { %3401 = vmatpush2.msra.mxu0 %v3043_v41  ;;  %3483 = vmatpush2.msra.mxu1 %v3043_v41  ;;  %v3041_v1 = vadd.f32 %v4784_v62, %v4768_v5  ;;  %v3415_v17 = vrot.slane %v1436_v6, %v6325_v11  ;;  %v3419_v12 = vrot.slane %v1436_v6, %v6333_v4  ;;  %v3512_v46 = vunpack.c.l.s4 %v4974_v47 }
 0x240   : > { %3402 = vmatprep.subr.mxu0 %v2530_v13  ;;  %3484 = vmatprep.subr.mxu1 %v2530_v13  ;;  %vm3529_vm2 = vcmp.lt.s32.totalorder %v1437_v28, 256 }
 0x241   : > { %3403 = vmatpush2.msra.mxu0 %v3041_v1  ;;  %3404 = vmatprep.mubr.f32.mxu0 %v3337_v35  ;;  %v3513_v37 = vunpack.c.0.s8 %v3512_v46 }
 0x242   : > { %3485 = vmatpush2.msra.mxu1 %v3041_v1  ;;  %3486 = vmatprep.mubr.f32.mxu1 %v3419_v12 }
 0x243   : > { %3405 = vmatmul.mubr.f32.vlgmr.msra.gmra.mxu0 %v3333_v61  ;;  %3487 = vmatmul.mubr.f32.vlgmr.msra.gmra.mxu1 %v3415_v17  ;;  %v3516_v44 = vsub.s32 %v3513_v37, %v6083_v24 }
 0x303   : > { %v3406_v63 = vpop.f32.mrf.mxu0  ;;  %v3488_v39 = vpop.f32.mrf.mxu1 }
 0x304   : > { %v3493_v33 = vmul.f32 0.00048828125, %v3406_v63  ;;  %v3495_v43 = vmul.f32 0.00048828125, %v3488_v39 }
 0x305   : > { %v3408_v20 = vpop.f32.mrf.mxu0  ;;  %v3490_v23 = vpop.f32.mrf.mxu1 }
 0x306   : > { %v3497_v10 = vmul.f32 %v3493_v33, %v3493_v33  ;;  %v3494_v58 = vmul.f32 0.00048828125, %v3408_v20  ;;  %v3496_v34 = vmul.f32 0.00048828125, %v3490_v23 }
 0x308   : > { %v3499_v25 = vsub.f32 %v3495_v43, %v3497_v10  ;;  %v3498_v3 = vmul.f32 %v3494_v58, %v3494_v58 }
 0x30a   : > { %v3501_v30 = vmax.f32 %v3499_v25, 0.0  ;;  %v3500_v49 = vsub.f32 %v3496_v34, %v3498_v3 }
 0x30c   : > { %v3504_v14 = vadd.f32 1e-05, %v3501_v30  ;;  %v3502_v26 = vmax.f32 %v3500_v49, 0.0 }
 0x30e   : > { %v3505_v8 = vadd.f32 1e-05, %v3502_v26  ;;  %4942 = vrsqrt.f32 %v3504_v14 }
 0x310   : > { %4944 = vrsqrt.f32 %v3505_v8 }
 0x31b   : > { %v4943_v32 = vpop.eup %4942 }
 0x31d   : > { %v4945_v27 = vpop.eup %4944 }
 0x31e   : > { %v3510_v40 = vcombine.low %v4943_v32, %v4945_v27 }
 0x320   : > { %v3517_v53 = vrot.slane %v3510_v40, %v3516_v44 }
 0x322   : > { %v3524_v51 = vrot.slane %v3517_v53, %v3516_v44 }
 0x324   : > { %v3526_v48 = vmul.f32 %v3524_v51, %v3503_v42 }
 0x326   : > { %3531 = vst.msk [vmem:[#allocation5] sm:$0x3] %vm3529_vm2, %v3526_v48  ;;  %v3537_v36 = vrot.slane %v3526_v48, %v6325_v11  ;;  %v3541_v52 = vrot.slane %v3526_v48, %v6333_v4 }
 0x328   : > { %v3544_v22 = vmul.f32 %v3537_v36, %v3493_v33  ;;  %v3545_v38 = vmul.f32 %v3541_v52, %v3494_v58 }
 0x32a   : > { %v3548_v21 = vcombine.low %v3544_v22, %v3545_v38 }
 0x32c   : > { %v3555_v24 = vrot.slane %v3548_v21, %v3516_v44 }
 0x32e   : > { %v3562_v29 = vrot.slane %v3555_v24, %v3516_v44 }
 0x330   : > { %v3564_v57 = vsub.f32 %v3532_v54, %v3562_v29 }
 0x332   : > { %3565 = vst.msk [vmem:[#allocation6] sm:$0x3] %vm3529_vm2, %v3564_v57 }
 0x333 PF: > { %p4808_p7 = scmp.ne.s32.totalorder %s4960_s21, 1 }
 0x335   : > { %3568 = sbr.rel (%p4808_p7) target bundleno = 1212 (0x4bc), region = 60 }
 0x33a   : > { %v4126_v28 = vld [vmem:[%s7053_s2 + $0x78] sm:$0xff]  ;;  %v4975_v56 = vmov 0.0   ;;  %v4125_v55 = vld [vmem:[%s7053_s2 + $0x70] sm:$0xff]  ;;  %v4124_v60 = vld [vmem:[%s7053_s2 + $0x68] sm:$0xff]  ;;  %v3705_v31 = vlaneseq }
 0x33b   : > { %4150 = vmatprep.subr.mxu0 %v4975_v56  ;;  %4848 = vmatprep.subr.mxu1 %v4975_v56  ;;  %v4123_v11 = vld [vmem:[%s7053_s2 + $0x60] sm:$0xff]  ;;  %v4122_v7 = vld [vmem:[%s7053_s2 + $0x58] sm:$0xff]  ;;  %v4121_v18 = vld [vmem:[%s7053_s2 + $0x50] sm:$0xff] }
 0x33c   : > { %4151 = vmatpush1.msra.mxu0 %v4126_v28  ;;  %4880 = vmatpush1.msra.mxu1 %v4126_v28  ;;  %v4120_v9 = vld [vmem:[%s7053_s2 + $0x48] sm:$0xff]  ;;  %v4119_v15 = vld [vmem:[%s7053_s2 + $0x40] sm:$0xff]  ;;  %v4118_v0 = vld [vmem:[%s7053_s2 + $0x38] sm:$0xff]  ;;  %v3706_v62 = vshrl.u32 %v3705_v31, 7 }
 0x33d   : > { %4152 = vmatprep.subr.mxu0 %v4975_v56  ;;  %4849 = vmatprep.subr.mxu1 %v4975_v56  ;;  %v4117_v61 = vld [vmem:[%s7053_s2 + $0x30] sm:$0xff]  ;;  %v4116_v4 = vld [vmem:[%s7053_s2 + $0x28] sm:$0xff]  ;;  %v4115_v50 = vld [vmem:[%s7053_s2 + $0x20] sm:$0xff] }
 0x33e   : > { %4153 = vmatpush1.msra.mxu0 %v4125_v55  ;;  %4881 = vmatpush1.msra.mxu1 %v4125_v55  ;;  %v4114_v16 = vld [vmem:[%s7053_s2 + $0x18] sm:$0xff]  ;;  %v4113_v59 = vld [vmem:[%s7053_s2 + $0x10] sm:$0xff]  ;;  %v4112_v19 = vld [vmem:[%s7053_s2 + $0x8] sm:$0xff]  ;;  %v3711_v17 = vsub.s32 1, %v3706_v62  ;;  %v3707_v39 = vsub.s32 0, %v3706_v62 }
 0x33f   : > { %4154 = vmatprep.subr.mxu0 %v4975_v56  ;;  %4850 = vmatprep.subr.mxu1 %v4975_v56  ;;  %v4111_v45 = vld [vmem:[%s7053_s2] sm:$0xff]  ;;  %v4142_v41 = vld [vmem:[%s7053_s2 + $0xf8] sm:$0xff]  ;;  %v4141_v6 = vld [vmem:[%s7053_s2 + $0xf0] sm:$0xff] }
 0x340   : > { %4155 = vmatpush1.msra.mxu0 %v4124_v60  ;;  %4882 = vmatpush1.msra.mxu1 %v4124_v60  ;;  %v4140_v2 = vld [vmem:[%s7053_s2 + $0xe8] sm:$0xff]  ;;  %v4139_v13 = vld [vmem:[%s7053_s2 + $0xe0] sm:$0xff]  ;;  %v4138_v5 = vld [vmem:[%s7053_s2 + $0xd8] sm:$0xff] }
 0x341   : > { %4156 = vmatprep.subr.mxu0 %v4975_v56  ;;  %4851 = vmatprep.subr.mxu1 %v4975_v56  ;;  %v4137_v35 = vld [vmem:[%s7053_s2 + $0xd0] sm:$0xff]  ;;  %v4136_v1 = vld [vmem:[%s7053_s2 + $0xc8] sm:$0xff]  ;;  %v4135_v12 = vld [vmem:[%s7053_s2 + $0xc0] sm:$0xff] }
 0x342   : > { %4157 = vmatpush1.msra.mxu0 %v4123_v11  ;;  %4883 = vmatpush1.msra.mxu1 %v4123_v11  ;;  %v3703_v63 = vld [vmem:[#allocation5] sm:$0x3]  ;;  %v4134_v33 = vld [vmem:[%s7053_s2 + $0xb8] sm:$0xff]  ;;  %v4133_v43 = vld [vmem:[%s7053_s2 + $0xb0] sm:$0xff] }
 0x343   : > { %4158 = vmatprep.subr.mxu0 %v4975_v56  ;;  %4852 = vmatprep.subr.mxu1 %v4975_v56  ;;  %v6483_v20 = vrot.slane %v3703_v63, %v3711_v17  ;;  %v3576_v23 = vld [vmem:[#allocation2 + $0x3b0] sm:$0xff]  ;;  %v6487_v10 = vrot.slane %v3703_v63, %v3707_v39  ;;  %v3843_v58 = vld [vmem:[#allocation6] sm:$0x3]  ;;  %v4132_v34 = vld [vmem:[%s7053_s2 + $0xa8] sm:$0xff] }
 0x344   : > { %4159 = vmatpush1.msra.mxu0 %v4122_v7  ;;  %4884 = vmatpush1.msra.mxu1 %v4122_v7  ;;  %v3640_v25 = vld [vmem:[#allocation2 + $0x200] sm:$0xff]  ;;  %v3575_v3 = vld [vmem:[#allocation2 + $0x2b0] sm:$0xff]  ;;  %v6495_v14 = vrot.slane %v3843_v58, %v3711_v17  ;;  %v3578_v8 = vld [vmem:[#allocation2 + $0x18] sm:$0xff]  ;;  %v6503_v37 = vrot.slane %v3843_v58, %v3707_v39 }
 0x345   : > { %4160 = vmatprep.subr.mxu0 %v4975_v56  ;;  %4853 = vmatprep.subr.mxu1 %v4975_v56  ;;  %v3639_v30 = vld [vmem:[#allocation2 + $0x130] sm:$0xff]  ;;  %v3716_v49 = vmul.f32 %v6483_v20, %v3576_v23  ;;  %v3780_v26 = vmul.f32 %v6483_v20, %v3640_v25  ;;  %v3642_v47 = vld [vmem:[#allocation2 + $0x220] sm:$0xff]  ;;  %v3715_v32 = vmul.f32 %v6487_v10, %v3575_v3  ;;  %v3577_v27 = vld [vmem:[#allocation2 + $0xd8] sm:$0xff] }
 0x346   : > { %4161 = vmatpush1.msra.mxu0 %v4121_v18  ;;  %4885 = vmatpush1.msra.mxu1 %v4121_v18  ;;  %v4131_v46 = vld [vmem:[%s7053_s2 + $0xa0] sm:$0xff]  ;;  %v3779_v44 = vmul.f32 %v6487_v10, %v3639_v30  ;;  %v3641_v40 = vld [vmem:[#allocation2 + $0x318] sm:$0xff]  ;;  %v3718_v42 = vmul.f32 %v6483_v20, %v3578_v8  ;;  %v3782_v51 = vmul.f32 %v6483_v20, %v3642_v47  ;;  %v3580_v48 = vld [vmem:[#allocation2 + $0x368] sm:$0xff] }
 0x347   : > { %4162 = vmatprep.subr.mxu0 %v4975_v56  ;;  %4854 = vmatprep.subr.mxu1 %v4975_v56  ;;  %v4130_v53 = vld [vmem:[%s7053_s2 + $0x98] sm:$0xff]  ;;  %v3856_v36 = vadd.f32 %v6495_v14, %v3716_v49  ;;  %v3920_v52 = vadd.f32 %v6495_v14, %v3780_v26  ;;  %v3644_v22 = vld [vmem:[#allocation2 + $0x300] sm:$0xff]  ;;  %v4129_v38 = vld [vmem:[%s7053_s2 + $0x90] sm:$0xff]  ;;  %v3855_v21 = vadd.f32 %v6503_v37, %v3715_v32 }
 0x348   : > { %4163 = vmatpush1.msra.mxu0 %v4120_v9  ;;  %4886 = vmatpush1.msra.mxu1 %v4120_v9  ;;  %v3717_v24 = vmul.f32 %v6487_v10, %v3577_v27  ;;  %v3781_v54 = vmul.f32 %v6487_v10, %v3641_v40  ;;  %v3919_v29 = vadd.f32 %v6503_v37, %v3779_v44  ;;  %v3579_v28 = vld [vmem:[#allocation2 + $0x50] sm:$0xff]  ;;  %v4128_v55 = vld [vmem:[%s7053_s2 + $0x88] sm:$0xff]  ;;  %v3583_v3 = vld [vmem:[#allocation2 + $0x380] sm:$0xff] }
 0x349   : > { %4164 = vmatprep.subr.mxu0 %v4975_v56  ;;  %4855 = vmatprep.subr.mxu1 %v4975_v56  ;;  %v3720_v57 = vmul.f32 %v6483_v20, %v3580_v48  ;;  %v3858_v60 = vadd.f32 %v6495_v14, %v3718_v42  ;;  %v3922_v11 = vadd.f32 %v6495_v14, %v3782_v51  ;;  %v3643_v18 = vld [vmem:[#allocation2 + $0x70] sm:$0xff]  ;;  %v3582_v9 = vld [vmem:[#allocation2 + $0x48] sm:$0xff]  ;;  %v3586_v47 = vld [vmem:[#allocation2 + $0x98] sm:$0xff] }
 0x34a   : > { %4165 = vmatpush1.msra.mxu0 %v4119_v15  ;;  %4887 = vmatpush1.msra.mxu1 %v4119_v15  ;;  %v3784_v7 = vmul.f32 %v6483_v20, %v3644_v22  ;;  %v3984_v15 = vmax.f32 %v3856_v36, 0.0  ;;  %v3581_v31 = vld [vmem:[#allocation2 + $0x330] sm:$0xff]  ;;  %v3723_v27 = vmul.f32 %v6487_v10, %v3583_v3  ;;  %v3726_v48 = vmul.f32 %v6483_v20, %v3586_v47  ;;  %v3585_v36 = vld [vmem:[#allocation2 + $0x118] sm:$0xff] }
 0x34b   : > { %4166 = vmatprep.subr.mxu0 %v4975_v56  ;;  %4856 = vmatprep.subr.mxu1 %v4975_v56  ;;  %v3584_v17 = vld [vmem:[#allocation2 + $0x110] sm:$0xff] }
 0x34c   : > { %4167 = vmatpush1.msra.mxu0 %v4118_v0  ;;  %4888 = vmatpush1.msra.mxu1 %v4118_v0  ;;  %v4048_v0 = vmax.f32 %v3920_v52, 0.0  ;;  %v3924_v62 = vadd.f32 %v6495_v14, %v3784_v7  ;;  %v3724_v26 = vmul.f32 %v6483_v20, %v3584_v17  ;;  %v3866_v7 = vadd.f32 %v6495_v14, %v3726_v48 }
 0x34d   : > { %4168 = vmatprep.subr.mxu0 %v4975_v56  ;;  %4857 = vmatprep.subr.mxu1 %v4975_v56 }
 0x34e   : > { %4169 = vmatpush1.msra.mxu0 %v4117_v61  ;;  %4889 = vmatpush1.msra.mxu1 %v4117_v61  ;;  %v3646_v61 = vld [vmem:[#allocation2 + $0x178] sm:$0xff]  ;;  %v4052_v30 = vmax.f32 %v3924_v62, 0.0  ;;  %v3864_v22 = vadd.f32 %v6495_v14, %v3724_v26  ;;  %v3591_v26 = vld [vmem:[#allocation2 + $0x2e0] sm:$0xff] }
 0x34f   : > { %4170 = vmatprep.subr.mxu0 %v4975_v56  ;;  %4858 = vmatprep.subr.mxu1 %v4975_v56  ;;  %v3731_v48 = vmul.f32 %v6487_v10, %v3591_v26 }
 0x350   : > { %4171 = vmatpush1.msra.mxu0 %v4116_v4  ;;  %4890 = vmatpush1.msra.mxu1 %v4116_v4  ;;  %v4127_v4 = vld [vmem:[%s7053_s2 + $0x80] sm:$0xff] }
 0x351   : > { %4172 = vmatprep.subr.mxu0 %v4975_v56  ;;  %4859 = vmatprep.subr.mxu1 %v4975_v56 }
 0x352   : > { %4173 = vmatpush1.msra.mxu0 %v4115_v50  ;;  %4891 = vmatpush1.msra.mxu1 %v4115_v50  ;;  %v3983_v50 = vmax.f32 %v3855_v21, 0.0 }
 0x353   : > { %4174 = vmatprep.subr.mxu0 %v4975_v56  ;;  %4860 = vmatprep.subr.mxu1 %v4975_v56 }
 0x354   : > { %4175 = vmatpush1.msra.mxu0 %v4114_v16  ;;  %4892 = vmatpush1.msra.mxu1 %v4114_v16  ;;  %v3857_v16 = vadd.f32 %v6503_v37, %v3717_v24  ;;  %v3649_v24 = vld [vmem:[#allocation2 + $0x3b8] sm:$0xff] }
 0x355   : > { %4176 = vmatprep.subr.mxu0 %v4975_v56  ;;  %4861 = vmatprep.subr.mxu1 %v4975_v56 }
 0x356   : > { %4177 = vmatpush1.msra.mxu0 %v4113_v59  ;;  %4893 = vmatpush1.msra.mxu1 %v4113_v59  ;;  %v3921_v59 = vadd.f32 %v6503_v37, %v3781_v54  ;;  %v3985_v63 = vmax.f32 %v3857_v16, 0.0  ;;  %v3588_v54 = vld [vmem:[#allocation2 + $0x150] sm:$0xff]  ;;  %v3651_v16 = vld [vmem:[#allocation2 + $0x248] sm:$0xff] }
 0x357   : > { %4178 = vmatprep.subr.mxu0 %v4975_v56  ;;  %4862 = vmatprep.subr.mxu1 %v4975_v56  ;;  %v3791_v62 = vmul.f32 %v6487_v10, %v3651_v16  ;;  %v3659_v16 = vld [vmem:[#allocation2 + $0x2c8] sm:$0xff] }
 0x358   : > { %4179 = vmatpush1.msra.mxu0 %v4112_v19  ;;  %4894 = vmatpush1.msra.mxu1 %v4112_v19  ;;  %v3719_v19 = vmul.f32 %v6487_v10, %v3579_v28  ;;  %v4049_v39 = vmax.f32 %v3921_v59, 0.0  ;;  %v3863_v28 = vadd.f32 %v6503_v37, %v3723_v27  ;;  %v3590_v59 = vld [vmem:[#allocation2 + $0x60] sm:$0xff] }
 0x359   : > { %4180 = vmatprep.subr.mxu0 %v4975_v56  ;;  %4863 = vmatprep.subr.mxu1 %v4975_v56  ;;  %v3594_v27 = vld [vmem:[#allocation2 + $0x340] sm:$0xff] }
 0x35a   : > { %4181 = vmatpush1.msra.mxu0 %v4111_v45  ;;  %4895 = vmatpush1.msra.mxu1 %v4111_v45  ;;  %v4047_v45 = vmax.f32 %v3919_v29, 0.0  ;;  %v3652_v29 = vld [vmem:[#allocation2 + $0x40] sm:$0xff] }
 0x35b   : > { %4182 = vmatprep.subr.mxu0 %v4975_v56  ;;  %4864 = vmatprep.subr.mxu1 %v4975_v56 }
 0x35c   : > { %4183 = vmatpush2.msra.mxu0 %v4142_v41  ;;  %4896 = vmatpush2.msra.mxu1 %v4142_v41  ;;  %v3860_v41 = vadd.f32 %v6495_v14, %v3720_v57 }
 0x35d   : > { %4184 = vmatprep.subr.mxu0 %v4975_v56  ;;  %4865 = vmatprep.subr.mxu1 %v4975_v56 }
 0x35e   : > { %4185 = vmatpush2.msra.mxu0 %v4141_v6  ;;  %4897 = vmatpush2.msra.mxu1 %v4141_v6  ;;  %v3783_v6 = vmul.f32 %v6487_v10, %v3643_v18  ;;  %v3789_v18 = vmul.f32 %v6487_v10, %v3649_v24 }
 0x35f   : > { %4186 = vmatprep.subr.mxu0 %v4975_v56  ;;  %4866 = vmatprep.subr.mxu1 %v4975_v56 }
 0x360   : > { %4187 = vmatpush2.msra.mxu0 %v4140_v2  ;;  %4898 = vmatpush2.msra.mxu1 %v4140_v2  ;;  %v3722_v2 = vmul.f32 %v6483_v20, %v3582_v9  ;;  %v3923_v23 = vadd.f32 %v6503_v37, %v3783_v6  ;;  %v3728_v9 = vmul.f32 %v6483_v20, %v3588_v54 }
 0x361   : > { %4188 = vmatprep.subr.mxu0 %v4975_v56  ;;  %4867 = vmatprep.subr.mxu1 %v4975_v56 }
 0x362   : > { %4189 = vmatpush2.msra.mxu0 %v4139_v13  ;;  %4899 = vmatpush2.msra.mxu1 %v4139_v13  ;;  %v3986_v13 = vmax.f32 %v3858_v60, 0.0  ;;  %v3862_v58 = vadd.f32 %v6495_v14, %v3722_v2  ;;  %v3725_v60 = vmul.f32 %v6487_v10, %v3585_v36 }
 0x363   : > { %4190 = vmatprep.subr.mxu0 %v4975_v56  ;;  %4868 = vmatprep.subr.mxu1 %v4975_v56 }
 0x364   : > { %4191 = vmatpush2.msra.mxu0 %v4138_v5  ;;  %4900 = vmatpush2.msra.mxu1 %v4138_v5  ;;  %v4050_v5 = vmax.f32 %v3922_v11, 0.0  ;;  %v3990_v42 = vmax.f32 %v3862_v58, 0.0  ;;  %v3865_v6 = vadd.f32 %v6503_v37, %v3725_v60  ;;  %v3660_v60 = vld [vmem:[#allocation2 + $0x210] sm:$0xff] }
 0x365   : > { %4192 = vmatprep.subr.mxu0 %v4975_v56  ;;  %4869 = vmatprep.subr.mxu1 %v4975_v56 }
 0x366   : > { %4193 = vmatpush2.msra.mxu0 %v4137_v35  ;;  %4901 = vmatpush2.msra.mxu1 %v4137_v35  ;;  %v3786_v35 = vmul.f32 %v6483_v20, %v3646_v61 }
 0x367   : > { %4194 = vmatprep.subr.mxu0 %v4975_v56  ;;  %4870 = vmatprep.subr.mxu1 %v4975_v56 }
 0x368   : > { %4195 = vmatpush2.msra.mxu0 %v4136_v1  ;;  %4902 = vmatpush2.msra.mxu1 %v4136_v1  ;;  %v3645_v1 = vld [vmem:[#allocation2 + $0xe0] sm:$0xff]  ;;  %v3926_v49 = vadd.f32 %v6495_v14, %v3786_v35  ;;  %v3589_v35 = vld [vmem:[#allocation2 + $0x108] sm:$0xff] }
 0x369   : > { %4196 = vmatprep.subr.mxu0 %v4975_v56  ;;  %4871 = vmatprep.subr.mxu1 %v4975_v56  ;;  %v3785_v25 = vmul.f32 %v6487_v10, %v3645_v1  ;;  %v3653_v1 = vld [vmem:[#allocation2 + $0x20] sm:$0xff]  ;;  %v3729_v58 = vmul.f32 %v6487_v10, %v3589_v35 }
 0x36a   : > { %4197 = vmatpush2.msra.mxu0 %v4135_v12  ;;  %4903 = vmatpush2.msra.mxu1 %v4135_v12  ;;  %v3648_v12 = vld [vmem:[#allocation2 + $0x260] sm:$0xff]  ;;  %v4054_v52 = vmax.f32 %v3926_v49, 0.0 }
 0x36b   : > { %4198 = vmatprep.subr.mxu0 %v4975_v56  ;;  %4872 = vmatprep.subr.mxu1 %v4975_v56  ;;  %v3788_v8 = vmul.f32 %v6483_v20, %v3648_v12  ;;  %v3925_v51 = vadd.f32 %v6503_v37, %v3785_v25  ;;  %v3793_v25 = vmul.f32 %v6487_v10, %v3653_v1 }
 0x36c   : > { %4199 = vmatpush2.msra.mxu0 %v4134_v33  ;;  %4904 = vmatpush2.msra.mxu1 %v4134_v33  ;;  %v3859_v33 = vadd.f32 %v6503_v37, %v3719_v19  ;;  %v3654_v19 = vld [vmem:[#allocation2 + $0xe8] sm:$0xff] }
 0x36d   : > { %4200 = vmatprep.subr.mxu0 %v4975_v56  ;;  %4873 = vmatprep.subr.mxu1 %v4975_v56  ;;  %v4053_v11 = vmax.f32 %v3925_v51, 0.0  ;;  %v3933_v51 = vadd.f32 %v6503_v37, %v3793_v25  ;;  %v3664_v25 = vld [vmem:[#allocation2 + $0x1c8] sm:$0xff] }
 0x36e   : > { %4201 = vmatpush2.msra.mxu0 %v4133_v43  ;;  %4905 = vmatpush2.msra.mxu1 %v4133_v43  ;;  %v3721_v43 = vmul.f32 %v6487_v10, %v3581_v31  ;;  %v3987_v32 = vmax.f32 %v3859_v33, 0.0  ;;  %v3994_v31 = vmax.f32 %v3866_v7, 0.0  ;;  %v3592_v33 = vld [vmem:[#allocation2 + $0x388] sm:$0xff] }
 0x36f   : > { %4202 = vmatprep.subr.mxu0 %v4975_v56  ;;  %4874 = vmatprep.subr.mxu1 %v4975_v56  ;;  %v3732_v49 = vmul.f32 %v6483_v20, %v3592_v33  ;;  %v4061_v7 = vmax.f32 %v3933_v51, 0.0  ;;  %v3602_v51 = vld [vmem:[#allocation2 + $0x28] sm:$0xff] }
 0x370   : > { %4203 = vmatpush2.msra.mxu0 %v4132_v34  ;;  %4906 = vmatpush2.msra.mxu1 %v4132_v34  ;;  %v3647_v34 = vld [vmem:[#allocation2 + $0x328] sm:$0xff]  ;;  %v3861_v44 = vadd.f32 %v6503_v37, %v3721_v43 }
 0x371   : > { %4204 = vmatprep.subr.mxu0 %v4975_v56  ;;  %4875 = vmatprep.subr.mxu1 %v4975_v56  ;;  %v3787_v40 = vmul.f32 %v6487_v10, %v3647_v34  ;;  %v3656_v43 = vld [vmem:[#allocation2 + $0x3a8] sm:$0xff] }
 0x372   : > { %4205 = vmatpush2.msra.mxu0 %v4131_v46  ;;  %4907 = vmatpush2.msra.mxu1 %v4131_v46  ;;  %v3650_v46 = vld [vmem:[#allocation2 + $0x2b8] sm:$0xff]  ;;  %v3989_v57 = vmax.f32 %v3861_v44, 0.0  ;;  %v3655_v44 = vld [vmem:[#allocation2 + $0x288] sm:$0xff] }
 0x373   : > { %4206 = vmatprep.subr.mxu0 %v4975_v56  ;;  %4876 = vmatprep.subr.mxu1 %v4975_v56  ;;  %v3790_v21 = vmul.f32 %v6483_v20, %v3650_v46 }
 0x374   : > { %4207 = vmatpush2.msra.mxu0 %v4130_v53  ;;  %4908 = vmatpush2.msra.mxu1 %v4130_v53  ;;  %v4051_v53 = vmax.f32 %v3923_v23, 0.0 }
 0x375   : > { %4208 = vmatprep.subr.mxu0 %v4975_v56  ;;  %4877 = vmatprep.subr.mxu1 %v4975_v56 }
 0x376   : > { %4209 = vmatpush2.msra.mxu0 %v4129_v38  ;;  %4909 = vmatpush2.msra.mxu1 %v4129_v38  ;;  %v3928_v38 = vadd.f32 %v6495_v14, %v3788_v8 }
 0x377   : > { %4210 = vmatprep.subr.mxu0 %v4975_v56  ;;  %4878 = vmatprep.subr.mxu1 %v4975_v56 }
 0x378   : > { %4211 = vmatpush2.msra.mxu0 %v4128_v55  ;;  %4910 = vmatpush2.msra.mxu1 %v4128_v55  ;;  %v3927_v55 = vadd.f32 %v6503_v37, %v3787_v40  ;;  %v4056_v61 = vmax.f32 %v3928_v38, 0.0  ;;  %v3658_v40 = vld [vmem:[#allocation2 + $0x160] sm:$0xff]  ;;  %v3734_v38 = vmul.f32 %v6483_v20, %v3594_v27 }
 0x379   : > { %4212 = vmatprep.subr.mxu0 %v4975_v56  ;;  %4879 = vmatprep.subr.mxu1 %v4975_v56  ;;  %v3988_v56 = vmax.f32 %v3860_v41, 0.0 }
 0x37a   : > { %4213 = vmatpush2.msra.mxu0 %v4127_v4  ;;  %4911 = vmatpush2.msra.mxu1 %v4127_v4  ;;  %v3930_v4 = vadd.f32 %v6495_v14, %v3790_v21  ;;  %v4055_v41 = vmax.f32 %v3927_v55, 0.0  ;;  %v3593_v21 = vld [vmem:[#allocation2 + $0x338] sm:$0xff]  ;;  %v3596_v55 = vld [vmem:[#allocation2 + $0x1a8] sm:$0xff] }
 0x37b   : > { %4214 = vmatprep.mubr.f32.mxu0 %v3984_v15  ;;  %4374 = vmatprep.mubr.f32.mxu1 %v4048_v0  ;;  %v3587_v15 = vld [vmem:[#allocation2 + $0x320] sm:$0xff]  ;;  %v3992_v0 = vmax.f32 %v3864_v22, 0.0  ;;  %v3795_v22 = vmul.f32 %v6487_v10, %v3655_v44 }
 0x37c   : > { %4215 = vmatmul.mubr.f32.vlgmr.msra.gmra.mxu0 %v3983_v50  ;;  %4375 = vmatmul.mubr.f32.vlgmr.msra.gmra.mxu1 %v4047_v45  ;;  %v3792_v50 = vmul.f32 %v6483_v20, %v3652_v29  ;;  %v3991_v45 = vmax.f32 %v3863_v28, 0.0  ;;  %v3727_v2 = vmul.f32 %v6487_v10, %v3587_v15  ;;  %v4058_v17 = vmax.f32 %v3930_v4, 0.0  ;;  %v3657_v28 = vld [vmem:[#allocation2 + $0x3c8] sm:$0xff] }
 0x37d   : > { %4219 = vmatprep.mubr.f32.mxu0 %v3986_v13  ;;  %4379 = vmatprep.mubr.f32.mxu1 %v4050_v5  ;;  %v3929_v13 = vadd.f32 %v6503_v37, %v3789_v18  ;;  %v3868_v5 = vadd.f32 %v6495_v14, %v3728_v9  ;;  %v3871_v18 = vadd.f32 %v6503_v37, %v3731_v48  ;;  %v3666_v48 = vld [vmem:[#allocation2 + $0x1d0] sm:$0xff] }
 0x37e   : > { %v3932_v12 = vadd.f32 %v6495_v14, %v3792_v50  ;;  %v3867_v23 = vadd.f32 %v6503_v37, %v3727_v2  ;;  %v3733_v9 = vmul.f32 %v6487_v10, %v3593_v21  ;;  %v3797_v4 = vmul.f32 %v6487_v10, %v3657_v28  ;;  %v3595_v50 = vld [vmem:[#allocation2 + $0x80] sm:$0xff]  ;;  %v3662_v2 = vld [vmem:[#allocation2 + $0x1e8] sm:$0xff]  ;;  %v3665_v28 = vld [vmem:[#allocation2 + $0x2d0] sm:$0xff] }
 0x37f   : > { %v4057_v3 = vmax.f32 %v3929_v13, 0.0  ;;  %v3996_v34 = vmax.f32 %v3868_v5, 0.0  ;;  %v3735_v5 = vmul.f32 %v6487_v10, %v3595_v50 }
 0x380   : > { %4220 = vmatmul.mubr.f32.gmra.mxu0 %v3985_v63  ;;  %4380 = vmatmul.mubr.f32.gmra.mxu1 %v4049_v39  ;;  %v3730_v63 = vmul.f32 %v6483_v20, %v3590_v59  ;;  %v3794_v39 = vmul.f32 %v6483_v20, %v3654_v19  ;;  %v4060_v8 = vmax.f32 %v3932_v12, 0.0  ;;  %v3873_v13 = vadd.f32 %v6503_v37, %v3733_v9  ;;  %v3668_v9 = vld [vmem:[#allocation2 + $0x120] sm:$0xff] }
 0x381   : > { %4224 = vmatprep.mubr.f32.mxu0 %v3988_v56  ;;  %4384 = vmatprep.mubr.f32.mxu1 %v4052_v30  ;;  %v3993_v56 = vmax.f32 %v3865_v6, 0.0  ;;  %v3931_v30 = vadd.f32 %v6503_v37, %v3791_v62  ;;  %v3598_v6 = vld [vmem:[#allocation2 + $0x168] sm:$0xff]  ;;  %v3799_v62 = vmul.f32 %v6487_v10, %v3659_v16 }
 0x382   : > { %v3870_v47 = vadd.f32 %v6495_v14, %v3730_v63  ;;  %v3934_v46 = vadd.f32 %v6495_v14, %v3794_v39  ;;  %v3738_v12 = vmul.f32 %v6483_v20, %v3598_v6  ;;  %v3597_v63 = vld [vmem:[#allocation2 + $0x1b8] sm:$0xff] }
 0x383   : > { %v4059_v36 = vmax.f32 %v3931_v30, 0.0  ;;  %v3939_v30 = vadd.f32 %v6503_v37, %v3799_v62  ;;  %v3670_v62 = vld [vmem:[#allocation2 + $0x2e8] sm:$0xff] }
 0x384   : > { %4225 = vmatmul.mubr.f32.gmra.mxu0 %v3987_v32  ;;  %4385 = vmatmul.mubr.f32.gmra.mxu1 %v4051_v53  ;;  %v3796_v32 = vmul.f32 %v6483_v20, %v3656_v43  ;;  %v3995_v53 = vmax.f32 %v3867_v23, 0.0  ;;  %v3998_v24 = vmax.f32 %v3870_v47, 0.0  ;;  %v4062_v54 = vmax.f32 %v3934_v46, 0.0  ;;  %v3661_v23 = vld [vmem:[#allocation2 + $0x3d8] sm:$0xff] }
 0x385   : > { %4229 = vmatprep.mubr.f32.mxu0 %v3990_v42  ;;  %4389 = vmatprep.mubr.f32.mxu1 %v4054_v52  ;;  %v3869_v42 = vadd.f32 %v6503_v37, %v3729_v58  ;;  %v3872_v52 = vadd.f32 %v6495_v14, %v3732_v49  ;;  %v3600_v58 = vld [vmem:[#allocation2 + $0x2f8] sm:$0xff]  ;;  %v3737_v49 = vmul.f32 %v6487_v10, %v3597_v63 }
 0x386   : > { %v3936_v29 = vadd.f32 %v6495_v14, %v3796_v32  ;;  %v3801_v47 = vmul.f32 %v6487_v10, %v3661_v23  ;;  %v3740_v46 = vmul.f32 %v6483_v20, %v3600_v58  ;;  %v3599_v32 = vld [vmem:[#allocation2 + $0x3e8] sm:$0xff] }
 0x387   : > { %v4000_v15 = vmax.f32 %v3872_v52, 0.0  ;;  %v4067_v52 = vmax.f32 %v3939_v30, 0.0  ;;  %v3608_v30 = vld [vmem:[#allocation2 + $0x3c0] sm:$0xff] }
 0x388   : > { %4230 = vmatmul.mubr.f32.gmra.mxu0 %v3989_v57  ;;  %4390 = vmatmul.mubr.f32.gmra.mxu1 %v4053_v11  ;;  %v3798_v57 = vmul.f32 %v6483_v20, %v3658_v40  ;;  %v3997_v11 = vmax.f32 %v3869_v42, 0.0  ;;  %v4064_v59 = vmax.f32 %v3936_v29, 0.0  ;;  %v3663_v42 = vld [vmem:[#allocation2 + $0x1b0] sm:$0xff] }
 0x389   : > { %4234 = vmatprep.mubr.f32.mxu0 %v3992_v0  ;;  %4394 = vmatprep.mubr.f32.mxu1 %v4056_v61  ;;  %v3935_v0 = vadd.f32 %v6503_v37, %v3795_v22  ;;  %v3874_v61 = vadd.f32 %v6495_v14, %v3734_v38  ;;  %v3877_v22 = vadd.f32 %v6503_v37, %v3737_v49  ;;  %v3672_v49 = vld [vmem:[#allocation2 + $0x238] sm:$0xff] }
 0x38a   : > { %v3938_v19 = vadd.f32 %v6495_v14, %v3798_v57  ;;  %v3739_v38 = vmul.f32 %v6487_v10, %v3599_v32  ;;  %v3803_v29 = vmul.f32 %v6487_v10, %v3663_v42  ;;  %v3601_v57 = vld [vmem:[#allocation2 + $0x290] sm:$0xff]  ;;  %v3671_v42 = vld [vmem:[#allocation2 + $0x1f8] sm:$0xff] }
 0x38b   : > { %v4063_v35 = vmax.f32 %v3935_v0, 0.0  ;;  %v4002_v1 = vmax.f32 %v3874_v61, 0.0  ;;  %v3741_v61 = vmul.f32 %v6487_v10, %v3601_v57 }
 0x38c   : > { %4235 = vmatmul.mubr.f32.gmra.mxu0 %v3991_v45  ;;  %4395 = vmatmul.mubr.f32.gmra.mxu1 %v4055_v41  ;;  %v3736_v45 = vmul.f32 %v6483_v20, %v3596_v55  ;;  %v3800_v41 = vmul.f32 %v6483_v20, %v3660_v60  ;;  %v4066_v39 = vmax.f32 %v3938_v19, 0.0  ;;  %v3879_v0 = vadd.f32 %v6503_v37, %v3739_v38  ;;  %v3674_v38 = vld [vmem:[#allocation2 + $0x390] sm:$0xff] }
 0x38d   : > { %4239 = vmatprep.mubr.f32.mxu0 %v3994_v31  ;;  %4399 = vmatprep.mubr.f32.mxu1 %v4058_v17  ;;  %v3999_v31 = vmax.f32 %v3871_v18, 0.0  ;;  %v3937_v17 = vadd.f32 %v6503_v37, %v3797_v4  ;;  %v3604_v18 = vld [vmem:[#allocation2 + $0xc0] sm:$0xff]  ;;  %v3805_v4 = vmul.f32 %v6487_v10, %v3665_v28 }
 0x38e   : > { %v3876_v33 = vadd.f32 %v6495_v14, %v3736_v45  ;;  %v3940_v43 = vadd.f32 %v6495_v14, %v3800_v41  ;;  %v3744_v19 = vmul.f32 %v6483_v20, %v3604_v18  ;;  %v3603_v45 = vld [vmem:[#allocation2 + $0x138] sm:$0xff] }
 0x38f   : > { %v4065_v26 = vmax.f32 %v3937_v17, 0.0  ;;  %v3945_v17 = vadd.f32 %v6503_v37, %v3805_v4  ;;  %v3676_v4 = vld [vmem:[#allocation2 + $0xa8] sm:$0xff] }
 0x390   : > { %4240 = vmatmul.mubr.f32.gmra.mxu0 %v3993_v56  ;;  %4400 = vmatmul.mubr.f32.gmra.mxu1 %v4057_v3  ;;  %v3802_v56 = vmul.f32 %v6483_v20, %v3662_v2  ;;  %v4001_v3 = vmax.f32 %v3873_v13, 0.0  ;;  %v4004_v44 = vmax.f32 %v3876_v33, 0.0  ;;  %v4068_v27 = vmax.f32 %v3940_v43, 0.0  ;;  %v3667_v13 = vld [vmem:[#allocation2 + $0x58] sm:$0xff] }
 0x391   : > { %4244 = vmatprep.mubr.f32.mxu0 %v3996_v34  ;;  %4404 = vmatprep.mubr.f32.mxu1 %v4060_v8  ;;  %v3875_v34 = vadd.f32 %v6503_v37, %v3735_v5  ;;  %v3878_v8 = vadd.f32 %v6495_v14, %v3738_v12  ;;  %v3606_v5 = vld [vmem:[#allocation2 + $0x280] sm:$0xff]  ;;  %v3743_v12 = vmul.f32 %v6487_v10, %v3603_v45 }
 0x392   : > { %v3942_v40 = vadd.f32 %v6495_v14, %v3802_v56  ;;  %v3807_v33 = vmul.f32 %v6487_v10, %v3667_v13  ;;  %v3746_v43 = vmul.f32 %v6483_v20, %v3606_v5  ;;  %v3605_v56 = vld [vmem:[#allocation2 + $0x1c0] sm:$0xff] }
 0x393   : > { %v4006_v21 = vmax.f32 %v3878_v8, 0.0  ;;  %v4073_v8 = vmax.f32 %v3945_v17, 0.0  ;;  %v3614_v17 = vld [vmem:[#allocation2 + $0x128] sm:$0xff] }
 0x394   : > { %4245 = vmatmul.mubr.f32.gmra.mxu0 %v3995_v53  ;;  %4405 = vmatmul.mubr.f32.gmra.mxu1 %v4059_v36  ;;  %v3804_v53 = vmul.f32 %v6483_v20, %v3664_v25  ;;  %v4003_v36 = vmax.f32 %v3875_v34, 0.0  ;;  %v4070_v55 = vmax.f32 %v3942_v40, 0.0  ;;  %v3669_v34 = vld [vmem:[#allocation2 + $0x198] sm:$0xff] }
 0x395   : > { %4249 = vmatprep.mubr.f32.mxu0 %v3998_v24  ;;  %4409 = vmatprep.mubr.f32.mxu1 %v4062_v54  ;;  %v3941_v24 = vadd.f32 %v6503_v37, %v3801_v47  ;;  %v3880_v54 = vadd.f32 %v6495_v14, %v3740_v46  ;;  %v3883_v47 = vadd.f32 %v6503_v37, %v3743_v12  ;;  %v3678_v12 = vld [vmem:[#allocation2 + $0x2d8] sm:$0xff] }
 0x396   : > { %v3944_v60 = vadd.f32 %v6495_v14, %v3804_v53  ;;  %v3745_v46 = vmul.f32 %v6487_v10, %v3605_v56  ;;  %v3809_v40 = vmul.f32 %v6487_v10, %v3669_v34  ;;  %v3607_v53 = vld [vmem:[#allocation2 + $0x100] sm:$0xff]  ;;  %v3677_v34 = vld [vmem:[#allocation2 + $0x258] sm:$0xff] }
 0x397   : > { %v4069_v50 = vmax.f32 %v3941_v24, 0.0  ;;  %v4008_v16 = vmax.f32 %v3880_v54, 0.0  ;;  %v3747_v54 = vmul.f32 %v6487_v10, %v3607_v53 }
 0x398   : > { %4250 = vmatmul.mubr.f32.gmra.mxu0 %v3997_v11  ;;  %4410 = vmatmul.mubr.f32.gmra.mxu1 %v4061_v7  ;;  %v3742_v11 = vmul.f32 %v6483_v20, %v3602_v51  ;;  %v3806_v7 = vmul.f32 %v6483_v20, %v3666_v48  ;;  %v4072_v41 = vmax.f32 %v3944_v60, 0.0  ;;  %v3885_v24 = vadd.f32 %v6503_v37, %v3745_v46  ;;  %v3680_v46 = vld [vmem:[#allocation2 + $0x180] sm:$0xff] }
 0x399   : > { %4254 = vmatprep.mubr.f32.mxu0 %v4000_v15  ;;  %4414 = vmatprep.mubr.f32.mxu1 %v4064_v59  ;;  %v4005_v15 = vmax.f32 %v3877_v22, 0.0  ;;  %v3943_v59 = vadd.f32 %v6503_v37, %v3803_v29  ;;  %v3610_v22 = vld [vmem:[#allocation2 + $0x3e0] sm:$0xff]  ;;  %v3811_v29 = vmul.f32 %v6487_v10, %v3671_v42 }
 0x39a   : > { %v3882_v6 = vadd.f32 %v6495_v14, %v3742_v11  ;;  %v3946_v2 = vadd.f32 %v6495_v14, %v3806_v7  ;;  %v3750_v60 = vmul.f32 %v6483_v20, %v3610_v22  ;;  %v3609_v11 = vld [vmem:[#allocation2 + $0x158] sm:$0xff] }
 0x39b   : > { %v4071_v63 = vmax.f32 %v3943_v59, 0.0  ;;  %v3951_v59 = vadd.f32 %v6503_v37, %v3811_v29  ;;  %v3682_v29 = vld [vmem:[#allocation2 + $0x3d0] sm:$0xff] }
 0x39c   : > { %4255 = vmatmul.mubr.f32.gmra.mxu0 %v3999_v31  ;;  %4415 = vmatmul.mubr.f32.gmra.mxu1 %v4063_v35  ;;  %v3808_v31 = vmul.f32 %v6483_v20, %v3668_v9  ;;  %v4007_v35 = vmax.f32 %v3879_v0, 0.0  ;;  %v4010_v23 = vmax.f32 %v3882_v6, 0.0  ;;  %v4074_v58 = vmax.f32 %v3946_v2, 0.0  ;;  %v3673_v0 = vld [vmem:[#allocation2 + $0x398] sm:$0xff] }
 0x39d   : > { %4259 = vmatprep.mubr.f32.mxu0 %v4002_v1  ;;  %4419 = vmatprep.mubr.f32.mxu1 %v4066_v39  ;;  %v3881_v1 = vadd.f32 %v6503_v37, %v3741_v61  ;;  %v3884_v39 = vadd.f32 %v6495_v14, %v3744_v19  ;;  %v3612_v61 = vld [vmem:[#allocation2 + $0x3f8] sm:$0xff]  ;;  %v3749_v19 = vmul.f32 %v6487_v10, %v3609_v11 }
 0x39e   : > { %v3948_v25 = vadd.f32 %v6495_v14, %v3808_v31  ;;  %v3813_v6 = vmul.f32 %v6487_v10, %v3673_v0  ;;  %v3752_v2 = vmul.f32 %v6483_v20, %v3612_v61  ;;  %v3611_v31 = vld [vmem:[#allocation2 + $0x218] sm:$0xff] }
 0x39f   : > { %v4012_v32 = vmax.f32 %v3884_v39, 0.0  ;;  %v4079_v39 = vmax.f32 %v3951_v59, 0.0  ;;  %v3620_v59 = vld [vmem:[#allocation2 + $0x1e0] sm:$0xff] }
 0x3a0   : > { %4260 = vmatmul.mubr.f32.gmra.mxu0 %v4001_v3  ;;  %4420 = vmatmul.mubr.f32.gmra.mxu1 %v4065_v26  ;;  %v3810_v3 = vmul.f32 %v6483_v20, %v3670_v62  ;;  %v4009_v26 = vmax.f32 %v3881_v1, 0.0  ;;  %v4076_v51 = vmax.f32 %v3948_v25, 0.0  ;;  %v3675_v1 = vld [vmem:[#allocation2 + $0x1a0] sm:$0xff] }
 0x3a1   : > { %4264 = vmatprep.mubr.f32.mxu0 %v4004_v44  ;;  %4424 = vmatprep.mubr.f32.mxu1 %v4068_v27  ;;  %v3947_v44 = vadd.f32 %v6503_v37, %v3807_v33  ;;  %v3886_v27 = vadd.f32 %v6495_v14, %v3746_v43  ;;  %v3889_v33 = vadd.f32 %v6503_v37, %v3749_v19  ;;  %v3684_v19 = vld [vmem:[#allocation2 + $0x378] sm:$0xff] }
 0x3a2   : > { %v3950_v48 = vadd.f32 %v6495_v14, %v3810_v3  ;;  %v3751_v43 = vmul.f32 %v6487_v10, %v3611_v31  ;;  %v3815_v25 = vmul.f32 %v6487_v10, %v3675_v1  ;;  %v3613_v3 = vld [vmem:[#allocation2 + $0x8] sm:$0xff]  ;;  %v3683_v1 = vld [vmem:[#allocation2 + $0x250] sm:$0xff] }
 0x3a3   : > { %v4075_v57 = vmax.f32 %v3947_v44, 0.0  ;;  %v4014_v28 = vmax.f32 %v3886_v27, 0.0  ;;  %v3753_v27 = vmul.f32 %v6487_v10, %v3613_v3 }
 0x3a4   : > { %4265 = vmatmul.mubr.f32.gmra.mxu0 %v4003_v36  ;;  %4425 = vmatmul.mubr.f32.gmra.mxu1 %v4067_v52  ;;  %v3748_v36 = vmul.f32 %v6483_v20, %v3608_v30  ;;  %v3812_v52 = vmul.f32 %v6483_v20, %v3672_v49  ;;  %v4078_v7 = vmax.f32 %v3950_v48, 0.0  ;;  %v3891_v44 = vadd.f32 %v6503_v37, %v3751_v43  ;;  %v3686_v43 = vld [vmem:[#allocation2 + $0x38] sm:$0xff] }
 0x3a5   : > { %4269 = vmatprep.mubr.f32.mxu0 %v4006_v21  ;;  %4429 = vmatprep.mubr.f32.mxu1 %v4070_v55  ;;  %v4011_v21 = vmax.f32 %v3883_v47, 0.0  ;;  %v3949_v55 = vadd.f32 %v6503_v37, %v3809_v40  ;;  %v3616_v47 = vld [vmem:[#allocation2 + $0x3f0] sm:$0xff]  ;;  %v3817_v40 = vmul.f32 %v6487_v10, %v3677_v34 }
 0x3a6   : > { %v3888_v18 = vadd.f32 %v6495_v14, %v3748_v36  ;;  %v3952_v9 = vadd.f32 %v6495_v14, %v3812_v52  ;;  %v3756_v48 = vmul.f32 %v6483_v20, %v3616_v47  ;;  %v3615_v36 = vld [vmem:[#allocation2 + $0x2a0] sm:$0xff] }
 0x3a7   : > { %v4077_v45 = vmax.f32 %v3949_v55, 0.0  ;;  %v3957_v55 = vadd.f32 %v6503_v37, %v3817_v40  ;;  %v3688_v40 = vld [vmem:[#allocation2 + $0x308] sm:$0xff] }
 0x3a8   : > { %4270 = vmatmul.mubr.f32.gmra.mxu0 %v4005_v15  ;;  %4430 = vmatmul.mubr.f32.gmra.mxu1 %v4069_v50  ;;  %v3814_v15 = vmul.f32 %v6483_v20, %v3674_v38  ;;  %v4013_v50 = vmax.f32 %v3885_v24, 0.0  ;;  %v4016_v13 = vmax.f32 %v3888_v18, 0.0  ;;  %v4080_v5 = vmax.f32 %v3952_v9, 0.0  ;;  %v3679_v24 = vld [vmem:[#allocation2 + $0xf0] sm:$0xff] }
 0x3a9   : > { %4274 = vmatprep.mubr.f32.mxu0 %v4008_v16  ;;  %4434 = vmatprep.mubr.f32.mxu1 %v4072_v41  ;;  %v3887_v16 = vadd.f32 %v6503_v37, %v3747_v54  ;;  %v3890_v41 = vadd.f32 %v6495_v14, %v3750_v60  ;;  %v3618_v54 = vld [vmem:[#allocation2 + $0x2c0] sm:$0xff]  ;;  %v3755_v60 = vmul.f32 %v6487_v10, %v3615_v36 }
 0x3aa   : > { %v3954_v62 = vadd.f32 %v6495_v14, %v3814_v15  ;;  %v3819_v18 = vmul.f32 %v6487_v10, %v3679_v24  ;;  %v3758_v9 = vmul.f32 %v6483_v20, %v3618_v54  ;;  %v3617_v15 = vld [vmem:[#allocation2 + $0xa0] sm:$0xff] }
 0x3ab   : > { %v4018_v56 = vmax.f32 %v3890_v41, 0.0  ;;  %v4085_v41 = vmax.f32 %v3957_v55, 0.0  ;;  %v3626_v55 = vld [vmem:[#allocation2 + $0x3a0] sm:$0xff] }
 0x3ac   : > { %4275 = vmatmul.mubr.f32.gmra.mxu0 %v4007_v35  ;;  %4435 = vmatmul.mubr.f32.gmra.mxu1 %v4071_v63  ;;  %v3816_v35 = vmul.f32 %v6483_v20, %v3676_v4  ;;  %v4015_v63 = vmax.f32 %v3887_v16, 0.0  ;;  %v4082_v30 = vmax.f32 %v3954_v62, 0.0  ;;  %v3681_v16 = vld [vmem:[#allocation2 + $0x170] sm:$0xff] }
 0x3ad   : > { %4279 = vmatprep.mubr.f32.mxu0 %v4010_v23  ;;  %4439 = vmatprep.mubr.f32.mxu1 %v4074_v58  ;;  %v3953_v23 = vadd.f32 %v6503_v37, %v3813_v6  ;;  %v3892_v58 = vadd.f32 %v6495_v14, %v3752_v2  ;;  %v3895_v6 = vadd.f32 %v6503_v37, %v3755_v60  ;;  %v3690_v60 = vld [vmem:[#allocation2 + $0xc8] sm:$0xff] }
 0x3ae   : > { %v3956_v49 = vadd.f32 %v6495_v14, %v3816_v35  ;;  %v3757_v2 = vmul.f32 %v6487_v10, %v3617_v15  ;;  %v3821_v62 = vmul.f32 %v6487_v10, %v3681_v16  ;;  %v3619_v35 = vld [vmem:[#allocation2 + $0xb0] sm:$0xff] }
 0x3af   : > { %v4081_v53 = vmax.f32 %v3953_v23, 0.0  ;;  %v4020_v42 = vmax.f32 %v3892_v58, 0.0  ;;  %v3759_v58 = vmul.f32 %v6487_v10, %v3619_v35  ;;  %v3689_v16 = vld [vmem:[#allocation2 + $0x370] sm:$0xff] }
 0x3b0   : > { %4280 = vmatmul.mubr.f32.gmra.mxu0 %v4009_v26  ;;  %4440 = vmatmul.mubr.f32.gmra.mxu1 %v4073_v8  ;;  %v3754_v26 = vmul.f32 %v6483_v20, %v3614_v17  ;;  %v3818_v8 = vmul.f32 %v6483_v20, %v3678_v12  ;;  %v4084_v52 = vmax.f32 %v3956_v49, 0.0  ;;  %v3897_v23 = vadd.f32 %v6503_v37, %v3757_v2  ;;  %v3692_v2 = vld [vmem:[#allocation2 + $0x360] sm:$0xff] }
 0x3b1   : > { %4284 = vmatprep.mubr.f32.mxu0 %v4012_v32  ;;  %4444 = vmatprep.mubr.f32.mxu1 %v4076_v51  ;;  %v4017_v32 = vmax.f32 %v3889_v33, 0.0  ;;  %v3955_v51 = vadd.f32 %v6503_v37, %v3815_v25  ;;  %v3622_v33 = vld [vmem:[#allocation2 + $0x10] sm:$0xff]  ;;  %v3823_v25 = vmul.f32 %v6487_v10, %v3683_v1 }
 0x3b2   : > { %v3894_v22 = vadd.f32 %v6495_v14, %v3754_v26  ;;  %v3958_v38 = vadd.f32 %v6495_v14, %v3818_v8  ;;  %v3762_v49 = vmul.f32 %v6483_v20, %v3622_v33  ;;  %v3621_v26 = vld [vmem:[#allocation2 + $0x1f0] sm:$0xff] }
 0x3b3   : > { %v4083_v11 = vmax.f32 %v3955_v51, 0.0  ;;  %v3963_v51 = vadd.f32 %v6503_v37, %v3823_v25  ;;  %v3694_v25 = vld [vmem:[#allocation2 + $0x348] sm:$0xff] }
 0x3b4   : > { %4285 = vmatmul.mubr.f32.gmra.mxu0 %v4011_v21  ;;  %4445 = vmatmul.mubr.f32.gmra.mxu1 %v4075_v57  ;;  %v3820_v21 = vmul.f32 %v6483_v20, %v3680_v46  ;;  %v4019_v57 = vmax.f32 %v3891_v44, 0.0  ;;  %v4022_v0 = vmax.f32 %v3894_v22, 0.0  ;;  %v4086_v61 = vmax.f32 %v3958_v38, 0.0  ;;  %v3685_v44 = vld [vmem:[#allocation2 + $0xb8] sm:$0xff] }
 0x3b5   : > { %4289 = vmatprep.mubr.f32.mxu0 %v4014_v28  ;;  %4449 = vmatprep.mubr.f32.mxu1 %v4078_v7  ;;  %v3893_v28 = vadd.f32 %v6503_v37, %v3753_v27  ;;  %v3896_v7 = vadd.f32 %v6495_v14, %v3756_v48  ;;  %v3624_v27 = vld [vmem:[#allocation2 + $0x240] sm:$0xff]  ;;  %v3761_v48 = vmul.f32 %v6487_v10, %v3621_v26 }
 0x3b6   : > { %v3960_v4 = vadd.f32 %v6495_v14, %v3820_v21  ;;  %v3825_v22 = vmul.f32 %v6487_v10, %v3685_v44  ;;  %v3764_v38 = vmul.f32 %v6483_v20, %v3624_v27  ;;  %v3623_v21 = vld [vmem:[#allocation2 + $0x230] sm:$0xff] }
 0x3b7   : > { %v4024_v31 = vmax.f32 %v3896_v7, 0.0  ;;  %v4091_v7 = vmax.f32 %v3963_v51, 0.0  ;;  %v3632_v51 = vld [vmem:[#allocation2 + $0x268] sm:$0xff] }
 0x3b8   : > { %4290 = vmatmul.mubr.f32.gmra.mxu0 %v4013_v50  ;;  %4450 = vmatmul.mubr.f32.gmra.mxu1 %v4077_v45  ;;  %v3822_v50 = vmul.f32 %v6483_v20, %v3682_v29  ;;  %v4021_v45 = vmax.f32 %v3893_v28, 0.0  ;;  %v4088_v17 = vmax.f32 %v3960_v4, 0.0  ;;  %v3687_v28 = vld [vmem:[#allocation2 + $0x78] sm:$0xff] }
 0x3b9   : > { %4294 = vmatprep.mubr.f32.mxu0 %v4016_v13  ;;  %4454 = vmatprep.mubr.f32.mxu1 %v4080_v5  ;;  %v3959_v13 = vadd.f32 %v6503_v37, %v3819_v18  ;;  %v3898_v5 = vadd.f32 %v6495_v14, %v3758_v9  ;;  %v3901_v18 = vadd.f32 %v6503_v37, %v3761_v48  ;;  %v3696_v48 = vld [vmem:[#allocation2 + $0xf8] sm:$0xff] }
 0x3ba   : > { %v3962_v12 = vadd.f32 %v6495_v14, %v3822_v50  ;;  %v3763_v9 = vmul.f32 %v6487_v10, %v3623_v21  ;;  %v3827_v4 = vmul.f32 %v6487_v10, %v3687_v28  ;;  %v3625_v50 = vld [vmem:[#allocation2 + $0x90] sm:$0xff]  ;;  %v3695_v28 = vld [vmem:[#allocation2 + $0x148] sm:$0xff] }
 0x3bb   : > { %v4087_v3 = vmax.f32 %v3959_v13, 0.0  ;;  %v4026_v34 = vmax.f32 %v3898_v5, 0.0  ;;  %v3765_v5 = vmul.f32 %v6487_v10, %v3625_v50 }
 0x3bc   : > { %4295 = vmatmul.mubr.f32.gmra.mxu0 %v4015_v63  ;;  %4455 = vmatmul.mubr.f32.gmra.mxu1 %v4079_v39  ;;  %v3760_v63 = vmul.f32 %v6483_v20, %v3620_v59  ;;  %v3824_v39 = vmul.f32 %v6483_v20, %v3684_v19  ;;  %v4090_v8 = vmax.f32 %v3962_v12, 0.0  ;;  %v3903_v13 = vadd.f32 %v6503_v37, %v3763_v9  ;;  %v3698_v9 = vld [vmem:[#allocation2] sm:$0xff] }
 0x3bd   : > { %4299 = vmatprep.mubr.f32.mxu0 %v4018_v56  ;;  %4459 = vmatprep.mubr.f32.mxu1 %v4082_v30  ;;  %v4023_v56 = vmax.f32 %v3895_v6, 0.0  ;;  %v3961_v30 = vadd.f32 %v6503_v37, %v3821_v62  ;;  %v3628_v6 = vld [vmem:[#allocation2 + $0xd0] sm:$0xff]  ;;  %v3829_v62 = vmul.f32 %v6487_v10, %v3689_v16 }
 0x3be   : > { %v3900_v47 = vadd.f32 %v6495_v14, %v3760_v63  ;;  %v3964_v46 = vadd.f32 %v6495_v14, %v3824_v39  ;;  %v3768_v12 = vmul.f32 %v6483_v20, %v3628_v6  ;;  %v3627_v63 = vld [vmem:[#allocation2 + $0x208] sm:$0xff] }
 0x3bf   : > { %v4089_v36 = vmax.f32 %v3961_v30, 0.0  ;;  %v3969_v30 = vadd.f32 %v6503_v37, %v3829_v62  ;;  %v3700_v62 = vld [vmem:[#allocation2 + $0x270] sm:$0xff] }
 0x3c0   : > { %4300 = vmatmul.mubr.f32.gmra.mxu0 %v4017_v32  ;;  %4460 = vmatmul.mubr.f32.gmra.mxu1 %v4081_v53  ;;  %v3826_v32 = vmul.f32 %v6483_v20, %v3686_v43  ;;  %v4025_v53 = vmax.f32 %v3897_v23, 0.0  ;;  %v4028_v24 = vmax.f32 %v3900_v47, 0.0  ;;  %v4092_v54 = vmax.f32 %v3964_v46, 0.0  ;;  %v3691_v23 = vld [vmem:[#allocation2 + $0x278] sm:$0xff] }
 0x3c1   : > { %4304 = vmatprep.mubr.f32.mxu0 %v4020_v42  ;;  %4464 = vmatprep.mubr.f32.mxu1 %v4084_v52  ;;  %v3899_v42 = vadd.f32 %v6503_v37, %v3759_v58  ;;  %v3902_v52 = vadd.f32 %v6495_v14, %v3762_v49  ;;  %v3630_v58 = vld [vmem:[#allocation2 + $0x2f0] sm:$0xff]  ;;  %v3767_v49 = vmul.f32 %v6487_v10, %v3627_v63 }
 0x3c2   : > { %v3966_v29 = vadd.f32 %v6495_v14, %v3826_v32  ;;  %v3831_v47 = vmul.f32 %v6487_v10, %v3691_v23  ;;  %v3770_v46 = vmul.f32 %v6483_v20, %v3630_v58  ;;  %v3629_v32 = vld [vmem:[#allocation2 + $0x88] sm:$0xff] }
 0x3c3   : > { %v4030_v15 = vmax.f32 %v3902_v52, 0.0  ;;  %v4097_v52 = vmax.f32 %v3969_v30, 0.0  ;;  %v3638_v30 = vld [vmem:[#allocation2 + $0x2a8] sm:$0xff] }
 0x3c4   : > { %4305 = vmatmul.mubr.f32.gmra.mxu0 %v4019_v57  ;;  %4465 = vmatmul.mubr.f32.gmra.mxu1 %v4083_v11  ;;  %v3828_v57 = vmul.f32 %v6483_v20, %v3688_v40  ;;  %v4027_v11 = vmax.f32 %v3899_v42, 0.0  ;;  %v4094_v59 = vmax.f32 %v3966_v29, 0.0  ;;  %v3693_v42 = vld [vmem:[#allocation2 + $0x228] sm:$0xff] }
 0x3c5   : > { %4309 = vmatprep.mubr.f32.mxu0 %v4022_v0  ;;  %4469 = vmatprep.mubr.f32.mxu1 %v4086_v61  ;;  %v3965_v0 = vadd.f32 %v6503_v37, %v3825_v22  ;;  %v3904_v61 = vadd.f32 %v6495_v14, %v3764_v38  ;;  %v3907_v22 = vadd.f32 %v6503_v37, %v3767_v49  ;;  %v3702_v49 = vld [vmem:[#allocation2 + $0x190] sm:$0xff] }
 0x3c6   : > { %v3968_v19 = vadd.f32 %v6495_v14, %v3828_v57  ;;  %v3769_v38 = vmul.f32 %v6487_v10, %v3629_v32  ;;  %v3833_v29 = vmul.f32 %v6487_v10, %v3693_v42  ;;  %v3631_v57 = vld [vmem:[#allocation2 + $0x358] sm:$0xff] }
 0x3c7   : > { %v4093_v35 = vmax.f32 %v3965_v0, 0.0  ;;  %v4032_v1 = vmax.f32 %v3904_v61, 0.0  ;;  %v3771_v61 = vmul.f32 %v6487_v10, %v3631_v57 }
 0x3c8   : > { %4310 = vmatmul.mubr.f32.gmra.mxu0 %v4021_v45  ;;  %4470 = vmatmul.mubr.f32.gmra.mxu1 %v4085_v41  ;;  %v3766_v45 = vmul.f32 %v6483_v20, %v3626_v55  ;;  %v3830_v41 = vmul.f32 %v6483_v20, %v3690_v60  ;;  %v4096_v39 = vmax.f32 %v3968_v19, 0.0  ;;  %v3909_v0 = vadd.f32 %v6503_v37, %v3769_v38 }
 0x3c9   : > { %4314 = vmatprep.mubr.f32.mxu0 %v4024_v31  ;;  %4474 = vmatprep.mubr.f32.mxu1 %v4088_v17  ;;  %v4029_v31 = vmax.f32 %v3901_v18, 0.0  ;;  %v3967_v17 = vadd.f32 %v6503_v37, %v3827_v4  ;;  %v3634_v18 = vld [vmem:[#allocation2 + $0x188] sm:$0xff]  ;;  %v3835_v4 = vmul.f32 %v6487_v10, %v3695_v28 }
 0x3ca   : > { %v3906_v33 = vadd.f32 %v6495_v14, %v3766_v45  ;;  %v3970_v43 = vadd.f32 %v6495_v14, %v3830_v41  ;;  %v3774_v19 = vmul.f32 %v6483_v20, %v3634_v18  ;;  %v3633_v45 = vld [vmem:[#allocation2 + $0x350] sm:$0xff] }
 0x3cb   : > { %v4095_v26 = vmax.f32 %v3967_v17, 0.0  ;;  %v3975_v17 = vadd.f32 %v6503_v37, %v3835_v4 }
 0x3cc   : > { %4315 = vmatmul.mubr.f32.gmra.mxu0 %v4023_v56  ;;  %4475 = vmatmul.mubr.f32.gmra.mxu1 %v4087_v3  ;;  %v3832_v56 = vmul.f32 %v6483_v20, %v3692_v2  ;;  %v4031_v3 = vmax.f32 %v3903_v13, 0.0  ;;  %v4034_v44 = vmax.f32 %v3906_v33, 0.0  ;;  %v4098_v27 = vmax.f32 %v3970_v43, 0.0  ;;  %v3697_v13 = vld [vmem:[#allocation2 + $0x68] sm:$0xff] }
 0x3cd   : > { %4319 = vmatprep.mubr.f32.mxu0 %v4026_v34  ;;  %4479 = vmatprep.mubr.f32.mxu1 %v4090_v8  ;;  %v3905_v34 = vadd.f32 %v6503_v37, %v3765_v5  ;;  %v3908_v8 = vadd.f32 %v6495_v14, %v3768_v12  ;;  %v3636_v5 = vld [vmem:[#allocation2 + $0x30] sm:$0xff]  ;;  %v3773_v12 = vmul.f32 %v6487_v10, %v3633_v45 }
 0x3ce   : > { %v3972_v40 = vadd.f32 %v6495_v14, %v3832_v56  ;;  %v3837_v33 = vmul.f32 %v6487_v10, %v3697_v13  ;;  %v3776_v43 = vmul.f32 %v6483_v20, %v3636_v5  ;;  %v3635_v56 = vld [vmem:[#allocation2 + $0x1d8] sm:$0xff] }
 0x3cf   : > { %v4036_v21 = vmax.f32 %v3908_v8, 0.0  ;;  %v4103_v8 = vmax.f32 %v3975_v17, 0.0 }
 0x3d0   : > { %4320 = vmatmul.mubr.f32.gmra.mxu0 %v4025_v53  ;;  %4480 = vmatmul.mubr.f32.gmra.mxu1 %v4089_v36  ;;  %v3834_v53 = vmul.f32 %v6483_v20, %v3694_v25  ;;  %v4033_v36 = vmax.f32 %v3905_v34, 0.0  ;;  %v4100_v55 = vmax.f32 %v3972_v40, 0.0  ;;  %v3699_v34 = vld [vmem:[#allocation2 + $0x298] sm:$0xff] }
 0x3d1   : > { %4324 = vmatprep.mubr.f32.mxu0 %v4028_v24  ;;  %4484 = vmatprep.mubr.f32.mxu1 %v4092_v54  ;;  %v3971_v24 = vadd.f32 %v6503_v37, %v3831_v47  ;;  %v3910_v54 = vadd.f32 %v6495_v14, %v3770_v46  ;;  %v3913_v47 = vadd.f32 %v6503_v37, %v3773_v12 }
 0x3d2   : > { %v3974_v60 = vadd.f32 %v6495_v14, %v3834_v53  ;;  %v3775_v46 = vmul.f32 %v6487_v10, %v3635_v56  ;;  %v3839_v40 = vmul.f32 %v6487_v10, %v3699_v34 }
 0x3d3   : > { %v4099_v50 = vmax.f32 %v3971_v24, 0.0  ;;  %v4038_v16 = vmax.f32 %v3910_v54, 0.0 }
 0x3d4   : > { %4325 = vmatmul.mubr.f32.gmra.mxu0 %v4027_v11  ;;  %4485 = vmatmul.mubr.f32.gmra.mxu1 %v4091_v7  ;;  %v3772_v11 = vmul.f32 %v6483_v20, %v3632_v51  ;;  %v3836_v7 = vmul.f32 %v6483_v20, %v3696_v48  ;;  %v4102_v41 = vmax.f32 %v3974_v60, 0.0  ;;  %v3778_v51 = vmul.f32 %v6483_v20, %v3638_v30 }
 0x3d5   : > { %4329 = vmatprep.mubr.f32.mxu0 %v4030_v15  ;;  %4489 = vmatprep.mubr.f32.mxu1 %v4094_v59  ;;  %v4035_v15 = vmax.f32 %v3907_v22, 0.0  ;;  %v3973_v59 = vadd.f32 %v6503_v37, %v3833_v29  ;;  %v3842_v48 = vmul.f32 %v6483_v20, %v3702_v49  ;;  %v4041_v22 = vmax.f32 %v3913_v47, 0.0 }
 0x3d6   : > { %v3912_v6 = vadd.f32 %v6495_v14, %v3772_v11  ;;  %v3976_v2 = vadd.f32 %v6495_v14, %v3836_v7  ;;  %v3915_v38 = vadd.f32 %v6503_v37, %v3775_v46  ;;  %v3979_v24 = vadd.f32 %v6503_v37, %v3839_v40 }
 0x3d7   : > { %v4101_v63 = vmax.f32 %v3973_v59, 0.0 }
 0x3d8   : > { %4330 = vmatmul.mubr.f32.gmra.mxu0 %v4029_v31  ;;  %4490 = vmatmul.mubr.f32.gmra.mxu1 %v4093_v35  ;;  %v3838_v31 = vmul.f32 %v6483_v20, %v3698_v9  ;;  %v4037_v35 = vmax.f32 %v3909_v0, 0.0  ;;  %v4040_v23 = vmax.f32 %v3912_v6, 0.0  ;;  %v4104_v58 = vmax.f32 %v3976_v2, 0.0 }
 0x3d9   : > { %4334 = vmatprep.mubr.f32.mxu0 %v4032_v1  ;;  %4494 = vmatprep.mubr.f32.mxu1 %v4096_v39  ;;  %v3911_v1 = vadd.f32 %v6503_v37, %v3771_v61  ;;  %v3914_v39 = vadd.f32 %v6495_v14, %v3774_v19  ;;  %v4043_v60 = vmax.f32 %v3915_v38, 0.0  ;;  %v4107_v11 = vmax.f32 %v3979_v24, 0.0 }
 0x3da   : > { %v3978_v25 = vadd.f32 %v6495_v14, %v3838_v31 }
 0x3db   : > { %v4042_v32 = vmax.f32 %v3914_v39, 0.0 }
 0x3dc   : > { %4335 = vmatmul.mubr.f32.gmra.mxu0 %v4031_v3  ;;  %4495 = vmatmul.mubr.f32.gmra.mxu1 %v4095_v26  ;;  %v3840_v3 = vmul.f32 %v6483_v20, %v3700_v62  ;;  %v4039_v26 = vmax.f32 %v3911_v1, 0.0  ;;  %v4106_v53 = vmax.f32 %v3978_v25, 0.0  ;;  %v3918_v20 = vadd.f32 %v6495_v14, %v3778_v51 }
 0x3dd   : > { %4339 = vmatprep.mubr.f32.mxu0 %v4034_v44  ;;  %4499 = vmatprep.mubr.f32.mxu1 %v4098_v27  ;;  %v3977_v44 = vadd.f32 %v6503_v37, %v3837_v33  ;;  %v3916_v27 = vadd.f32 %v6495_v14, %v3776_v43 }
 0x3de   : > { %v3980_v42 = vadd.f32 %v6495_v14, %v3840_v3  ;;  %v4046_v9 = vmax.f32 %v3918_v20, 0.0 }
 0x3df   : > { %v4044_v57 = vmax.f32 %v3916_v27, 0.0 }
 0x3e0   : > { %4340 = vmatmul.mubr.f32.gmra.mxu0 %v4033_v36  ;;  %4500 = vmatmul.mubr.f32.gmra.mxu1 %v4097_v52  ;;  %v3637_v36 = vld [vmem:[#allocation2 + $0x140] sm:$0xff]  ;;  %v3701_v52 = vld [vmem:[#allocation2 + $0x310] sm:$0xff]  ;;  %v4108_v28 = vmax.f32 %v3980_v42, 0.0 }
 0x3e1   : > { %4344 = vmatprep.mubr.f32.mxu0 %v4036_v21  ;;  %4504 = vmatprep.mubr.f32.mxu1 %v4100_v55  ;;  %v4105_v21 = vmax.f32 %v3977_v44, 0.0  ;;  %v3777_v54 = vmul.f32 %v6487_v10, %v3637_v36  ;;  %v3841_v29 = vmul.f32 %v6487_v10, %v3701_v52  ;;  %v3982_v55 = vadd.f32 %v6495_v14, %v3842_v48  ;;  %v6784_v14 = vld [vmem:[%s7054_s3] ss:$0 sm:$0xff] }
 0x3e3   : > { %v3917_v7 = vadd.f32 %v6503_v37, %v3777_v54  ;;  %v3981_v18 = vadd.f32 %v6503_v37, %v3841_v29  ;;  %v4110_v10 = vmax.f32 %v3982_v55, 0.0 }
 0x3e4   : > { %4345 = vmatmul.mubr.f32.gmra.mxu0 %v4035_v15  ;;  %4505 = vmatmul.mubr.f32.gmra.mxu1 %v4099_v50 }
 0x3e5   : > { %4349 = vmatprep.mubr.f32.mxu0 %v4038_v16  ;;  %4509 = vmatprep.mubr.f32.mxu1 %v4102_v41  ;;  %v4045_v15 = vmax.f32 %v3917_v7, 0.0  ;;  %v4109_v0 = vmax.f32 %v3981_v18, 0.0 }
 0x3e8   : > { %4350 = vmatmul.mubr.f32.gmra.mxu0 %v4037_v35  ;;  %4510 = vmatmul.mubr.f32.gmra.mxu1 %v4101_v63 }
 0x3e9   : > { %4354 = vmatprep.mubr.f32.mxu0 %v4040_v23  ;;  %4514 = vmatprep.mubr.f32.mxu1 %v4104_v58 }
 0x3ec   : > { %4355 = vmatmul.mubr.f32.gmra.mxu0 %v4039_v26  ;;  %4515 = vmatmul.mubr.f32.gmra.mxu1 %v4103_v8 }
 0x3ed   : > { %4359 = vmatprep.mubr.f32.mxu0 %v4042_v32  ;;  %4519 = vmatprep.mubr.f32.mxu1 %v4106_v53 }
 0x3f0   : > { %4360 = vmatmul.mubr.f32.gmra.mxu0 %v4041_v22  ;;  %4520 = vmatmul.mubr.f32.gmra.mxu1 %v4105_v21 }
 0x3f1   : > { %4364 = vmatprep.mubr.f32.mxu0 %v4044_v57  ;;  %4524 = vmatprep.mubr.f32.mxu1 %v4108_v28 }
 0x3f4   : > { %4365 = vmatmul.mubr.f32.gmra.mxu0 %v4043_v60  ;;  %4525 = vmatmul.mubr.f32.gmra.mxu1 %v4107_v11 }
 0x3f5   : > { %4369 = vmatprep.mubr.f32.mxu0 %v4046_v9  ;;  %4529 = vmatprep.mubr.f32.mxu1 %v4110_v10 }
 0x3f8   : > { %4370 = vmatmul.mubr.f32.gmra.mxu0 %v4045_v15  ;;  %4530 = vmatmul.mubr.f32.gmra.mxu1 %v4109_v0 }
 0x43c   : > { %v4216_v61 = vpop.f32.mrf.mxu0  ;;  %v4376_v4 = vpop.f32.mrf.mxu1 }
 0x43d   : > { %v4217_v37 = vadd.f32 %v6784_v14, %v4216_v61  ;;  %v4377_v50 = vadd.f32 %v6784_v14, %v4376_v4 }
 0x43e   : > { %v4218_v16 = vpop.f32.mrf.mxu0  ;;  %v4378_v59 = vpop.f32.mrf.mxu1 }
 0x43f   : > { %4535 = vst [vmem:[%s7057_s6] sm:$0xff] %v4217_v37  ;;  %4567 = vst [vmem:[%s7057_s6 + $0x100] sm:$0xff] %v4377_v50 }
 0x440   : > { %v4221_v19 = vpop.f32.mrf.mxu0  ;;  %v4381_v45 = vpop.f32.mrf.mxu1 }
 0x441   : > { %v4222_v41 = vadd.f32 %v6784_v14, %v4221_v19  ;;  %v4382_v6 = vadd.f32 %v6784_v14, %v4381_v45 }
 0x442   : > { %v4223_v2 = vpop.f32.mrf.mxu0  ;;  %v4383_v31 = vpop.f32.mrf.mxu1 }
 0x443   : > { %4536 = vst [vmem:[%s7057_s6 + $0x8] sm:$0xff] %v4222_v41  ;;  %4568 = vst [vmem:[%s7057_s6 + $0x108] sm:$0xff] %v4382_v6 }
 0x444   : > { %v4226_v13 = vpop.f32.mrf.mxu0  ;;  %v4386_v5 = vpop.f32.mrf.mxu1 }
 0x445   : > { %v4227_v62 = vadd.f32 %v6784_v14, %v4226_v13  ;;  %v4387_v35 = vadd.f32 %v6784_v14, %v4386_v5 }
 0x446   : > { %v4228_v1 = vpop.f32.mrf.mxu0  ;;  %v4388_v17 = vpop.f32.mrf.mxu1 }
 0x447   : > { %4537 = vst [vmem:[%s7057_s6 + $0x10] sm:$0xff] %v4227_v62  ;;  %4569 = vst [vmem:[%s7057_s6 + $0x110] sm:$0xff] %v4387_v35 }
 0x448   : > { %v4231_v12 = vpop.f32.mrf.mxu0  ;;  %v4391_v63 = vpop.f32.mrf.mxu1 }
 0x449   : > { %v4232_v39 = vadd.f32 %v6784_v14, %v4231_v12  ;;  %v4392_v33 = vadd.f32 %v6784_v14, %v4391_v63 }
 0x44a   : > { %v4233_v43 = vpop.f32.mrf.mxu0  ;;  %v4393_v56 = vpop.f32.mrf.mxu1 }
 0x44b   : > { %4538 = vst [vmem:[%s7057_s6 + $0x18] sm:$0xff] %v4232_v39  ;;  %4570 = vst [vmem:[%s7057_s6 + $0x118] sm:$0xff] %v4392_v33 }
 0x44c   : > { %v4236_v23 = vpop.f32.mrf.mxu0  ;;  %v4396_v58 = vpop.f32.mrf.mxu1 }
 0x44d   : > { %v4237_v25 = vadd.f32 %v6784_v14, %v4236_v23  ;;  %v4397_v3 = vadd.f32 %v6784_v14, %v4396_v58 }
 0x44e   : > { %v4238_v34 = vpop.f32.mrf.mxu0  ;;  %v4398_v30 = vpop.f32.mrf.mxu1 }
 0x44f   : > { %4539 = vst [vmem:[%s7057_s6 + $0x20] sm:$0xff] %v4237_v25  ;;  %4571 = vst [vmem:[%s7057_s6 + $0x120] sm:$0xff] %v4397_v3 }
 0x450   : > { %v4241_v49 = vpop.f32.mrf.mxu0  ;;  %v4401_v26 = vpop.f32.mrf.mxu1 }
 0x451   : > { %v4242_v8 = vadd.f32 %v6784_v14, %v4241_v49  ;;  %v4402_v47 = vadd.f32 %v6784_v14, %v4401_v26 }
 0x452   : > { %v4243_v46 = vpop.f32.mrf.mxu0  ;;  %v4403_v32 = vpop.f32.mrf.mxu1 }
 0x453   : > { %4540 = vst [vmem:[%s7057_s6 + $0x28] sm:$0xff] %v4242_v8  ;;  %4572 = vst [vmem:[%s7057_s6 + $0x128] sm:$0xff] %v4402_v47 }
 0x454   : > { %v4246_v44 = vpop.f32.mrf.mxu0  ;;  %v4406_v27 = vpop.f32.mrf.mxu1 }
 0x455   : > { %v4247_v40 = vadd.f32 %v6784_v14, %v4246_v44  ;;  %v4407_v53 = vadd.f32 %v6784_v14, %v4406_v27 }
 0x456   : > { %v4248_v42 = vpop.f32.mrf.mxu0  ;;  %v4408_v51 = vpop.f32.mrf.mxu1 }
 0x457   : > { %4541 = vst [vmem:[%s7057_s6 + $0x30] sm:$0xff] %v4247_v40  ;;  %4573 = vst [vmem:[%s7057_s6 + $0x130] sm:$0xff] %v4407_v53 }
 0x458   : > { %v4251_v48 = vpop.f32.mrf.mxu0  ;;  %v4411_v36 = vpop.f32.mrf.mxu1 }
 0x459   : > { %v4252_v52 = vadd.f32 %v6784_v14, %v4251_v48  ;;  %v4412_v22 = vadd.f32 %v6784_v14, %v4411_v36 }
 0x45a   : > { %v4253_v38 = vpop.f32.mrf.mxu0  ;;  %v4413_v21 = vpop.f32.mrf.mxu1 }
 0x45b   : > { %4542 = vst [vmem:[%s7057_s6 + $0x38] sm:$0xff] %v4252_v52  ;;  %4574 = vst [vmem:[%s7057_s6 + $0x138] sm:$0xff] %v4412_v22 }
 0x45c   : > { %v4256_v24 = vpop.f32.mrf.mxu0  ;;  %v4416_v54 = vpop.f32.mrf.mxu1 }
 0x45d   : > { %v4257_v29 = vadd.f32 %v6784_v14, %v4256_v24  ;;  %v4417_v57 = vadd.f32 %v6784_v14, %v4416_v54 }
 0x45e   : > { %v4258_v28 = vpop.f32.mrf.mxu0  ;;  %v4418_v20 = vpop.f32.mrf.mxu1 }
 0x45f   : > { %4543 = vst [vmem:[%s7057_s6 + $0x40] sm:$0xff] %v4257_v29  ;;  %4575 = vst [vmem:[%s7057_s6 + $0x140] sm:$0xff] %v4417_v57 }
 0x460   : > { %v4261_v55 = vpop.f32.mrf.mxu0  ;;  %v4421_v60 = vpop.f32.mrf.mxu1 }
 0x461   : > { %v4262_v11 = vadd.f32 %v6784_v14, %v4261_v55  ;;  %v4422_v7 = vadd.f32 %v6784_v14, %v4421_v60 }
 0x462   : > { %v4263_v18 = vpop.f32.mrf.mxu0  ;;  %v4423_v9 = vpop.f32.mrf.mxu1 }
 0x463   : > { %4544 = vst [vmem:[%s7057_s6 + $0x48] sm:$0xff] %v4262_v11  ;;  %4576 = vst [vmem:[%s7057_s6 + $0x148] sm:$0xff] %v4422_v7 }
 0x464   : > { %v4266_v10 = vpop.f32.mrf.mxu0  ;;  %v4426_v15 = vpop.f32.mrf.mxu1 }
 0x465   : > { %v4267_v0 = vadd.f32 %v6784_v14, %v4266_v10  ;;  %v4427_v61 = vadd.f32 %v6784_v14, %v4426_v15 }
 0x466   : > { %v4268_v4 = vpop.f32.mrf.mxu0  ;;  %v4428_v37 = vpop.f32.mrf.mxu1 }
 0x467   : > { %4545 = vst [vmem:[%s7057_s6 + $0x50] sm:$0xff] %v4267_v0  ;;  %4577 = vst [vmem:[%s7057_s6 + $0x150] sm:$0xff] %v4427_v61 }
 0x468   : > { %v4271_v50 = vpop.f32.mrf.mxu0  ;;  %v4431_v16 = vpop.f32.mrf.mxu1 }
 0x469   : > { %v4272_v59 = vadd.f32 %v6784_v14, %v4271_v50  ;;  %v4432_v19 = vadd.f32 %v6784_v14, %v4431_v16 }
 0x46a   : > { %v4273_v45 = vpop.f32.mrf.mxu0  ;;  %v4433_v41 = vpop.f32.mrf.mxu1 }
 0x46b   : > { %4546 = vst [vmem:[%s7057_s6 + $0x58] sm:$0xff] %v4272_v59  ;;  %4578 = vst [vmem:[%s7057_s6 + $0x158] sm:$0xff] %v4432_v19 }
 0x46c   : > { %v4276_v6 = vpop.f32.mrf.mxu0  ;;  %v4436_v2 = vpop.f32.mrf.mxu1 }
 0x46d   : > { %v4277_v31 = vadd.f32 %v6784_v14, %v4276_v6  ;;  %v4437_v13 = vadd.f32 %v6784_v14, %v4436_v2 }
 0x46e   : > { %v4278_v5 = vpop.f32.mrf.mxu0  ;;  %v4438_v62 = vpop.f32.mrf.mxu1 }
 0x46f   : > { %4547 = vst [vmem:[%s7057_s6 + $0x60] sm:$0xff] %v4277_v31  ;;  %4579 = vst [vmem:[%s7057_s6 + $0x160] sm:$0xff] %v4437_v13 }
 0x470   : > { %v4281_v35 = vpop.f32.mrf.mxu0  ;;  %v4441_v1 = vpop.f32.mrf.mxu1 }
 0x471   : > { %v4282_v17 = vadd.f32 %v6784_v14, %v4281_v35  ;;  %v4442_v12 = vadd.f32 %v6784_v14, %v4441_v1 }
 0x472   : > { %v4283_v63 = vpop.f32.mrf.mxu0  ;;  %v4443_v39 = vpop.f32.mrf.mxu1 }
 0x473   : > { %4548 = vst [vmem:[%s7057_s6 + $0x68] sm:$0xff] %v4282_v17  ;;  %4580 = vst [vmem:[%s7057_s6 + $0x168] sm:$0xff] %v4442_v12 }
 0x474   : > { %v4286_v33 = vpop.f32.mrf.mxu0  ;;  %v4446_v43 = vpop.f32.mrf.mxu1 }
 0x475   : > { %v4287_v56 = vadd.f32 %v6784_v14, %v4286_v33  ;;  %v4447_v23 = vadd.f32 %v6784_v14, %v4446_v43 }
 0x476   : > { %v4288_v58 = vpop.f32.mrf.mxu0  ;;  %v4448_v25 = vpop.f32.mrf.mxu1 }
 0x477   : > { %4549 = vst [vmem:[%s7057_s6 + $0x70] sm:$0xff] %v4287_v56  ;;  %4581 = vst [vmem:[%s7057_s6 + $0x170] sm:$0xff] %v4447_v23 }
 0x478   : > { %v4291_v3 = vpop.f32.mrf.mxu0  ;;  %v4451_v34 = vpop.f32.mrf.mxu1 }
 0x479   : > { %v4292_v30 = vadd.f32 %v6784_v14, %v4291_v3  ;;  %v4452_v49 = vadd.f32 %v6784_v14, %v4451_v34 }
 0x47a   : > { %v4293_v26 = vpop.f32.mrf.mxu0  ;;  %v4453_v8 = vpop.f32.mrf.mxu1 }
 0x47b   : > { %4550 = vst [vmem:[%s7057_s6 + $0x78] sm:$0xff] %v4292_v30  ;;  %4582 = vst [vmem:[%s7057_s6 + $0x178] sm:$0xff] %v4452_v49 }
 0x47c   : > { %v4296_v47 = vpop.f32.mrf.mxu0  ;;  %v4456_v46 = vpop.f32.mrf.mxu1 }
 0x47d   : > { %v4297_v32 = vadd.f32 %v6784_v14, %v4296_v47  ;;  %v4457_v44 = vadd.f32 %v6784_v14, %v4456_v46 }
 0x47e   : > { %v4298_v27 = vpop.f32.mrf.mxu0  ;;  %v4458_v40 = vpop.f32.mrf.mxu1 }
 0x47f   : > { %4551 = vst [vmem:[%s7057_s6 + $0x80] sm:$0xff] %v4297_v32  ;;  %4583 = vst [vmem:[%s7057_s6 + $0x180] sm:$0xff] %v4457_v44 }
 0x480   : > { %v4301_v53 = vpop.f32.mrf.mxu0  ;;  %v4461_v42 = vpop.f32.mrf.mxu1 }
 0x481   : > { %v4302_v51 = vadd.f32 %v6784_v14, %v4301_v53  ;;  %v4462_v48 = vadd.f32 %v6784_v14, %v4461_v42 }
 0x482   : > { %v4303_v36 = vpop.f32.mrf.mxu0  ;;  %v4463_v52 = vpop.f32.mrf.mxu1 }
 0x483   : > { %4552 = vst [vmem:[%s7057_s6 + $0x88] sm:$0xff] %v4302_v51  ;;  %4584 = vst [vmem:[%s7057_s6 + $0x188] sm:$0xff] %v4462_v48 }
 0x484   : > { %v4306_v22 = vpop.f32.mrf.mxu0  ;;  %v4466_v38 = vpop.f32.mrf.mxu1 }
 0x485   : > { %v4307_v21 = vadd.f32 %v6784_v14, %v4306_v22  ;;  %v4467_v24 = vadd.f32 %v6784_v14, %v4466_v38 }
 0x486   : > { %v4308_v54 = vpop.f32.mrf.mxu0  ;;  %v4468_v29 = vpop.f32.mrf.mxu1 }
 0x487   : > { %4553 = vst [vmem:[%s7057_s6 + $0x90] sm:$0xff] %v4307_v21  ;;  %4585 = vst [vmem:[%s7057_s6 + $0x190] sm:$0xff] %v4467_v24 }
 0x488   : > { %v4311_v57 = vpop.f32.mrf.mxu0  ;;  %v4471_v28 = vpop.f32.mrf.mxu1 }
 0x489   : > { %v4312_v20 = vadd.f32 %v6784_v14, %v4311_v57  ;;  %v4472_v55 = vadd.f32 %v6784_v14, %v4471_v28 }
 0x48a   : > { %v4313_v60 = vpop.f32.mrf.mxu0  ;;  %v4473_v11 = vpop.f32.mrf.mxu1 }
 0x48b   : > { %4554 = vst [vmem:[%s7057_s6 + $0x98] sm:$0xff] %v4312_v20  ;;  %4586 = vst [vmem:[%s7057_s6 + $0x198] sm:$0xff] %v4472_v55 }
 0x48c   : > { %v4316_v7 = vpop.f32.mrf.mxu0  ;;  %v4476_v18 = vpop.f32.mrf.mxu1 }
 0x48d   : > { %v4317_v9 = vadd.f32 %v6784_v14, %v4316_v7  ;;  %v4477_v10 = vadd.f32 %v6784_v14, %v4476_v18 }
 0x48e   : > { %v4318_v15 = vpop.f32.mrf.mxu0  ;;  %v4478_v0 = vpop.f32.mrf.mxu1 }
 0x48f   : > { %4555 = vst [vmem:[%s7057_s6 + $0xa0] sm:$0xff] %v4317_v9  ;;  %4587 = vst [vmem:[%s7057_s6 + $0x1a0] sm:$0xff] %v4477_v10 }
 0x490   : > { %v4321_v61 = vpop.f32.mrf.mxu0  ;;  %v4481_v4 = vpop.f32.mrf.mxu1 }
 0x491   : > { %v4322_v37 = vadd.f32 %v6784_v14, %v4321_v61  ;;  %v4482_v50 = vadd.f32 %v6784_v14, %v4481_v4 }
 0x492   : > { %v4323_v16 = vpop.f32.mrf.mxu0  ;;  %v4483_v59 = vpop.f32.mrf.mxu1 }
 0x493   : > { %4556 = vst [vmem:[%s7057_s6 + $0xa8] sm:$0xff] %v4322_v37  ;;  %4588 = vst [vmem:[%s7057_s6 + $0x1a8] sm:$0xff] %v4482_v50 }
 0x494   : > { %v4326_v19 = vpop.f32.mrf.mxu0  ;;  %v4486_v45 = vpop.f32.mrf.mxu1 }
 0x495   : > { %v4327_v41 = vadd.f32 %v6784_v14, %v4326_v19  ;;  %v4487_v6 = vadd.f32 %v6784_v14, %v4486_v45 }
 0x496   : > { %v4328_v2 = vpop.f32.mrf.mxu0  ;;  %v4488_v31 = vpop.f32.mrf.mxu1 }
 0x497   : > { %4557 = vst [vmem:[%s7057_s6 + $0xb0] sm:$0xff] %v4327_v41  ;;  %4589 = vst [vmem:[%s7057_s6 + $0x1b0] sm:$0xff] %v4487_v6 }
 0x498   : > { %v4331_v13 = vpop.f32.mrf.mxu0  ;;  %v4491_v5 = vpop.f32.mrf.mxu1 }
 0x499   : > { %v4332_v62 = vadd.f32 %v6784_v14, %v4331_v13  ;;  %v4492_v35 = vadd.f32 %v6784_v14, %v4491_v5 }
 0x49a   : > { %v4333_v1 = vpop.f32.mrf.mxu0  ;;  %v4493_v17 = vpop.f32.mrf.mxu1 }
 0x49b   : > { %4558 = vst [vmem:[%s7057_s6 + $0xb8] sm:$0xff] %v4332_v62  ;;  %4590 = vst [vmem:[%s7057_s6 + $0x1b8] sm:$0xff] %v4492_v35 }
 0x49c   : > { %v4336_v12 = vpop.f32.mrf.mxu0  ;;  %v4496_v63 = vpop.f32.mrf.mxu1 }
 0x49d   : > { %v4337_v39 = vadd.f32 %v6784_v14, %v4336_v12  ;;  %v4497_v33 = vadd.f32 %v6784_v14, %v4496_v63 }
 0x49e   : > { %v4338_v43 = vpop.f32.mrf.mxu0  ;;  %v4498_v56 = vpop.f32.mrf.mxu1 }
 0x49f   : > { %4559 = vst [vmem:[%s7057_s6 + $0xc0] sm:$0xff] %v4337_v39  ;;  %4591 = vst [vmem:[%s7057_s6 + $0x1c0] sm:$0xff] %v4497_v33 }
 0x4a0   : > { %v4341_v23 = vpop.f32.mrf.mxu0  ;;  %v4501_v58 = vpop.f32.mrf.mxu1 }
 0x4a1   : > { %v4342_v25 = vadd.f32 %v6784_v14, %v4341_v23  ;;  %v4502_v3 = vadd.f32 %v6784_v14, %v4501_v58 }
 0x4a2   : > { %v4343_v34 = vpop.f32.mrf.mxu0  ;;  %v4503_v30 = vpop.f32.mrf.mxu1 }
 0x4a3   : > { %4560 = vst [vmem:[%s7057_s6 + $0xc8] sm:$0xff] %v4342_v25  ;;  %4592 = vst [vmem:[%s7057_s6 + $0x1c8] sm:$0xff] %v4502_v3 }
 0x4a4   : > { %v4346_v49 = vpop.f32.mrf.mxu0  ;;  %v4506_v26 = vpop.f32.mrf.mxu1 }
 0x4a5   : > { %v4347_v8 = vadd.f32 %v6784_v14, %v4346_v49  ;;  %v4507_v47 = vadd.f32 %v6784_v14, %v4506_v26 }
 0x4a6   : > { %v4348_v46 = vpop.f32.mrf.mxu0  ;;  %v4508_v32 = vpop.f32.mrf.mxu1 }
 0x4a7   : > { %4561 = vst [vmem:[%s7057_s6 + $0xd0] sm:$0xff] %v4347_v8  ;;  %4593 = vst [vmem:[%s7057_s6 + $0x1d0] sm:$0xff] %v4507_v47 }
 0x4a8   : > { %v4351_v44 = vpop.f32.mrf.mxu0  ;;  %v4511_v27 = vpop.f32.mrf.mxu1 }
 0x4a9   : > { %v4352_v40 = vadd.f32 %v6784_v14, %v4351_v44  ;;  %v4512_v53 = vadd.f32 %v6784_v14, %v4511_v27 }
 0x4aa   : > { %v4353_v42 = vpop.f32.mrf.mxu0  ;;  %v4513_v51 = vpop.f32.mrf.mxu1 }
 0x4ab   : > { %4562 = vst [vmem:[%s7057_s6 + $0xd8] sm:$0xff] %v4352_v40  ;;  %4594 = vst [vmem:[%s7057_s6 + $0x1d8] sm:$0xff] %v4512_v53 }
 0x4ac   : > { %v4356_v48 = vpop.f32.mrf.mxu0  ;;  %v4516_v36 = vpop.f32.mrf.mxu1 }
 0x4ad   : > { %v4357_v52 = vadd.f32 %v6784_v14, %v4356_v48  ;;  %v4517_v22 = vadd.f32 %v6784_v14, %v4516_v36 }
 0x4ae   : > { %v4358_v38 = vpop.f32.mrf.mxu0  ;;  %v4518_v21 = vpop.f32.mrf.mxu1 }
 0x4af   : > { %4563 = vst [vmem:[%s7057_s6 + $0xe0] sm:$0xff] %v4357_v52  ;;  %4595 = vst [vmem:[%s7057_s6 + $0x1e0] sm:$0xff] %v4517_v22 }
 0x4b0   : > { %v4361_v24 = vpop.f32.mrf.mxu0  ;;  %v4521_v54 = vpop.f32.mrf.mxu1 }
 0x4b1   : > { %v4362_v29 = vadd.f32 %v6784_v14, %v4361_v24  ;;  %v4522_v57 = vadd.f32 %v6784_v14, %v4521_v54 }
 0x4b2   : > { %v4363_v28 = vpop.f32.mrf.mxu0  ;;  %v4523_v20 = vpop.f32.mrf.mxu1 }
 0x4b3   : > { %4564 = vst [vmem:[%s7057_s6 + $0xe8] sm:$0xff] %v4362_v29  ;;  %4596 = vst [vmem:[%s7057_s6 + $0x1e8] sm:$0xff] %v4522_v57 }
 0x4b4   : > { %v4366_v55 = vpop.f32.mrf.mxu0  ;;  %v4526_v60 = vpop.f32.mrf.mxu1 }
 0x4b5   : > { %v4367_v11 = vadd.f32 %v6784_v14, %v4366_v55  ;;  %v4527_v7 = vadd.f32 %v6784_v14, %v4526_v60 }
 0x4b6   : > { %v4368_v18 = vpop.f32.mrf.mxu0  ;;  %v4528_v9 = vpop.f32.mrf.mxu1 }
 0x4b7   : > { %4565 = vst [vmem:[%s7057_s6 + $0xf0] sm:$0xff] %v4367_v11  ;;  %4597 = vst [vmem:[%s7057_s6 + $0x1f0] sm:$0xff] %v4527_v7 }
 0x4b8   : > { %v4371_v10 = vpop.f32.mrf.mxu0  ;;  %v4531_v15 = vpop.f32.mrf.mxu1 }
 0x4b9   : > { %v4372_v0 = vadd.f32 %v6784_v14, %v4371_v10  ;;  %v4532_v61 = vadd.f32 %v6784_v14, %v4531_v15 }
 0x4ba   : > { %v4373_v4 = vpop.f32.mrf.mxu0  ;;  %v4533_v37 = vpop.f32.mrf.mxu1 }
 0x4bb   : > { %4566 = vst [vmem:[%s7057_s6 + $0xf8] sm:$0xff] %v4372_v0  ;;  %4598 = vst [vmem:[%s7057_s6 + $0x1f8] sm:$0xff] %v4532_v61 }
 0x4bc PF: > { %s16_s23 = sadd.s32 1, %s4968_s23   ;;  %s7142_s21 = smov %s4964_s22 }
 0x4bd   : > { %p13_p8 = scmp.ge.s32.totalorder %s16_s23, 4   ;;  %s7143_s22 = smov %s7145_s24 }
 0x4bf   :  { %15 = sbr.rel (!%p13_p8) target bundleno = 2 (0x2), region = 92 }

</bundles_post_ra>
